<compile_context>
chip_gen: v7x
topology: tpu7x:2x2x1
jax: 0.10.0
libtpu: 0.0.40
codegen_flags: <defaults>
</compile_context>

<pallas_src>
import functools

import jax
import jax.numpy as jnp
from jax.experimental import pallas as pl
from jax.experimental.pallas import tpu as pltpu


_LANE = 128


# ---------------------------------------------------------------------------
# Small helpers (padding / tile selection)
# ---------------------------------------------------------------------------
def _round_up(x, m):
    return (x + m - 1) // m * m


def _node_pad(n):
    """Node count appears as both M (sublane) and K (lane) of the adjacency
    matmuls; pad once, at setup, to a lane-friendly multiple."""
    if n < 512:
        return _round_up(n, _LANE)
    return _round_up(n, 512)


def _pick_block(dim, pref):
    """Largest block <= pref that divides `dim` (dims here are 128-multiples,
    or small enough to be a single block)."""
    if dim <= pref:
        return dim
    b = (min(pref, dim) // _LANE) * _LANE
    while b > _LANE and dim % b != 0:
        b -= _LANE
    return b


def _pad2d(x, rows, cols):
    r, c = x.shape
    if (r, c) == (rows, cols):
        return x
    return jnp.pad(x, ((0, rows - r), (0, cols - c)))


# ---------------------------------------------------------------------------
# Pallas kernels
# ---------------------------------------------------------------------------
def _matmul_single_k_kernel(a_ref, b_ref, o_ref):
    # K fits in one block: no scratch accumulator, write MXU result directly.
    o_ref[...] = jnp.dot(
        a_ref[...], b_ref[...], preferred_element_type=jnp.float32
    ).astype(o_ref.dtype)


def _matmul_acc_kernel(a_ref, b_ref, o_ref, acc_ref):
    @pl.when(pl.program_id(2) == 0)
    def _init():
        acc_ref[...] = jnp.zeros_like(acc_ref)

    acc_ref[...] += jnp.dot(
        a_ref[...], b_ref[...], preferred_element_type=jnp.float32
    )

    @pl.when(pl.program_id(2) == pl.num_programs(2) - 1)
    def _store():
        o_ref[...] = acc_ref[...].astype(o_ref.dtype)


def _make_dual_mm_single_step_kernel(hp):
    """Whole K in one block: write [A1@B | A2@B] slab directly (no scratch)."""
    def kernel(a1_ref, a2_ref, b_ref, o_ref):
        b = b_ref[...]                     # shared RHS tile, loaded once
        o_ref[:, :hp] = jnp.dot(
            a1_ref[...], b, preferred_element_type=jnp.float32
        ).astype(o_ref.dtype)
        o_ref[:, hp:] = jnp.dot(
            a2_ref[...], b, preferred_element_type=jnp.float32
        ).astype(o_ref.dtype)
    return kernel


def _make_dual_mm_acc_kernel(bk, hp, b_resident):
    """K-tiled dual matmul into a single (bm, 2*hp) f32 accumulator.

    If `b_resident`, the whole RHS lives in VMEM (fetched once for the entire
    grid) and the current K slice is taken inside the kernel."""
    def kernel(a1_ref, a2_ref, b_ref, o_ref, acc_ref):
        k = pl.program_id(1)

        @pl.when(k == 0)
        def _init():
            acc_ref[...] = jnp.zeros_like(acc_ref)

        if b_resident:
            start = pl.multiple_of(k * bk, bk)
            b = b_ref[pl.ds(start, bk), :]
        else:
            b = b_ref[...]

        acc_ref[:, :hp] += jnp.dot(a1_ref[...], b,
                                   preferred_element_type=jnp.float32)
        acc_ref[:, hp:] += jnp.dot(a2_ref[...], b,
                                   preferred_element_type=jnp.float32)

        @pl.when(k == pl.num_programs(1) - 1)
        def _store():
            o_ref[...] = acc_ref[...].astype(o_ref.dtype)

    return kernel


def _make_fused_concat_linear_kernel(n_seg):
    """y = sum_s h_s @ W_s + b, fusing the concat + fc_out matmul."""
    def kernel(*refs):
        h_refs = refs[:n_seg]
        w_refs = refs[n_seg:2 * n_seg]
        b_ref = refs[2 * n_seg]
        o_ref = refs[2 * n_seg + 1]
        acc = jnp.dot(h_refs[0][...], w_refs[0][...],
                      preferred_element_type=jnp.float32)
        for s in range(1, n_seg):
            acc = acc + jnp.dot(h_refs[s][...], w_refs[s][...],
                                preferred_element_type=jnp.float32)
        o_ref[...] = (acc + b_ref[...].astype(jnp.float32)).astype(o_ref.dtype)
    return kernel


# ---------------------------------------------------------------------------
# Pallas wrappers
# ---------------------------------------------------------------------------
def pallas_matmul(a, b, *, out_dtype=None, bm_pref=512, bn_pref=256,
                  bk_pref=1024):
    """C = A @ B, tiled, f32 accumulation.  Pads to 128-multiples internally
    (a no-op when inputs are already tile-aligned)."""
    M, K = a.shape
    K2, N = b.shape
    assert K == K2, (a.shape, b.shape)
    out_dtype = out_dtype or a.dtype

    Mp, Kp, Np = _round_up(M, _LANE), _round_up(K, _LANE), _round_up(N, _LANE)
    a = _pad2d(a, Mp, Kp)
    b = _pad2d(b, Kp, Np)
    bm = _pick_block(Mp, bm_pref)
    bk = _pick_block(Kp, bk_pref)
    bn = _pick_block(Np, bn_pref)

    if Kp == bk:
        kernel = _matmul_single_k_kernel
        grid = (Mp // bm, Np // bn)
        in_specs = [pl.BlockSpec((bm, bk), lambda i, j: (i, 0)),
                    pl.BlockSpec((bk, bn), lambda i, j: (0, j))]
        out_spec = pl.BlockSpec((bm, bn), lambda i, j: (i, j))
        scratch = []
        dims = ("parallel", "parallel")
    else:
        kernel = _matmul_acc_kernel
        grid = (Mp // bm, Np // bn, Kp // bk)
        in_specs = [pl.BlockSpec((bm, bk), lambda i, j, k: (i, k)),
                    pl.BlockSpec((bk, bn), lambda i, j, k: (k, j))]
        out_spec = pl.BlockSpec((bm, bn), lambda i, j, k: (i, j))
        scratch = [pltpu.VMEM((bm, bn), jnp.float32)]
        dims = ("parallel", "parallel", "arbitrary")

    out = pl.pallas_call(
        kernel,
        out_shape=jax.ShapeDtypeStruct((Mp, Np), out_dtype),
        grid_spec=pltpu.PrefetchScalarGridSpec(
            num_scalar_prefetch=0,
            grid=grid,
            in_specs=in_specs,
            out_specs=out_spec,
            scratch_shapes=scratch),
        compiler_params=pltpu.CompilerParams(dimension_semantics=dims),
    )(a, b)
    return out[:M, :N] if (Mp, Np) != (M, N) else out


def pallas_dual_matmul(a1, a2, b, *, out_dtype=None, bm_pref=512, bk_pref=1024,
                       b_resident_budget_bytes=6 * 1024 * 1024):
    """[A1 @ B | A2 @ B] emitted as a single lane-dense (M, 2*Hp) slab from one
    pallas_call with a shared RHS tile.

    Inputs must be pre-padded (M, K, Hp multiples of 128) -- this is done once
    at setup for the adjacencies, keeping the per-forward hot path free of
    extra HBM convert/pad passes."""
    M, K = a1.shape
    assert a1.shape == a2.shape, (a1.shape, a2.shape)
    K2, Hp = b.shape
    assert K == K2, (a1.shape, b.shape)
    assert M % _LANE == 0 and K % _LANE == 0 and Hp % _LANE == 0, (M, K, Hp)
    out_dtype = out_dtype or b.dtype

    bm = _pick_block(M, bm_pref)
    bk = _pick_block(K, bk_pref)
    nk = K // bk
    a_itemsize = jnp.dtype(a1.dtype).itemsize
    b_itemsize = jnp.dtype(b.dtype).itemsize
    o_itemsize = jnp.dtype(out_dtype).itemsize

    # Hold the whole shared RHS resident in VMEM across the K loop when it
    # fits -> it is fetched once total instead of once per M tile.
    b_resident = (nk > 1) and (K * Hp * b_itemsize <= b_resident_budget_bytes)

    out_shape = jax.ShapeDtypeStruct((M, 2 * Hp), out_dtype)

    if nk == 1:
        grid = (M // bm,)
        in_specs = [pl.BlockSpec((bm, K), lambda i: (i, 0)),
                    pl.BlockSpec((bm, K), lambda i: (i, 0)),
                    pl.BlockSpec((K, Hp), lambda i: (0, 0))]
        out_specs = pl.BlockSpec((bm, 2 * Hp), lambda i: (i, 0))
        kernel = _make_dual_mm_single_step_kernel(Hp)
        scratch = []
        dims = ("parallel",)
    else:
        grid = (M // bm, nk)
        b_spec = (pl.BlockSpec((K, Hp), lambda i, k: (0, 0)) if b_resident
                  else pl.BlockSpec((bk, Hp), lambda i, k: (k, 0)))
        in_specs = [pl.BlockSpec((bm, bk), lambda i, k: (i, k)),
                    pl.BlockSpec((bm, bk), lambda i, k: (i, k)),
                    b_spec]
        out_specs = pl.BlockSpec((bm, 2 * Hp), lambda i, k: (i, 0))
        kernel = _make_dual_mm_acc_kernel(bk, Hp, b_resident)
        scratch = [pltpu.VMEM((bm, 2 * Hp), jnp.float32)]
        dims = ("parallel", "arbitrary")

    # Explicit scoped-VMEM budget so a tile config tuned on v6e does not
    # silently break on v7x (64 MiB physical, 32 MiB default scoped).
    kblk = K if nk == 1 else bk
    b_rows = K if (nk == 1 or b_resident) else bk
    footprint = (2 * 2 * bm * kblk * a_itemsize        # a1, a2 (double-buffered)
                 + 2 * b_rows * Hp * b_itemsize        # shared RHS
                 + 2 * bm * 2 * Hp * o_itemsize        # output slab
                 + (0 if nk == 1 else bm * 2 * Hp * 4))  # f32 accumulator
    vmem_limit = int(min(max(footprint * 1.25 + (4 << 20), 32 << 20), 48 << 20))

    return pl.pallas_call(
        kernel,
        out_shape=out_shape,
        grid_spec=pltpu.PrefetchScalarGridSpec(
            num_scalar_prefetch=0,
            grid=grid,
            in_specs=in_specs,
            out_specs=out_specs,
            scratch_shapes=scratch),
        compiler_params=pltpu.CompilerParams(
            dimension_semantics=dims, vmem_limit_bytes=vmem_limit),
    )(a1, a2, b)


def pallas_fused_concat_linear(hs, w_segs, bias2d, *, out_dtype,
                               bm_pref=512, bn_pref=256):
    """y = concat(hs, axis=1) @ concat(w_segs, axis=0) + bias, without ever
    materializing the concat buffer.  Operands must be pre-padded."""
    n_seg = len(hs)
    assert len(w_segs) == n_seg
    M = hs[0].shape[0]
    N = w_segs[0].shape[1]
    for h, w in zip(hs, w_segs):
        assert h.shape[0] == M and w.shape[1] == N and h.shape[1] == w.shape[0]
        assert h.shape[1] % _LANE == 0
    assert M % _LANE == 0 and N % _LANE == 0 and bias2d.shape == (1, N)

    bm = _pick_block(M, bm_pref)
    bn = _pick_block(N, bn_pref)

    in_specs = (
        [pl.BlockSpec((bm, h.shape[1]), lambda i, j: (i, 0)) for h in hs]
        + [pl.BlockSpec((w.shape[0], bn), lambda i, j: (0, j)) for w in w_segs]
        + [pl.BlockSpec((1, bn), lambda i, j: (0, j))]
    )

    return pl.pallas_call(
        _make_fused_concat_linear_kernel(n_seg),
        out_shape=jax.ShapeDtypeStruct((M, N), out_dtype),
        grid_spec=pltpu.PrefetchScalarGridSpec(
            num_scalar_prefetch=0,
            grid=(M // bm, N // bn),
            in_specs=in_specs,
            out_specs=pl.BlockSpec((bm, bn), lambda i, j: (i, j)),
            scratch_shapes=[]),
        compiler_params=pltpu.CompilerParams(
            dimension_semantics=("parallel", "parallel")),
    )(*hs, *w_segs, bias2d)


# ---------------------------------------------------------------------------
# H2GCN model (forward only)
# ---------------------------------------------------------------------------
def init_h2gcn_params(key, in_channels, hidden_channels, out_channels,
                      num_layers=1, dtype=jnp.float32):
    """Deterministic init mimicking nn.Linear defaults (uniform +-1/sqrt(fan_in))."""
    total_concat_dim = (2 * num_layers + 1) * hidden_channels
    k1, k2, k3 = jax.random.split(key, 3)
    bound1 = 1.0 / jnp.sqrt(in_channels)
    bound2 = 1.0 / jnp.sqrt(total_concat_dim)
    # store weights pre-transposed so kernels compute x @ W^T directly
    w1_t = jax.random.uniform(k1, (in_channels, hidden_channels), dtype,
                              minval=-bound1, maxval=bound1)
    w_out_t = jax.random.uniform(k2, (total_concat_dim, out_channels), dtype,
                                 minval=-bound2, maxval=bound2)
    b_out = jax.random.uniform(k3, (out_channels,), dtype,
                               minval=-bound2, maxval=bound2)
    return {"w1_t": w1_t, "w_out_t": w_out_t, "b_out": b_out}


def prepare_h2gcn_state(params, adj1, adj2, *, num_layers=1,
                        compute_dtype=jnp.bfloat16):
    """One-time preprocessing hoisted out of the per-forward hot path:
      * cast + zero-pad the constant dense adjacencies to tile-aligned shapes
        (so the bandwidth-bound kernels stream them exactly once per forward);
      * pre-cast fc1 weight; pre-split / pre-cast / pre-pad fc_out weight into
        per-operand slabs matching [h0, (h1|h2)_layer1, ...];
      * pre-pad the fc_out bias."""
    n = adj1.shape[0]
    assert adj1.shape == (n, n) and adj2.shape == (n, n)
    in_ch, hidden = params["w1_t"].shape
    assert params["w_out_t"].shape[0] == (2 * num_layers + 1) * hidden

    cd = jnp.dtype(compute_dtype)
    npad = _node_pad(n)
    cp = _round_up(in_ch, _LANE)
    hp = _round_up(hidden, _LANE)
    op = _round_up(params["w_out_t"].shape[1], _LANE)

    adj1_p = _pad2d(adj1.astype(cd), npad, npad)
    adj2_p = _pad2d(adj2.astype(cd), npad, npad)
    w1_p = _pad2d(params["w1_t"].astype(cd), cp, hp)

    w_out = params["w_out_t"]
    segs = [_pad2d(w_out[:hidden].astype(cd), hp, op)]               # h0 segment
    for l in range(num_layers):
        w1s = _pad2d(w_out[(2 * l + 1) * hidden:(2 * l + 2) * hidden].astype(cd),
                     hp, op)
        w2s = _pad2d(w_out[(2 * l + 2) * hidden:(2 * l + 3) * hidden].astype(cd),
                     hp, op)
        segs.append(jnp.concatenate([w1s, w2s], axis=0))             # (h1|h2) slab

    b_p = _pad2d(params["b_out"].reshape(1, -1).astype(jnp.float32), 1, op)

    return {"adj1": adj1_p, "adj2": adj2_p, "w1": w1_p,
            "w_out_segs": segs, "b_out": b_p}


@functools.partial(jax.jit, static_argnames=("num_layers", "out_channels"))
def h2gcn_forward(state, x, *, num_layers, out_channels):
    """H2GCN forward.  `state` comes from prepare_h2gcn_state; its dtype
    (bf16 fast path with f32 MXU accumulation, or f32 for PyTorch parity)
    determines the compute precision."""
    cd = state["adj1"].dtype
    npad = state["adj1"].shape[0]
    cp, hp = state["w1"].shape
    n = x.shape[0]
    assert n <= npad

    # fc1 (no bias): pad the per-call feature matrix (small: N x C).
    x_p = _pad2d(x, npad, cp).astype(cd)
    h0 = pallas_matmul(x_p, state["w1"], out_dtype=cd)          # (npad, hp)

    hs = [h0]
    w_segs = [state["w_out_segs"][0]]
    h_prev = h0
    for layer in range(num_layers):
        # 1-hop and 2-hop aggregation share one pallas_call (shared RHS tile);
        # result is a single lane-dense (npad, 2*hp) slab [h1 | h2].
        h12 = pallas_dual_matmul(state["adj1"], state["adj2"], h_prev,
                                 out_dtype=cd)
        hs.append(h12)
        w_segs.append(state["w_out_segs"][1 + layer])
        if layer + 1 < num_layers:
            h_prev = h12[:, :hp]                                 # h1 feeds next layer

    # dropout: eval/inference mode -> identity
    # TODO(synk): training-mode dropout (mask + 1/(1-p) scaling) not implemented.

    # fused concat + fc_out: y = sum_s h_s @ W_s + b (no [N, 3H] concat buffer)
    out_p = pallas_fused_concat_linear(hs, w_segs, state["b_out"],
                                       out_dtype=jnp.float32)
    return out_p[:n, :out_channels]


# ---------------------------------------------------------------------------
# Pure-JAX reference (mirrors the kernel's precision policy) for checking
# ---------------------------------------------------------------------------
def h2gcn_forward_ref(params, x, adj1, adj2, num_layers=1,
                      compute_dtype=jnp.float32):
    cd = compute_dtype

    def mm(a, b):
        return jnp.dot(a.astype(cd), b.astype(cd),
                       preferred_element_type=jnp.float32)

    h0 = mm(x, params["w1_t"]).astype(cd)
    outputs = [h0]
    h_prev = h0
    for _ in range(num_layers):
        h1 = mm(adj1, h_prev).astype(cd)
        h2 = mm(adj2, h_prev).astype(cd)
        outputs.extend([h1, h2])
        h_prev = h1
    h = jnp.concatenate(outputs, axis=1)
    return mm(h, params["w_out_t"]) + params["b_out"]


if __name__ == "__main__":
    # Small, deliberately non-tile-aligned shapes to exercise the padding path.
    N_NODES = 500      # number of nodes (not a multiple of 8/128)
    IN_CH = 96         # in_channels   (not a multiple of 128)
    HID = 128          # hidden_channels
    OUT_CH = 10        # out_channels  (e.g. number of classes)
    NUM_LAYERS = 1

    key = jax.random.PRNGKey(0)
    k_params, k_x, k_a1, k_a2 = jax.random.split(key, 4)

    params = init_h2gcn_params(k_params, IN_CH, HID, OUT_CH, NUM_LAYERS)
    x = jax.random.normal(k_x, (N_NODES, IN_CH), jnp.float32)

    # Sparse-ish dense adjacency matrices (row-normalized random masks).
    # torch.sparse.mm(adj, x) has dense-matmul semantics; sparsity is storage.
    def make_adj(k):
        mask = (jax.random.uniform(k, (N_NODES, N_NODES)) < 0.05).astype(jnp.float32)
        deg = jnp.maximum(mask.sum(axis=1, keepdims=True), 1.0)
        return mask / deg

    adj1 = make_adj(k_a1)
    adj2 = make_adj(k_a2)

    # --- float32 path (matches PyTorch numerics) ---
    state_f32 = prepare_h2gcn_state(params, adj1, adj2, num_layers=NUM_LAYERS,
                                    compute_dtype=jnp.float32)
    out_f32 = jax.block_until_ready(
        h2gcn_forward(state_f32, x, num_layers=NUM_LAYERS, out_channels=OUT_CH))
    ref_f32 = h2gcn_forward_ref(params, x, adj1, adj2, num_layers=NUM_LAYERS,
                                compute_dtype=jnp.float32)
    assert out_f32.shape == (N_NODES, OUT_CH), out_f32.shape
    assert jnp.allclose(out_f32, ref_f32, atol=1e-4, rtol=1e-4), (
        float(jnp.max(jnp.abs(out_f32 - ref_f32))))

    # --- bf16-input fast path (f32 accumulation), checked vs matching reference ---
    state_bf16 = prepare_h2gcn_state(params, adj1, adj2, num_layers=NUM_LAYERS,
                                     compute_dtype=jnp.bfloat16)
    out_bf16 = jax.block_until_ready(
        h2gcn_forward(state_bf16, x, num_layers=NUM_LAYERS, out_channels=OUT_CH))
    ref_bf16 = h2gcn_forward_ref(params, x, adj1, adj2, num_layers=NUM_LAYERS,
                                 compute_dtype=jnp.bfloat16)
    assert out_bf16.shape == (N_NODES, OUT_CH), out_bf16.shape
    assert jnp.allclose(out_bf16, ref_bf16, atol=1e-2, rtol=1e-2), (
        float(jnp.max(jnp.abs(out_bf16 - ref_bf16))))

    print("KERNEL_OK")
</pallas_src>

<mosaic_0001>
module attributes {stable_mosaic.version = 11 : i64} {
  func.func @kernel(%arg0: i32, %arg1: memref<512x512xf32, #tpu.memory_space<vmem>>, %arg2: memref<512x512xf32, #tpu.memory_space<vmem>>, %arg3: memref<512x128xf32, #tpu.memory_space<vmem>>, %arg4: memref<512x256xf32, #tpu.memory_space<vmem>>) attributes {dimension_semantics = [#tpu.dimension_semantics<parallel>], iteration_bounds = array<i64: 1>, scalar_prefetch = 0 : i64, scratch_operands = 0 : i64, tpu.core_type = #tpu.core_type<tc>, window_params = [{transform_indices = @transform_0, window_bounds = array<i64: 512, 512>}, {transform_indices = @transform_1, window_bounds = array<i64: 512, 512>}, {pipeline_mode = #tpu.pipeline_mode<synchronous>, transform_indices = @transform_2, window_bounds = array<i64: 512, 128>}, {transform_indices = @transform_3, window_bounds = array<i64: 512, 256>}]} {
    %c0 = arith.constant 0 : index
    %c0_0 = arith.constant 0 : index
    %0 = vector.load %arg3[%c0, %c0_0] : memref<512x128xf32, #tpu.memory_space<vmem>>, vector<512x128xf32>
    %c0_1 = arith.constant 0 : index
    %c0_2 = arith.constant 0 : index
    %1 = vector.load %arg1[%c0_1, %c0_2] : memref<512x512xf32, #tpu.memory_space<vmem>>, vector<512x512xf32>
    %cst = arith.constant dense<0.000000e+00> : vector<512x128xf32>
    %2 = tpu.matmul %1, %0, %cst {dimension_numbers = #tpu.dot_dimension_numbers<[1], [0], [0], [1], [0, 0, 1, 1], [], []>} : vector<512x512xf32>, vector<512x128xf32>, vector<512x128xf32> -> vector<512x128xf32>
    %c0_3 = arith.constant 0 : index
    %c0_4 = arith.constant 0 : index
    %3 = vector.load %arg4[%c0_3, %c0_4] : memref<512x256xf32, #tpu.memory_space<vmem>>, vector<512x128xf32>
    tpu.vector_store %arg4[%c0_3, %c0_4], %2 {strides = array<i32>} : memref<512x256xf32, #tpu.memory_space<vmem>>, vector<512x128xf32>,
    %c0_5 = arith.constant 0 : index
    %c0_6 = arith.constant 0 : index
    %4 = vector.load %arg2[%c0_5, %c0_6] : memref<512x512xf32, #tpu.memory_space<vmem>>, vector<512x512xf32>
    %cst_7 = arith.constant dense<0.000000e+00> : vector<512x128xf32>
    %5 = tpu.matmul %4, %0, %cst_7 {dimension_numbers = #tpu.dot_dimension_numbers<[1], [0], [0], [1], [0, 0, 1, 1], [], []>} : vector<512x512xf32>, vector<512x128xf32>, vector<512x128xf32> -> vector<512x128xf32>
    %c0_8 = arith.constant 0 : index
    %c128 = arith.constant 128 : index
    %6 = vector.load %arg4[%c0_8, %c128] : memref<512x256xf32, #tpu.memory_space<vmem>>, vector<512x128xf32>
    tpu.vector_store %arg4[%c0_8, %c128], %5 {strides = array<i32>} : memref<512x256xf32, #tpu.memory_space<vmem>>, vector<512x128xf32>,
    return
  }
  func.func @transform_0(%arg0: i32) -> (i32, i32) {
    %c0_i32 = arith.constant 0 : i32
    %c0_i32_0 = arith.constant 0 : i32
    return %arg0, %c0_i32 : i32, i32
  }
  func.func @transform_1(%arg0: i32) -> (i32, i32) {
    %c0_i32 = arith.constant 0 : i32
    %c0_i32_0 = arith.constant 0 : i32
    return %arg0, %c0_i32 : i32, i32
  }
  func.func @transform_2(%arg0: i32) -> (i32, i32) {
    %c0_i32 = arith.constant 0 : i32
    %c0_i32_0 = arith.constant 0 : i32
    %c0_i32_1 = arith.constant 0 : i32
    return %c0_i32, %c0_i32_0 : i32, i32
  }
  func.func @transform_3(%arg0: i32) -> (i32, i32) {
    %c0_i32 = arith.constant 0 : i32
    %c0_i32_0 = arith.constant 0 : i32
    return %arg0, %c0_i32 : i32, i32
  }
}

module attributes {stable_mosaic.version = 11 : i64} {
  func.func @_matmul_single_k_kernel(%arg0: i32, %arg1: i32, %arg2: memref<512x128xf32, #tpu.memory_space<vmem>>, %arg3: memref<128x128xf32, #tpu.memory_space<vmem>>, %arg4: memref<512x128xf32, #tpu.memory_space<vmem>>) attributes {dimension_semantics = [#tpu.dimension_semantics<parallel>, #tpu.dimension_semantics<parallel>], iteration_bounds = array<i64: 1, 1>, scalar_prefetch = 0 : i64, scratch_operands = 0 : i64, tpu.core_type = #tpu.core_type<tc>, window_params = [{transform_indices = @transform_0, window_bounds = array<i64: 512, 128>}, {transform_indices = @transform_1, window_bounds = array<i64: 128, 128>}, {transform_indices = @transform_2, window_bounds = array<i64: 512, 128>}]} {
    %c0 = arith.constant 0 : index
    %c0_0 = arith.constant 0 : index
    %0 = vector.load %arg2[%c0, %c0_0] : memref<512x128xf32, #tpu.memory_space<vmem>>, vector<512x128xf32>
    %c0_1 = arith.constant 0 : index
    %c0_2 = arith.constant 0 : index
    %1 = vector.load %arg3[%c0_1, %c0_2] : memref<128x128xf32, #tpu.memory_space<vmem>>, vector<128x128xf32>
    %cst = arith.constant dense<0.000000e+00> : vector<512x128xf32>
    %2 = tpu.matmul %0, %1, %cst {dimension_numbers = #tpu.dot_dimension_numbers<[1], [0], [0], [1], [0, 0, 1, 1], [], []>} : vector<512x128xf32>, vector<128x128xf32>, vector<512x128xf32> -> vector<512x128xf32>
    %c0_3 = arith.constant 0 : index
    %c0_4 = arith.constant 0 : index
    %3 = vector.load %arg4[%c0_3, %c0_4] : memref<512x128xf32, #tpu.memory_space<vmem>>, vector<512x128xf32>
    tpu.vector_store %arg4[%c0_3, %c0_4], %2 {strides = array<i32>} : memref<512x128xf32, #tpu.memory_space<vmem>>, vector<512x128xf32>,
    return
  }
  func.func @transform_0(%arg0: i32, %arg1: i32) -> (i32, i32) {
    %c0_i32 = arith.constant 0 : i32
    %c0_i32_0 = arith.constant 0 : i32
    return %arg0, %c0_i32 : i32, i32
  }
  func.func @transform_1(%arg0: i32, %arg1: i32) -> (i32, i32) {
    %c0_i32 = arith.constant 0 : i32
    %c0_i32_0 = arith.constant 0 : i32
    return %c0_i32, %arg1 : i32, i32
  }
  func.func @transform_2(%arg0: i32, %arg1: i32) -> (i32, i32) {
    %c0_i32 = arith.constant 0 : i32
    return %arg0, %arg1 : i32, i32
  }
}

module attributes {stable_mosaic.version = 11 : i64} {
  func.func @kernel(%arg0: i32, %arg1: i32, %arg2: memref<512x128xf32, #tpu.memory_space<vmem>>, %arg3: memref<512x256xf32, #tpu.memory_space<vmem>>, %arg4: memref<128x128xf32, #tpu.memory_space<vmem>>, %arg5: memref<256x128xf32, #tpu.memory_space<vmem>>, %arg6: memref<1x128xf32, #tpu.memory_space<vmem>>, %arg7: memref<512x128xf32, #tpu.memory_space<vmem>>) attributes {dimension_semantics = [#tpu.dimension_semantics<parallel>, #tpu.dimension_semantics<parallel>], iteration_bounds = array<i64: 1, 1>, scalar_prefetch = 0 : i64, scratch_operands = 0 : i64, tpu.core_type = #tpu.core_type<tc>, window_params = [{transform_indices = @transform_0, window_bounds = array<i64: 512, 128>}, {transform_indices = @transform_1, window_bounds = array<i64: 512, 256>}, {transform_indices = @transform_2, window_bounds = array<i64: 128, 128>}, {transform_indices = @transform_3, window_bounds = array<i64: 256, 128>}, {transform_indices = @transform_4, window_bounds = array<i64: 1, 128>}, {transform_indices = @transform_5, window_bounds = array<i64: 512, 128>}]} {
    %c0 = arith.constant 0 : index
    %c0_0 = arith.constant 0 : index
    %0 = vector.load %arg2[%c0, %c0_0] : memref<512x128xf32, #tpu.memory_space<vmem>>, vector<512x128xf32>
    %c0_1 = arith.constant 0 : index
    %c0_2 = arith.constant 0 : index
    %1 = vector.load %arg4[%c0_1, %c0_2] : memref<128x128xf32, #tpu.memory_space<vmem>>, vector<128x128xf32>
    %cst = arith.constant dense<0.000000e+00> : vector<512x128xf32>
    %2 = tpu.matmul %0, %1, %cst {dimension_numbers = #tpu.dot_dimension_numbers<[1], [0], [0], [1], [0, 0, 1, 1], [], []>} : vector<512x128xf32>, vector<128x128xf32>, vector<512x128xf32> -> vector<512x128xf32>
    %c0_3 = arith.constant 0 : index
    %c0_4 = arith.constant 0 : index
    %3 = vector.load %arg3[%c0_3, %c0_4] : memref<512x256xf32, #tpu.memory_space<vmem>>, vector<512x256xf32>
    %c0_5 = arith.constant 0 : index
    %c0_6 = arith.constant 0 : index
    %4 = vector.load %arg5[%c0_5, %c0_6] : memref<256x128xf32, #tpu.memory_space<vmem>>, vector<256x128xf32>
    %cst_7 = arith.constant dense<0.000000e+00> : vector<512x128xf32>
    %5 = tpu.matmul %3, %4, %cst_7 {dimension_numbers = #tpu.dot_dimension_numbers<[1], [0], [0], [1], [0, 0, 1, 1], [], []>} : vector<512x256xf32>, vector<256x128xf32>, vector<512x128xf32> -> vector<512x128xf32>
    %6 = arith.addf %2, %5 : vector<512x128xf32>
    %c0_8 = arith.constant 0 : index
    %c0_9 = arith.constant 0 : index
    %7 = vector.load %arg6[%c0_8, %c0_9] : memref<1x128xf32, #tpu.memory_space<vmem>>, vector<1x128xf32>
    %8 = vector.broadcast %7 : vector<1x128xf32> to vector<512x128xf32>
    %9 = arith.addf %6, %8 : vector<512x128xf32>
    %c0_10 = arith.constant 0 : index
    %c0_11 = arith.constant 0 : index
    %10 = vector.load %arg7[%c0_10, %c0_11] : memref<512x128xf32, #tpu.memory_space<vmem>>, vector<512x128xf32>
    tpu.vector_store %arg7[%c0_10, %c0_11], %9 {strides = array<i32>} : memref<512x128xf32, #tpu.memory_space<vmem>>, vector<512x128xf32>,
    return
  }
  func.func @transform_0(%arg0: i32, %arg1: i32) -> (i32, i32) {
    %c0_i32 = arith.constant 0 : i32
    %c0_i32_0 = arith.constant 0 : i32
    return %arg0, %c0_i32 : i32, i32
  }
  func.func @transform_1(%arg0: i32, %arg1: i32) -> (i32, i32) {
    %c0_i32 = arith.constant 0 : i32
    %c0_i32_0 = arith.constant 0 : i32
    return %arg0, %c0_i32 : i32, i32
  }
  func.func @transform_2(%arg0: i32, %arg1: i32) -> (i32, i32) {
    %c0_i32 = arith.constant 0 : i32
    %c0_i32_0 = arith.constant 0 : i32
    return %c0_i32, %arg1 : i32, i32
  }
  func.func @transform_3(%arg0: i32, %arg1: i32) -> (i32, i32) {
    %c0_i32 = arith.constant 0 : i32
    %c0_i32_0 = arith.constant 0 : i32
    return %c0_i32, %arg1 : i32, i32
  }
  func.func @transform_4(%arg0: i32, %arg1: i32) -> (i32, i32) {
    %c0_i32 = arith.constant 0 : i32
    %c0_i32_0 = arith.constant 0 : i32
    return %c0_i32, %arg1 : i32, i32
  }
  func.func @transform_5(%arg0: i32, %arg1: i32) -> (i32, i32) {
    %c0_i32 = arith.constant 0 : i32
    return %arg0, %arg1 : i32, i32
  }
}

</mosaic_0001>

<bundles_post_ra>
// kernel: h2gcn_forward.3
= control target key start
LH: loop header
LB: loop body
LE: loop exit
PB: predicated region body
PF: predicated region fallthrough
CT: control target
= control target key end

     0   :  { %7 = vsyncpa [#allocation3], 0  ;;  %s842_s9 = smov [#allocation2]   ;;  %s1256_s0 = inlined_call_operand.vmem [shape: f32[512,128], index: 0, kind: input, shape index: {}]   ;;  %s1257_s1 = inlined_call_operand.hbm [shape: f32[128,128], index: 1, kind: input, shape index: {}]   ;;  %s1258_s2 = inlined_call_operand.vmem [shape: f32[512,128], index: 2, kind: output, shape index: {}]  }
   0x1   :  { %s15_s10 = sshll.u32 %s842_s9, 4  ;;  %s818_s13 = scalar_lea.hbm %s1257_s1, 2048  ;;  %s16_s10 = int_to_ptr.vmem [resolvable:$true] %s15_s10 }
   0x2   :  { %p819_p0 = scmp.ne.s32.totalorder %s1257_s1, %s818_s13  ;;  %p822_p1 = scmp.lt.u32.totalorder %s818_s13, %s1257_s1 }
   0x4   :  { %p824_p2 = pnand %p822_p1, %p819_p0 }
   0x6   :  { %827 = shalt.err (!%p824_p2)
}
   0x7   :  { %s828_s18 = scalar_lea.vmem %s16_s10, 2048  ;;  %p833_p4 = scmp.lt.s32.totalorder %s16_s10, %s16_s10 }
   0x8   :  { %p829_p3 = scmp.ne.s32.totalorder %s16_s10, %s828_s18  ;;  %p834_p5 = scmp.lt.s32.totalorder %s828_s18, %s828_s18 }
   0xa   :  { %p835_p6 = por %p834_p5, %p833_p4 }
   0xc   :  { %p836_p7 = pnand %p835_p6, %p829_p3 }
   0xe   :  { %839 = shalt.err (!%p836_p7)
}
   0xf   :  { %s843_s19 = smov 128   ;;  %s844_s20 = smov 8  }
  0x10   :  { %21 = dma.hbm_to_vmem [thread:$0]  %s1257_s1, 2048, %s16_s10, [#allocation3], %s843_s19, %s843_s19, %s844_s20  }
  0x11   :  { %840 = dma.done.wait [#allocation3], 2048  }
  0x12   :  { %841 = vsyncadd [#allocation3], 4294965248  ;;  %v89_v0 = vld [vmem:[#allocation2] sm:$0xff]  ;;  %v90_v1 = vld [vmem:[#allocation2 + $0x8] sm:$0xff] }
  0x13   :  { %v91_v2 = vld [vmem:[#allocation2 + $0x10] sm:$0xff]  ;;  %v767_v3 = vpack.c.bf16 %v90_v1, %v89_v0  ;;  %v92_v4 = vld [vmem:[#allocation2 + $0x18] sm:$0xff]  ;;  %v93_v6 = vld [vmem:[#allocation2 + $0x20] sm:$0xff] }
  0x14   :  { %v771_v5 = vpack.c.bf16 %v92_v4, %v91_v2  ;;  %v94_v7 = vld [vmem:[#allocation2 + $0x28] sm:$0xff]  ;;  %v25_v9 = vld [vmem:[%s1256_s0] sm:$0xff]  ;;  %v95_v11 = vld [vmem:[#allocation2 + $0x30] sm:$0xff] }
  0x15   :  { %768 = vmatprep.subr.bf16.mxu0 %v767_v3  ;;  %799 = vmatprep.subr.bf16.mxu1 %v767_v3  ;;  %v775_v8 = vpack.c.bf16 %v94_v7, %v93_v6  ;;  %v57_v10 = vld [vmem:[%s1256_s0 + $0x100] sm:$0xff]  ;;  %v96_v12 = vld [vmem:[#allocation2 + $0x38] sm:$0xff]  ;;  %v98_v15 = vld [vmem:[#allocation2 + $0x48] sm:$0xff] }
  0x16   :  { %770 = vmatpush3.bf16.msra.mxu0 %v767_v3  ;;  %807 = vmatpush3.bf16.msra.mxu1 %v767_v3  ;;  %v779_v13 = vpack.c.bf16 %v96_v12, %v95_v11  ;;  %v97_v14 = vld [vmem:[#allocation2 + $0x40] sm:$0xff]  ;;  %v99_v17 = vld [vmem:[#allocation2 + $0x50] sm:$0xff]  ;;  %v100_v18 = vld [vmem:[#allocation2 + $0x58] sm:$0xff] }
  0x17   :  { %772 = vmatprep.subr.bf16.mxu0 %v771_v5  ;;  %800 = vmatprep.subr.bf16.mxu1 %v771_v5  ;;  %v783_v16 = vpack.c.bf16 %v98_v15, %v97_v14  ;;  %v787_v19 = vpack.c.bf16 %v100_v18, %v99_v17  ;;  %v101_v20 = vld [vmem:[#allocation2 + $0x60] sm:$0xff]  ;;  %v102_v21 = vld [vmem:[#allocation2 + $0x68] sm:$0xff]  ;;  %v103_v23 = vld [vmem:[#allocation2 + $0x70] sm:$0xff] }
  0x18   :  { %671 = vmatprep.mubr.f32.mxu0 %v25_v9  ;;  %719 = vmatprep.mubr.f32.mxu1 %v57_v10  ;;  %v791_v22 = vpack.c.bf16 %v102_v21, %v101_v20  ;;  %v104_v24 = vld [vmem:[#allocation2 + $0x78] sm:$0xff]  ;;  %v26_v26 = vld [vmem:[%s1256_s0 + $0x8] sm:$0xff]  ;;  %v27_v28 = vld [vmem:[%s1256_s0 + $0x10] sm:$0xff] }
  0x19   :  { %v795_v25 = vpack.c.bf16 %v104_v24, %v103_v23  ;;  %v58_v27 = vld [vmem:[%s1256_s0 + $0x108] sm:$0xff]  ;;  %v59_v29 = vld [vmem:[%s1256_s0 + $0x110] sm:$0xff]  ;;  %v28_v30 = vld [vmem:[%s1256_s0 + $0x18] sm:$0xff] }
  0x1a   :  { %774 = vmatpush3.bf16.msra.mxu0 %v771_v5  ;;  %808 = vmatpush3.bf16.msra.mxu1 %v771_v5  ;;  %v60_v31 = vld [vmem:[%s1256_s0 + $0x118] sm:$0xff]  ;;  %v29_v32 = vld [vmem:[%s1256_s0 + $0x20] sm:$0xff]  ;;  %v30_v34 = vld [vmem:[%s1256_s0 + $0x28] sm:$0xff] }
  0x1b   :  { %776 = vmatprep.subr.bf16.mxu0 %v775_v8  ;;  %801 = vmatprep.subr.bf16.mxu1 %v775_v8  ;;  %v61_v33 = vld [vmem:[%s1256_s0 + $0x120] sm:$0xff]  ;;  %v62_v35 = vld [vmem:[%s1256_s0 + $0x128] sm:$0xff]  ;;  %v31_v36 = vld [vmem:[%s1256_s0 + $0x30] sm:$0xff] }
  0x1c   :  { %v63_v37 = vld [vmem:[%s1256_s0 + $0x130] sm:$0xff]  ;;  %v32_v38 = vld [vmem:[%s1256_s0 + $0x38] sm:$0xff]  ;;  %v33_v40 = vld [vmem:[%s1256_s0 + $0x40] sm:$0xff] }
  0x1d   :  { %v64_v39 = vld [vmem:[%s1256_s0 + $0x138] sm:$0xff]  ;;  %v65_v41 = vld [vmem:[%s1256_s0 + $0x140] sm:$0xff]  ;;  %v34_v42 = vld [vmem:[%s1256_s0 + $0x48] sm:$0xff] }
  0x1e   :  { %778 = vmatpush3.bf16.msra.mxu0 %v775_v8  ;;  %809 = vmatpush3.bf16.msra.mxu1 %v775_v8  ;;  %v66_v43 = vld [vmem:[%s1256_s0 + $0x148] sm:$0xff]  ;;  %v35_v44 = vld [vmem:[%s1256_s0 + $0x50] sm:$0xff]  ;;  %v36_v46 = vld [vmem:[%s1256_s0 + $0x58] sm:$0xff] }
  0x1f   :  { %780 = vmatprep.subr.bf16.mxu0 %v779_v13  ;;  %802 = vmatprep.subr.bf16.mxu1 %v779_v13  ;;  %v67_v45 = vld [vmem:[%s1256_s0 + $0x150] sm:$0xff]  ;;  %v68_v47 = vld [vmem:[%s1256_s0 + $0x158] sm:$0xff]  ;;  %v37_v48 = vld [vmem:[%s1256_s0 + $0x60] sm:$0xff] }
  0x20   :  { %v69_v49 = vld [vmem:[%s1256_s0 + $0x160] sm:$0xff]  ;;  %v38_v50 = vld [vmem:[%s1256_s0 + $0x68] sm:$0xff]  ;;  %v39_v52 = vld [vmem:[%s1256_s0 + $0x70] sm:$0xff] }
  0x21   :  { %v70_v51 = vld [vmem:[%s1256_s0 + $0x168] sm:$0xff]  ;;  %v71_v53 = vld [vmem:[%s1256_s0 + $0x170] sm:$0xff]  ;;  %v40_v54 = vld [vmem:[%s1256_s0 + $0x78] sm:$0xff] }
  0x22   :  { %782 = vmatpush3.bf16.msra.mxu0 %v779_v13  ;;  %810 = vmatpush3.bf16.msra.mxu1 %v779_v13  ;;  %v72_v55 = vld [vmem:[%s1256_s0 + $0x178] sm:$0xff]  ;;  %v41_v56 = vld [vmem:[%s1256_s0 + $0x80] sm:$0xff]  ;;  %v42_v58 = vld [vmem:[%s1256_s0 + $0x88] sm:$0xff] }
  0x23   :  { %784 = vmatprep.subr.bf16.mxu0 %v783_v16  ;;  %803 = vmatprep.subr.bf16.mxu1 %v783_v16  ;;  %v73_v57 = vld [vmem:[%s1256_s0 + $0x180] sm:$0xff]  ;;  %v74_v59 = vld [vmem:[%s1256_s0 + $0x188] sm:$0xff]  ;;  %v43_v60 = vld [vmem:[%s1256_s0 + $0x90] sm:$0xff] }
  0x24   :  { %v75_v61 = vld [vmem:[%s1256_s0 + $0x190] sm:$0xff]  ;;  %v44_v62 = vld [vmem:[%s1256_s0 + $0x98] sm:$0xff]  ;;  %v45_v0 = vld [vmem:[%s1256_s0 + $0xa0] sm:$0xff] }
  0x25   :  { %v76_v63 = vld [vmem:[%s1256_s0 + $0x198] sm:$0xff]  ;;  %v77_v1 = vld [vmem:[%s1256_s0 + $0x1a0] sm:$0xff]  ;;  %v46_v2 = vld [vmem:[%s1256_s0 + $0xa8] sm:$0xff] }
  0x26   :  { %786 = vmatpush3.bf16.msra.mxu0 %v783_v16  ;;  %811 = vmatpush3.bf16.msra.mxu1 %v783_v16  ;;  %v78_v3 = vld [vmem:[%s1256_s0 + $0x1a8] sm:$0xff]  ;;  %v47_v4 = vld [vmem:[%s1256_s0 + $0xb0] sm:$0xff]  ;;  %v48_v6 = vld [vmem:[%s1256_s0 + $0xb8] sm:$0xff] }
  0x27   :  { %788 = vmatprep.subr.bf16.mxu0 %v787_v19  ;;  %804 = vmatprep.subr.bf16.mxu1 %v787_v19  ;;  %v79_v5 = vld [vmem:[%s1256_s0 + $0x1b0] sm:$0xff]  ;;  %v80_v7 = vld [vmem:[%s1256_s0 + $0x1b8] sm:$0xff]  ;;  %v49_v8 = vld [vmem:[%s1256_s0 + $0xc0] sm:$0xff] }
  0x28   :  { %v81_v9 = vld [vmem:[%s1256_s0 + $0x1c0] sm:$0xff]  ;;  %v50_v10 = vld [vmem:[%s1256_s0 + $0xc8] sm:$0xff]  ;;  %v51_v12 = vld [vmem:[%s1256_s0 + $0xd0] sm:$0xff] }
  0x29   :  { %v82_v11 = vld [vmem:[%s1256_s0 + $0x1c8] sm:$0xff]  ;;  %v83_v13 = vld [vmem:[%s1256_s0 + $0x1d0] sm:$0xff]  ;;  %v52_v14 = vld [vmem:[%s1256_s0 + $0xd8] sm:$0xff] }
  0x2a   :  { %790 = vmatpush3.bf16.msra.mxu0 %v787_v19  ;;  %812 = vmatpush3.bf16.msra.mxu1 %v787_v19  ;;  %v84_v15 = vld [vmem:[%s1256_s0 + $0x1d8] sm:$0xff]  ;;  %v53_v16 = vld [vmem:[%s1256_s0 + $0xe0] sm:$0xff]  ;;  %v54_v18 = vld [vmem:[%s1256_s0 + $0xe8] sm:$0xff] }
  0x2b   :  { %792 = vmatprep.subr.bf16.mxu0 %v791_v22  ;;  %805 = vmatprep.subr.bf16.mxu1 %v791_v22  ;;  %v85_v17 = vld [vmem:[%s1256_s0 + $0x1e0] sm:$0xff]  ;;  %v86_v19 = vld [vmem:[%s1256_s0 + $0x1e8] sm:$0xff]  ;;  %v55_v20 = vld [vmem:[%s1256_s0 + $0xf0] sm:$0xff] }
  0x2c   :  { %v87_v21 = vld [vmem:[%s1256_s0 + $0x1f0] sm:$0xff]  ;;  %v88_v23 = vld [vmem:[%s1256_s0 + $0x1f8] sm:$0xff] }
  0x2e   :  { %794 = vmatpush3.bf16.msra.mxu0 %v791_v22  ;;  %813 = vmatpush3.bf16.msra.mxu1 %v791_v22  ;;  %v56_v22 = vld [vmem:[%s1256_s0 + $0xf8] sm:$0xff] }
  0x2f   :  { %796 = vmatprep.subr.bf16.mxu0 %v795_v25  ;;  %806 = vmatprep.subr.bf16.mxu1 %v795_v25 }
  0x32   :  { %798 = vmatpush3.bf16.msra.mxu0 %v795_v25  ;;  %814 = vmatpush3.bf16.msra.mxu1 %v795_v25 }
  0x35   :  { %672 = vmatmul.mubr.f32.vlgmr.msra.gmra.mrb[0].mxu0 %v26_v26  ;;  %720 = vmatmul.mubr.f32.vlgmr.msra.gmra.mrb[0].mxu1 %v58_v27 }
  0x36   :  { %674 = vmatprep.mubr.f32.mxu0 %v27_v28  ;;  %722 = vmatprep.mubr.f32.mxu1 %v59_v29 }
  0x39   :  { %675 = vmatmul.mubr.f32.gmra.mrb[2].mxu0 %v28_v30  ;;  %723 = vmatmul.mubr.f32.gmra.mrb[2].mxu1 %v60_v31 }
  0x3a   :  { %677 = vmatprep.mubr.f32.mxu0 %v29_v32  ;;  %725 = vmatprep.mubr.f32.mxu1 %v61_v33 }
  0x3d   :  { %678 = vmatmul.mubr.f32.gmra.mrb[4].mxu0 %v30_v34  ;;  %726 = vmatmul.mubr.f32.gmra.mrb[4].mxu1 %v62_v35 }
  0x3e   :  { %680 = vmatprep.mubr.f32.mxu0 %v31_v36  ;;  %728 = vmatprep.mubr.f32.mxu1 %v63_v37 }
  0x41   :  { %681 = vmatmul.mubr.f32.gmra.mrb[6].mxu0 %v32_v38  ;;  %729 = vmatmul.mubr.f32.gmra.mrb[6].mxu1 %v64_v39 }
  0x42   :  { %683 = vmatprep.mubr.f32.mxu0 %v33_v40  ;;  %731 = vmatprep.mubr.f32.mxu1 %v65_v41 }
  0x45   :  { %684 = vmatmul.mubr.f32.gmra.mrb[8].mxu0 %v34_v42  ;;  %732 = vmatmul.mubr.f32.gmra.mrb[8].mxu1 %v66_v43 }
  0x46   :  { %686 = vmatprep.mubr.f32.mxu0 %v35_v44  ;;  %734 = vmatprep.mubr.f32.mxu1 %v67_v45 }
  0x49   :  { %687 = vmatmul.mubr.f32.gmra.mrb[10].mxu0 %v36_v46  ;;  %735 = vmatmul.mubr.f32.gmra.mrb[10].mxu1 %v68_v47 }
  0x4a   :  { %689 = vmatprep.mubr.f32.mxu0 %v37_v48  ;;  %737 = vmatprep.mubr.f32.mxu1 %v69_v49 }
  0x4d   :  { %690 = vmatmul.mubr.f32.gmra.mrb[12].mxu0 %v38_v50  ;;  %738 = vmatmul.mubr.f32.gmra.mrb[12].mxu1 %v70_v51 }
  0x4e   :  { %692 = vmatprep.mubr.f32.mxu0 %v39_v52  ;;  %740 = vmatprep.mubr.f32.mxu1 %v71_v53 }
  0x51   :  { %693 = vmatmul.mubr.f32.gmra.mrb[14].mxu0 %v40_v54  ;;  %741 = vmatmul.mubr.f32.gmra.mrb[14].mxu1 %v72_v55 }
  0x52   :  { %695 = vmatprep.mubr.f32.mxu0 %v41_v56  ;;  %743 = vmatprep.mubr.f32.mxu1 %v73_v57 }
  0x55   :  { %696 = vmatmul.mubr.f32.gmra.mrb[16].mxu0 %v42_v58  ;;  %744 = vmatmul.mubr.f32.gmra.mrb[16].mxu1 %v74_v59 }
  0x56   :  { %698 = vmatprep.mubr.f32.mxu0 %v43_v60  ;;  %746 = vmatprep.mubr.f32.mxu1 %v75_v61 }
  0x59   :  { %699 = vmatmul.mubr.f32.gmra.mrb[18].mxu0 %v44_v62  ;;  %747 = vmatmul.mubr.f32.gmra.mrb[18].mxu1 %v76_v63 }
  0x5a   :  { %701 = vmatprep.mubr.f32.mxu0 %v45_v0  ;;  %749 = vmatprep.mubr.f32.mxu1 %v77_v1 }
  0x5d   :  { %702 = vmatmul.mubr.f32.gmra.mrb[20].mxu0 %v46_v2  ;;  %750 = vmatmul.mubr.f32.gmra.mrb[20].mxu1 %v78_v3 }
  0x5e   :  { %704 = vmatprep.mubr.f32.mxu0 %v47_v4  ;;  %752 = vmatprep.mubr.f32.mxu1 %v79_v5 }
  0x61   :  { %705 = vmatmul.mubr.f32.gmra.mrb[22].mxu0 %v48_v6  ;;  %753 = vmatmul.mubr.f32.gmra.mrb[22].mxu1 %v80_v7 }
  0x62   :  { %707 = vmatprep.mubr.f32.mxu0 %v49_v8  ;;  %755 = vmatprep.mubr.f32.mxu1 %v81_v9 }
  0x65   :  { %708 = vmatmul.mubr.f32.gmra.mrb[24].mxu0 %v50_v10  ;;  %756 = vmatmul.mubr.f32.gmra.mrb[24].mxu1 %v82_v11 }
  0x66   :  { %710 = vmatprep.mubr.f32.mxu0 %v51_v12  ;;  %758 = vmatprep.mubr.f32.mxu1 %v83_v13 }
  0x69   :  { %711 = vmatmul.mubr.f32.gmra.mrb[26].mxu0 %v52_v14  ;;  %759 = vmatmul.mubr.f32.gmra.mrb[26].mxu1 %v84_v15 }
  0x6a   :  { %713 = vmatprep.mubr.f32.mxu0 %v53_v16  ;;  %761 = vmatprep.mubr.f32.mxu1 %v85_v17 }
  0x6d   :  { %714 = vmatmul.mubr.f32.gmra.mrb[28].mxu0 %v54_v18  ;;  %762 = vmatmul.mubr.f32.gmra.mrb[28].mxu1 %v86_v19 }
  0x6e   :  { %716 = vmatprep.mubr.f32.mxu0 %v55_v20  ;;  %764 = vmatprep.mubr.f32.mxu1 %v87_v21 }
  0x71   :  { %717 = vmatmul.mubr.f32.gmra.mrb[30].mxu0 %v56_v22  ;;  %765 = vmatmul.mubr.f32.gmra.mrb[30].mxu1 %v88_v23 }
 0x108   :  { %v673_v24 = vpop.f32.mrb[0].mxu0  ;;  %v721_v25 = vpop.f32.mrb[0].mxu1 }
 0x109   :  { %491 = vst [vmem:[%s1258_s2 + $0x8] sm:$0xff] %v673_v24  ;;  %523 = vst [vmem:[%s1258_s2 + $0x108] sm:$0xff] %v721_v25  ;;  %v171_v26 = vpop.f32.mrb[1].mxu0  ;;  %v331_v27 = vpop.f32.mrb[1].mxu1 }
 0x10a   :  { %490 = vst [vmem:[%s1258_s2] sm:$0xff] %v171_v26  ;;  %522 = vst [vmem:[%s1258_s2 + $0x100] sm:$0xff] %v331_v27 }
 0x10c   :  { %v676_v28 = vpop.f32.mrb[2].mxu0  ;;  %v724_v29 = vpop.f32.mrb[2].mxu1 }
 0x10d   :  { %493 = vst [vmem:[%s1258_s2 + $0x18] sm:$0xff] %v676_v28  ;;  %525 = vst [vmem:[%s1258_s2 + $0x118] sm:$0xff] %v724_v29  ;;  %v181_v30 = vpop.f32.mrb[3].mxu0  ;;  %v341_v31 = vpop.f32.mrb[3].mxu1 }
 0x10e   :  { %492 = vst [vmem:[%s1258_s2 + $0x10] sm:$0xff] %v181_v30  ;;  %524 = vst [vmem:[%s1258_s2 + $0x110] sm:$0xff] %v341_v31 }
 0x110   :  { %v679_v32 = vpop.f32.mrb[4].mxu0  ;;  %v727_v33 = vpop.f32.mrb[4].mxu1 }
 0x111   :  { %495 = vst [vmem:[%s1258_s2 + $0x28] sm:$0xff] %v679_v32  ;;  %527 = vst [vmem:[%s1258_s2 + $0x128] sm:$0xff] %v727_v33  ;;  %v191_v34 = vpop.f32.mrb[5].mxu0  ;;  %v351_v35 = vpop.f32.mrb[5].mxu1 }
 0x112   :  { %494 = vst [vmem:[%s1258_s2 + $0x20] sm:$0xff] %v191_v34  ;;  %526 = vst [vmem:[%s1258_s2 + $0x120] sm:$0xff] %v351_v35 }
 0x114   :  { %v682_v36 = vpop.f32.mrb[6].mxu0  ;;  %v730_v37 = vpop.f32.mrb[6].mxu1 }
 0x115   :  { %497 = vst [vmem:[%s1258_s2 + $0x38] sm:$0xff] %v682_v36  ;;  %529 = vst [vmem:[%s1258_s2 + $0x138] sm:$0xff] %v730_v37  ;;  %v201_v38 = vpop.f32.mrb[7].mxu0  ;;  %v361_v39 = vpop.f32.mrb[7].mxu1 }
 0x116   :  { %496 = vst [vmem:[%s1258_s2 + $0x30] sm:$0xff] %v201_v38  ;;  %528 = vst [vmem:[%s1258_s2 + $0x130] sm:$0xff] %v361_v39 }
 0x118   :  { %v685_v40 = vpop.f32.mrb[8].mxu0  ;;  %v733_v41 = vpop.f32.mrb[8].mxu1 }
 0x119   :  { %499 = vst [vmem:[%s1258_s2 + $0x48] sm:$0xff] %v685_v40  ;;  %531 = vst [vmem:[%s1258_s2 + $0x148] sm:$0xff] %v733_v41  ;;  %v211_v42 = vpop.f32.mrb[9].mxu0  ;;  %v371_v43 = vpop.f32.mrb[9].mxu1 }
 0x11a   :  { %498 = vst [vmem:[%s1258_s2 + $0x40] sm:$0xff] %v211_v42  ;;  %530 = vst [vmem:[%s1258_s2 + $0x140] sm:$0xff] %v371_v43 }
 0x11c   :  { %v688_v44 = vpop.f32.mrb[10].mxu0  ;;  %v736_v45 = vpop.f32.mrb[10].mxu1 }
 0x11d   :  { %501 = vst [vmem:[%s1258_s2 + $0x58] sm:$0xff] %v688_v44  ;;  %533 = vst [vmem:[%s1258_s2 + $0x158] sm:$0xff] %v736_v45  ;;  %v221_v46 = vpop.f32.mrb[11].mxu0  ;;  %v381_v47 = vpop.f32.mrb[11].mxu1 }
 0x11e   :  { %500 = vst [vmem:[%s1258_s2 + $0x50] sm:$0xff] %v221_v46  ;;  %532 = vst [vmem:[%s1258_s2 + $0x150] sm:$0xff] %v381_v47 }
 0x120   :  { %v691_v48 = vpop.f32.mrb[12].mxu0  ;;  %v739_v49 = vpop.f32.mrb[12].mxu1 }
 0x121   :  { %503 = vst [vmem:[%s1258_s2 + $0x68] sm:$0xff] %v691_v48  ;;  %535 = vst [vmem:[%s1258_s2 + $0x168] sm:$0xff] %v739_v49  ;;  %v231_v50 = vpop.f32.mrb[13].mxu0  ;;  %v391_v51 = vpop.f32.mrb[13].mxu1 }
 0x122   :  { %502 = vst [vmem:[%s1258_s2 + $0x60] sm:$0xff] %v231_v50  ;;  %534 = vst [vmem:[%s1258_s2 + $0x160] sm:$0xff] %v391_v51 }
 0x124   :  { %v694_v52 = vpop.f32.mrb[14].mxu0  ;;  %v742_v53 = vpop.f32.mrb[14].mxu1 }
 0x125   :  { %505 = vst [vmem:[%s1258_s2 + $0x78] sm:$0xff] %v694_v52  ;;  %537 = vst [vmem:[%s1258_s2 + $0x178] sm:$0xff] %v742_v53  ;;  %v241_v54 = vpop.f32.mrb[15].mxu0  ;;  %v401_v55 = vpop.f32.mrb[15].mxu1 }
 0x126   :  { %504 = vst [vmem:[%s1258_s2 + $0x70] sm:$0xff] %v241_v54  ;;  %536 = vst [vmem:[%s1258_s2 + $0x170] sm:$0xff] %v401_v55 }
 0x128   :  { %v697_v56 = vpop.f32.mrb[16].mxu0  ;;  %v745_v57 = vpop.f32.mrb[16].mxu1 }
 0x129   :  { %507 = vst [vmem:[%s1258_s2 + $0x88] sm:$0xff] %v697_v56  ;;  %539 = vst [vmem:[%s1258_s2 + $0x188] sm:$0xff] %v745_v57  ;;  %v251_v58 = vpop.f32.mrb[17].mxu0  ;;  %v411_v59 = vpop.f32.mrb[17].mxu1 }
 0x12a   :  { %506 = vst [vmem:[%s1258_s2 + $0x80] sm:$0xff] %v251_v58  ;;  %538 = vst [vmem:[%s1258_s2 + $0x180] sm:$0xff] %v411_v59 }
 0x12c   :  { %v700_v60 = vpop.f32.mrb[18].mxu0  ;;  %v748_v61 = vpop.f32.mrb[18].mxu1 }
 0x12d   :  { %509 = vst [vmem:[%s1258_s2 + $0x98] sm:$0xff] %v700_v60  ;;  %541 = vst [vmem:[%s1258_s2 + $0x198] sm:$0xff] %v748_v61  ;;  %v261_v62 = vpop.f32.mrb[19].mxu0  ;;  %v421_v63 = vpop.f32.mrb[19].mxu1 }
 0x12e   :  { %508 = vst [vmem:[%s1258_s2 + $0x90] sm:$0xff] %v261_v62  ;;  %540 = vst [vmem:[%s1258_s2 + $0x190] sm:$0xff] %v421_v63 }
 0x130   :  { %v703_v0 = vpop.f32.mrb[20].mxu0  ;;  %v751_v1 = vpop.f32.mrb[20].mxu1 }
 0x131   :  { %511 = vst [vmem:[%s1258_s2 + $0xa8] sm:$0xff] %v703_v0  ;;  %543 = vst [vmem:[%s1258_s2 + $0x1a8] sm:$0xff] %v751_v1  ;;  %v271_v2 = vpop.f32.mrb[21].mxu0  ;;  %v431_v3 = vpop.f32.mrb[21].mxu1 }
 0x132   :  { %510 = vst [vmem:[%s1258_s2 + $0xa0] sm:$0xff] %v271_v2  ;;  %542 = vst [vmem:[%s1258_s2 + $0x1a0] sm:$0xff] %v431_v3 }
 0x134   :  { %v706_v4 = vpop.f32.mrb[22].mxu0  ;;  %v754_v5 = vpop.f32.mrb[22].mxu1 }
 0x135   :  { %513 = vst [vmem:[%s1258_s2 + $0xb8] sm:$0xff] %v706_v4  ;;  %545 = vst [vmem:[%s1258_s2 + $0x1b8] sm:$0xff] %v754_v5  ;;  %v281_v6 = vpop.f32.mrb[23].mxu0  ;;  %v441_v7 = vpop.f32.mrb[23].mxu1 }
 0x136   :  { %512 = vst [vmem:[%s1258_s2 + $0xb0] sm:$0xff] %v281_v6  ;;  %544 = vst [vmem:[%s1258_s2 + $0x1b0] sm:$0xff] %v441_v7 }
 0x138   :  { %v709_v8 = vpop.f32.mrb[24].mxu0  ;;  %v757_v9 = vpop.f32.mrb[24].mxu1 }
 0x139   :  { %515 = vst [vmem:[%s1258_s2 + $0xc8] sm:$0xff] %v709_v8  ;;  %547 = vst [vmem:[%s1258_s2 + $0x1c8] sm:$0xff] %v757_v9  ;;  %v291_v10 = vpop.f32.mrb[25].mxu0  ;;  %v451_v11 = vpop.f32.mrb[25].mxu1 }
 0x13a   :  { %514 = vst [vmem:[%s1258_s2 + $0xc0] sm:$0xff] %v291_v10  ;;  %546 = vst [vmem:[%s1258_s2 + $0x1c0] sm:$0xff] %v451_v11 }
 0x13c   :  { %v712_v12 = vpop.f32.mrb[26].mxu0  ;;  %v760_v13 = vpop.f32.mrb[26].mxu1 }
 0x13d   :  { %517 = vst [vmem:[%s1258_s2 + $0xd8] sm:$0xff] %v712_v12  ;;  %549 = vst [vmem:[%s1258_s2 + $0x1d8] sm:$0xff] %v760_v13  ;;  %v301_v14 = vpop.f32.mrb[27].mxu0  ;;  %v461_v15 = vpop.f32.mrb[27].mxu1 }
 0x13e   :  { %516 = vst [vmem:[%s1258_s2 + $0xd0] sm:$0xff] %v301_v14  ;;  %548 = vst [vmem:[%s1258_s2 + $0x1d0] sm:$0xff] %v461_v15 }
 0x140   :  { %v715_v16 = vpop.f32.mrb[28].mxu0  ;;  %v763_v17 = vpop.f32.mrb[28].mxu1 }
 0x141   :  { %519 = vst [vmem:[%s1258_s2 + $0xe8] sm:$0xff] %v715_v16  ;;  %551 = vst [vmem:[%s1258_s2 + $0x1e8] sm:$0xff] %v763_v17  ;;  %v311_v18 = vpop.f32.mrb[29].mxu0  ;;  %v471_v19 = vpop.f32.mrb[29].mxu1 }
 0x142   :  { %518 = vst [vmem:[%s1258_s2 + $0xe0] sm:$0xff] %v311_v18  ;;  %550 = vst [vmem:[%s1258_s2 + $0x1e0] sm:$0xff] %v471_v19 }
 0x144   :  { %v718_v20 = vpop.f32.mrb[30].mxu0  ;;  %v766_v21 = vpop.f32.mrb[30].mxu1 }
 0x145   :  { %521 = vst [vmem:[%s1258_s2 + $0xf8] sm:$0xff] %v718_v20  ;;  %553 = vst [vmem:[%s1258_s2 + $0x1f8] sm:$0xff] %v766_v21  ;;  %v321_v22 = vpop.f32.mrb[31].mxu0  ;;  %v481_v23 = vpop.f32.mrb[31].mxu1 }
 0x146   :  { %520 = vst [vmem:[%s1258_s2 + $0xf0] sm:$0xff] %v321_v22  ;;  %552 = vst [vmem:[%s1258_s2 + $0x1f0] sm:$0xff] %v481_v23 }
 0x147   :  { %558 = vsyncpa [#allocation3], 1 }

// kernel: h2gcn_forward.5
= control target key start
LH: loop header
LB: loop body
LE: loop exit
PB: predicated region body
PF: predicated region fallthrough
CT: control target
= control target key end

     0   :  { %v1491_v0 = vmov 0.0|0.0   ;;  %s2655_s3 = inlined_call_operand.vmem [shape: f32[256,128], index: 3, kind: input, shape index: {}]   ;;  %s2656_s1 = inlined_call_operand.vmem [shape: f32[512,256], index: 1, kind: input, shape index: {}]   ;;  %s2657_s2 = inlined_call_operand.vmem [shape: f32[128,128], index: 2, kind: input, shape index: {}]   ;;  %s2658_s0 = inlined_call_operand.vmem [shape: f32[512,128], index: 0, kind: input, shape index: {}]   ;;  %s2659_s4 = inlined_call_operand.vmem [shape: f32[1,128], index: 4, kind: input, shape index: {}]   ;;  %s2660_s5 = inlined_call_operand.vmem [shape: f32[512,128], index: 5, kind: output, shape index: {}]  }
   0x1   :  { %1378 = vmatprep.subr.bf16.mxu0 %v1491_v0  ;;  %1458 = vmatprep.subr.bf16.mxu1 %v1491_v0  ;;  %v228_v1 = vld [vmem:[%s2655_s3] sm:$0xff]  ;;  %v229_v2 = vld [vmem:[%s2655_s3 + $0x8] sm:$0xff]  ;;  %v230_v3 = vld [vmem:[%s2655_s3 + $0x10] sm:$0xff] }
   0x2   :  { %v1379_v4 = vpack.c.bf16 %v229_v2, %v228_v1  ;;  %v231_v5 = vld [vmem:[%s2655_s3 + $0x18] sm:$0xff]  ;;  %v232_v7 = vld [vmem:[%s2655_s3 + $0x20] sm:$0xff]  ;;  %v233_v8 = vld [vmem:[%s2655_s3 + $0x28] sm:$0xff] }
   0x3   :  { %v1382_v6 = vpack.c.bf16 %v231_v5, %v230_v3  ;;  %v1385_v9 = vpack.c.bf16 %v233_v8, %v232_v7  ;;  %v234_v10 = vld [vmem:[%s2655_s3 + $0x30] sm:$0xff]  ;;  %v235_v11 = vld [vmem:[%s2655_s3 + $0x38] sm:$0xff]  ;;  %v101_v12 = vld [vmem:[%s2656_s1 + $0x8] sm:$0xff] }
   0x4   :  { %1380 = vmatpush1.bf16.msra.mxu0 %v1379_v4  ;;  %1474 = vmatpush1.bf16.msra.mxu1 %v1379_v4  ;;  %v1388_v13 = vpack.c.bf16 %v235_v11, %v234_v10  ;;  %v197_v14 = vld [vmem:[%s2656_s1 + $0x308] sm:$0xff]  ;;  %v236_v15 = vld [vmem:[%s2655_s3 + $0x40] sm:$0xff]  ;;  %v238_v18 = vld [vmem:[%s2655_s3 + $0x50] sm:$0xff] }
   0x5   :  { %1381 = vmatprep.subr.bf16.mxu0 %v1491_v0  ;;  %1459 = vmatprep.subr.bf16.mxu1 %v1491_v0  ;;  %v237_v16 = vld [vmem:[%s2655_s3 + $0x48] sm:$0xff]  ;;  %v239_v19 = vld [vmem:[%s2655_s3 + $0x58] sm:$0xff]  ;;  %v240_v21 = vld [vmem:[%s2655_s3 + $0x60] sm:$0xff] }
   0x6   :  { %324 = vmatprep.mubr.f32.mxu0 %v101_v12  ;;  %564 = vmatprep.mubr.f32.mxu1 %v197_v14  ;;  %v1391_v17 = vpack.c.bf16 %v237_v16, %v236_v15  ;;  %v1394_v20 = vpack.c.bf16 %v239_v19, %v238_v18  ;;  %v241_v22 = vld [vmem:[%s2655_s3 + $0x68] sm:$0xff]  ;;  %v242_v24 = vld [vmem:[%s2655_s3 + $0x70] sm:$0xff]  ;;  %v243_v25 = vld [vmem:[%s2655_s3 + $0x78] sm:$0xff] }
   0x7   :  { %v1397_v23 = vpack.c.bf16 %v241_v22, %v240_v21  ;;  %v1400_v26 = vpack.c.bf16 %v243_v25, %v242_v24  ;;  %v244_v27 = vld [vmem:[%s2655_s3 + $0x80] sm:$0xff]  ;;  %v245_v28 = vld [vmem:[%s2655_s3 + $0x88] sm:$0xff]  ;;  %v246_v30 = vld [vmem:[%s2655_s3 + $0x90] sm:$0xff] }
   0x8   :  { %1383 = vmatpush1.bf16.msra.mxu0 %v1382_v6  ;;  %1475 = vmatpush1.bf16.msra.mxu1 %v1382_v6  ;;  %v1403_v29 = vpack.c.bf16 %v245_v28, %v244_v27  ;;  %v247_v31 = vld [vmem:[%s2655_s3 + $0x98] sm:$0xff]  ;;  %v248_v33 = vld [vmem:[%s2655_s3 + $0xa0] sm:$0xff]  ;;  %v249_v34 = vld [vmem:[%s2655_s3 + $0xa8] sm:$0xff] }
   0x9   :  { %1384 = vmatprep.subr.bf16.mxu0 %v1491_v0  ;;  %1460 = vmatprep.subr.bf16.mxu1 %v1491_v0  ;;  %v1406_v32 = vpack.c.bf16 %v247_v31, %v246_v30  ;;  %v1409_v35 = vpack.c.bf16 %v249_v34, %v248_v33  ;;  %v250_v36 = vld [vmem:[%s2655_s3 + $0xb0] sm:$0xff]  ;;  %v251_v37 = vld [vmem:[%s2655_s3 + $0xb8] sm:$0xff]  ;;  %v252_v39 = vld [vmem:[%s2655_s3 + $0xc0] sm:$0xff] }
   0xa   :  { %v1412_v38 = vpack.c.bf16 %v251_v37, %v250_v36  ;;  %v253_v40 = vld [vmem:[%s2655_s3 + $0xc8] sm:$0xff]  ;;  %v254_v42 = vld [vmem:[%s2655_s3 + $0xd0] sm:$0xff]  ;;  %v255_v43 = vld [vmem:[%s2655_s3 + $0xd8] sm:$0xff] }
   0xb   :  { %v1415_v41 = vpack.c.bf16 %v253_v40, %v252_v39  ;;  %v1418_v44 = vpack.c.bf16 %v255_v43, %v254_v42  ;;  %v256_v45 = vld [vmem:[%s2655_s3 + $0xe0] sm:$0xff]  ;;  %v257_v46 = vld [vmem:[%s2655_s3 + $0xe8] sm:$0xff]  ;;  %v258_v48 = vld [vmem:[%s2655_s3 + $0xf0] sm:$0xff] }
   0xc   :  { %1386 = vmatpush1.bf16.msra.mxu0 %v1385_v9  ;;  %1476 = vmatpush1.bf16.msra.mxu1 %v1385_v9  ;;  %v1421_v47 = vpack.c.bf16 %v257_v46, %v256_v45  ;;  %v259_v49 = vld [vmem:[%s2655_s3 + $0xf8] sm:$0xff]  ;;  %v84_v50 = vld [vmem:[%s2657_s2] sm:$0xff]  ;;  %v85_v51 = vld [vmem:[%s2657_s2 + $0x8] sm:$0xff] }
   0xd   :  { %1387 = vmatprep.subr.bf16.mxu0 %v1491_v0  ;;  %1461 = vmatprep.subr.bf16.mxu1 %v1491_v0  ;;  %v1424_v52 = vpack.c.bf16 %v259_v49, %v258_v48  ;;  %v1426_v53 = vpack.c.bf16 %v85_v51, %v84_v50  ;;  %v86_v54 = vld [vmem:[%s2657_s2 + $0x10] sm:$0xff]  ;;  %v87_v55 = vld [vmem:[%s2657_s2 + $0x18] sm:$0xff]  ;;  %v100_v56 = vld [vmem:[%s2656_s1] sm:$0xff] }
   0xe   :  { %v196_v57 = vld [vmem:[%s2656_s1 + $0x300] sm:$0xff]  ;;  %v103_v58 = vld [vmem:[%s2656_s1 + $0x18] sm:$0xff]  ;;  %v1430_v59 = vpack.c.bf16 %v87_v55, %v86_v54  ;;  %v89_v62 = vld [vmem:[%s2657_s2 + $0x28] sm:$0xff] }
   0xf   :  { %v199_v60 = vld [vmem:[%s2656_s1 + $0x318] sm:$0xff]  ;;  %v88_v61 = vld [vmem:[%s2657_s2 + $0x20] sm:$0xff]  ;;  %v102_v63 = vld [vmem:[%s2656_s1 + $0x10] sm:$0xff] }
  0x10   :  { %1389 = vmatpush1.bf16.msra.mxu0 %v1388_v13  ;;  %1477 = vmatpush1.bf16.msra.mxu1 %v1388_v13  ;;  %v105_v1 = vld [vmem:[%s2656_s1 + $0x28] sm:$0xff]  ;;  %v1434_v3 = vpack.c.bf16 %v89_v62, %v88_v61  ;;  %v90_v4 = vld [vmem:[%s2657_s2 + $0x30] sm:$0xff]  ;;  %v91_v5 = vld [vmem:[%s2657_s2 + $0x38] sm:$0xff] }
  0x11   :  { %1390 = vmatprep.subr.bf16.mxu0 %v1491_v0  ;;  %1462 = vmatprep.subr.bf16.mxu1 %v1491_v0  ;;  %v201_v2 = vld [vmem:[%s2656_s1 + $0x328] sm:$0xff]  ;;  %v104_v6 = vld [vmem:[%s2656_s1 + $0x20] sm:$0xff]  ;;  %v107_v8 = vld [vmem:[%s2656_s1 + $0x38] sm:$0xff]  ;;  %v1438_v10 = vpack.c.bf16 %v91_v5, %v90_v4 }
  0x12   :  { %v200_v7 = vld [vmem:[%s2656_s1 + $0x320] sm:$0xff]  ;;  %v203_v9 = vld [vmem:[%s2656_s1 + $0x338] sm:$0xff]  ;;  %v93_v12 = vld [vmem:[%s2657_s2 + $0x48] sm:$0xff] }
  0x13   :  { %v92_v11 = vld [vmem:[%s2657_s2 + $0x40] sm:$0xff]  ;;  %v106_v13 = vld [vmem:[%s2656_s1 + $0x30] sm:$0xff]  ;;  %v109_v15 = vld [vmem:[%s2656_s1 + $0x48] sm:$0xff] }
  0x14   :  { %1392 = vmatpush1.bf16.msra.mxu0 %v1391_v17  ;;  %1478 = vmatpush1.bf16.msra.mxu1 %v1391_v17  ;;  %v202_v14 = vld [vmem:[%s2656_s1 + $0x330] sm:$0xff]  ;;  %v205_v16 = vld [vmem:[%s2656_s1 + $0x348] sm:$0xff]  ;;  %v1442_v17 = vpack.c.bf16 %v93_v12, %v92_v11  ;;  %v95_v19 = vld [vmem:[%s2657_s2 + $0x58] sm:$0xff] }
  0x15   :  { %1393 = vmatprep.subr.bf16.mxu0 %v1491_v0  ;;  %1463 = vmatprep.subr.bf16.mxu1 %v1491_v0  ;;  %v94_v18 = vld [vmem:[%s2657_s2 + $0x50] sm:$0xff]  ;;  %v204_v21 = vld [vmem:[%s2656_s1 + $0x340] sm:$0xff]  ;;  %v111_v22 = vld [vmem:[%s2656_s1 + $0x58] sm:$0xff] }
  0x16   :  { %v1446_v24 = vpack.c.bf16 %v95_v19, %v94_v18  ;;  %v96_v25 = vld [vmem:[%s2657_s2 + $0x60] sm:$0xff]  ;;  %v110_v27 = vld [vmem:[%s2656_s1 + $0x50] sm:$0xff]  ;;  %v209_v30 = vld [vmem:[%s2656_s1 + $0x368] sm:$0xff] }
  0x17   :  { %v206_v28 = vld [vmem:[%s2656_s1 + $0x350] sm:$0xff]  ;;  %v99_v33 = vld [vmem:[%s2657_s2 + $0x78] sm:$0xff]  ;;  %v112_v34 = vld [vmem:[%s2656_s1 + $0x60] sm:$0xff] }
  0x18   :  { %1395 = vmatpush1.bf16.msra.mxu0 %v1394_v20  ;;  %1479 = vmatpush1.bf16.msra.mxu1 %v1394_v20  ;;  %v108_v20 = vld [vmem:[%s2656_s1 + $0x40] sm:$0xff]  ;;  %v115_v36 = vld [vmem:[%s2656_s1 + $0x78] sm:$0xff]  ;;  %v114_v39 = vld [vmem:[%s2656_s1 + $0x70] sm:$0xff] }
  0x19   :  { %1396 = vmatprep.subr.bf16.mxu0 %v1491_v0  ;;  %1464 = vmatprep.subr.bf16.mxu1 %v1491_v0  ;;  %v211_v37 = vld [vmem:[%s2656_s1 + $0x378] sm:$0xff]  ;;  %v210_v40 = vld [vmem:[%s2656_s1 + $0x370] sm:$0xff]  ;;  %v213_v42 = vld [vmem:[%s2656_s1 + $0x388] sm:$0xff] }
  0x1a   :  { %v116_v43 = vld [vmem:[%s2656_s1 + $0x80] sm:$0xff]  ;;  %v119_v45 = vld [vmem:[%s2656_s1 + $0x98] sm:$0xff]  ;;  %v214_v48 = vld [vmem:[%s2656_s1 + $0x390] sm:$0xff] }
  0x1b   :  { %v215_v46 = vld [vmem:[%s2656_s1 + $0x398] sm:$0xff]  ;;  %v121_v49 = vld [vmem:[%s2656_s1 + $0xa8] sm:$0xff]  ;;  %v120_v51 = vld [vmem:[%s2656_s1 + $0xa0] sm:$0xff] }
  0x1c   :  { %1398 = vmatpush1.bf16.msra.mxu0 %v1397_v23  ;;  %1480 = vmatpush1.bf16.msra.mxu1 %v1397_v23  ;;  %v207_v23 = vld [vmem:[%s2656_s1 + $0x358] sm:$0xff]  ;;  %v217_v50 = vld [vmem:[%s2656_s1 + $0x3a8] sm:$0xff]  ;;  %v122_v55 = vld [vmem:[%s2656_s1 + $0xb0] sm:$0xff] }
  0x1d   :  { %1399 = vmatprep.subr.bf16.mxu0 %v1491_v0  ;;  %1465 = vmatprep.subr.bf16.mxu1 %v1491_v0  ;;  %v219_v54 = vld [vmem:[%s2656_s1 + $0x3b8] sm:$0xff]  ;;  %v224_v4 = vld [vmem:[%s2656_s1 + $0x3e0] sm:$0xff]  ;;  %v21_v12 = vld [vmem:[%s2658_s0 + $0x8] sm:$0xff] }
  0x1e   :  { %v127_v61 = vld [vmem:[%s2656_s1 + $0xd8] sm:$0xff]  ;;  %v132_v11 = vld [vmem:[%s2656_s1 + $0x100] sm:$0xff] }
  0x1f   :  { %v223_v62 = vld [vmem:[%s2656_s1 + $0x3d8] sm:$0xff]  ;;  %v24_v18 = vld [vmem:[%s2658_s0 + $0x20] sm:$0xff] }
  0x20   :  { %1401 = vmatpush1.bf16.msra.mxu0 %v1400_v26  ;;  %1481 = vmatpush1.bf16.msra.mxu1 %v1400_v26  ;;  %v97_v26 = vld [vmem:[%s2657_s2 + $0x68] sm:$0xff]  ;;  %v131_v5 = vld [vmem:[%s2656_s1 + $0xf8] sm:$0xff]  ;;  %v136_v19 = vld [vmem:[%s2656_s1 + $0x120] sm:$0xff] }
  0x21   :  { %1402 = vmatprep.subr.bf16.mxu0 %v1491_v0  ;;  %1466 = vmatprep.subr.bf16.mxu1 %v1491_v0  ;;  %v1450_v31 = vpack.c.bf16 %v97_v26, %v96_v25  ;;  %v141_v25 = vld [vmem:[%s2656_s1 + $0x148] sm:$0xff]  ;;  %v28_v26 = vld [vmem:[%s2658_s0 + $0x40] sm:$0xff] }
  0x24   :  { %1404 = vmatpush1.bf16.msra.mxu0 %v1403_v29  ;;  %1482 = vmatpush1.bf16.msra.mxu1 %v1403_v29  ;;  %v113_v29 = vld [vmem:[%s2656_s1 + $0x68] sm:$0xff] }
  0x25   :  { %1405 = vmatprep.subr.bf16.mxu0 %v1491_v0  ;;  %1467 = vmatprep.subr.bf16.mxu1 %v1491_v0 }
  0x28   :  { %1407 = vmatpush1.bf16.msra.mxu0 %v1406_v32  ;;  %1483 = vmatpush1.bf16.msra.mxu1 %v1406_v32  ;;  %v98_v32 = vld [vmem:[%s2657_s2 + $0x70] sm:$0xff] }
  0x29   :  { %1408 = vmatprep.subr.bf16.mxu0 %v1491_v0  ;;  %1468 = vmatprep.subr.bf16.mxu1 %v1491_v0 }
  0x2c   :  { %1410 = vmatpush1.bf16.msra.mxu0 %v1409_v35  ;;  %1484 = vmatpush1.bf16.msra.mxu1 %v1409_v35  ;;  %v208_v35 = vld [vmem:[%s2656_s1 + $0x360] sm:$0xff] }
  0x2d   :  { %1411 = vmatprep.subr.bf16.mxu0 %v1491_v0  ;;  %1469 = vmatprep.subr.bf16.mxu1 %v1491_v0 }
  0x30   :  { %1413 = vmatpush1.bf16.msra.mxu0 %v1412_v38  ;;  %1485 = vmatpush1.bf16.msra.mxu1 %v1412_v38  ;;  %v1454_v38 = vpack.c.bf16 %v99_v33, %v98_v32  ;;  %v31_v32 = vld [vmem:[%s2658_s0 + $0x58] sm:$0xff]  ;;  %v145_v33 = vld [vmem:[%s2656_s1 + $0x168] sm:$0xff] }
  0x31   :  { %1414 = vmatprep.subr.bf16.mxu0 %v1491_v0  ;;  %1470 = vmatprep.subr.bf16.mxu1 %v1491_v0 }
  0x34   :  { %1416 = vmatpush1.bf16.msra.mxu0 %v1415_v41  ;;  %1486 = vmatpush1.bf16.msra.mxu1 %v1415_v41  ;;  %v117_v41 = vld [vmem:[%s2656_s1 + $0x88] sm:$0xff] }
  0x35   :  { %1417 = vmatprep.subr.bf16.mxu0 %v1491_v0  ;;  %1471 = vmatprep.subr.bf16.mxu1 %v1491_v0 }
  0x38   :  { %1419 = vmatpush1.bf16.msra.mxu0 %v1418_v44  ;;  %1487 = vmatpush1.bf16.msra.mxu1 %v1418_v44  ;;  %v212_v44 = vld [vmem:[%s2656_s1 + $0x380] sm:$0xff] }
  0x39   :  { %1420 = vmatprep.subr.bf16.mxu0 %v1491_v0  ;;  %1472 = vmatprep.subr.bf16.mxu1 %v1491_v0 }
  0x3c   :  { %1422 = vmatpush1.bf16.msra.mxu0 %v1421_v47  ;;  %1488 = vmatpush1.bf16.msra.mxu1 %v1421_v47  ;;  %v118_v47 = vld [vmem:[%s2656_s1 + $0x90] sm:$0xff] }
  0x3d   :  { %1423 = vmatprep.subr.bf16.mxu0 %v1491_v0  ;;  %1473 = vmatprep.subr.bf16.mxu1 %v1491_v0  ;;  %v198_v0 = vld [vmem:[%s2656_s1 + $0x310] sm:$0xff] }
  0x40   :  { %1425 = vmatpush1.bf16.msra.mxu0 %v1424_v52  ;;  %1489 = vmatpush1.bf16.msra.mxu1 %v1424_v52  ;;  %v216_v52 = vld [vmem:[%s2656_s1 + $0x3a0] sm:$0xff] }
  0x41   :  { %1427 = vmatprep.subr.bf16.mxu1 %v1426_v53 }
  0x43   :  { %325 = vmatmul.mubr.f32.vlgmr.msra.gmra.mrb[0].mxu0 %v100_v56  ;;  %565 = vmatmul.mubr.f32.vlgmr.msra.gmra.mrb[0].mxu1 %v196_v57  ;;  %v218_v56 = vld [vmem:[%s2656_s1 + $0x3b0] sm:$0xff]  ;;  %v125_v57 = vld [vmem:[%s2656_s1 + $0xc8] sm:$0xff] }
  0x44   :  { %1429 = vmatpush3.bf16.msra.mxu1 %v1426_v53  ;;  %329 = vmatprep.mubr.f32.mxu0 %v103_v58  ;;  %v123_v53 = vld [vmem:[%s2656_s1 + $0xb8] sm:$0xff]  ;;  %v221_v58 = vld [vmem:[%s2656_s1 + $0x3c8] sm:$0xff] }
  0x45   :  { %569 = vmatprep.mubr.f32.mxu1 %v199_v60  ;;  %1431 = vmatprep.subr.bf16.mxu1 %v1430_v59  ;;  %v220_v60 = vld [vmem:[%s2656_s1 + $0x3c0] sm:$0xff] }
  0x47   :  { %330 = vmatmul.mubr.f32.gmra.mrb[2].mxu0 %v102_v63  ;;  %570 = vmatmul.mubr.f32.gmra.mrb[2].mxu1 %v198_v0  ;;  %v126_v63 = vld [vmem:[%s2656_s1 + $0xd0] sm:$0xff] }
  0x48   :  { %334 = vmatprep.mubr.f32.mxu0 %v105_v1  ;;  %574 = vmatprep.mubr.f32.mxu1 %v201_v2  ;;  %v222_v0 = vld [vmem:[%s2656_s1 + $0x3d0] sm:$0xff]  ;;  %v129_v1 = vld [vmem:[%s2656_s1 + $0xe8] sm:$0xff] }
  0x49   :  { %1433 = vmatpush3.bf16.msra.mxu1 %v1430_v59  ;;  %v124_v59 = vld [vmem:[%s2656_s1 + $0xc0] sm:$0xff]  ;;  %v225_v2 = vld [vmem:[%s2656_s1 + $0x3e8] sm:$0xff] }
  0x4a   :  { %1435 = vmatprep.subr.bf16.mxu1 %v1434_v3 }
  0x4b   :  { %335 = vmatmul.mubr.f32.gmra.mrb[4].mxu0 %v104_v6  ;;  %575 = vmatmul.mubr.f32.gmra.mrb[4].mxu1 %v200_v7  ;;  %v227_v6 = vld [vmem:[%s2656_s1 + $0x3f8] sm:$0xff]  ;;  %v130_v7 = vld [vmem:[%s2656_s1 + $0xf0] sm:$0xff] }
  0x4c   :  { %339 = vmatprep.mubr.f32.mxu0 %v107_v8  ;;  %579 = vmatprep.mubr.f32.mxu1 %v203_v9  ;;  %v226_v8 = vld [vmem:[%s2656_s1 + $0x3f0] sm:$0xff]  ;;  %v133_v9 = vld [vmem:[%s2656_s1 + $0x108] sm:$0xff] }
  0x4d   :  { %1437 = vmatpush3.bf16.msra.mxu1 %v1434_v3  ;;  %v128_v3 = vld [vmem:[%s2656_s1 + $0xe0] sm:$0xff] }
  0x4e   :  { %1439 = vmatprep.subr.bf16.mxu1 %v1438_v10 }
  0x4f   :  { %340 = vmatmul.mubr.f32.gmra.mrb[6].mxu0 %v106_v13  ;;  %580 = vmatmul.mubr.f32.gmra.mrb[6].mxu1 %v202_v14  ;;  %v135_v13 = vld [vmem:[%s2656_s1 + $0x118] sm:$0xff]  ;;  %v22_v14 = vld [vmem:[%s2658_s0 + $0x10] sm:$0xff] }
  0x50   :  { %344 = vmatprep.mubr.f32.mxu0 %v109_v15  ;;  %584 = vmatprep.mubr.f32.mxu1 %v205_v16  ;;  %v134_v15 = vld [vmem:[%s2656_s1 + $0x110] sm:$0xff]  ;;  %v23_v16 = vld [vmem:[%s2658_s0 + $0x18] sm:$0xff] }
  0x51   :  { %1441 = vmatpush3.bf16.msra.mxu1 %v1438_v10  ;;  %v20_v10 = vld [vmem:[%s2658_s0] sm:$0xff] }
  0x52   :  { %1443 = vmatprep.subr.bf16.mxu1 %v1442_v17 }
  0x53   :  { %345 = vmatmul.mubr.f32.gmra.mrb[8].mxu0 %v108_v20  ;;  %585 = vmatmul.mubr.f32.gmra.mrb[8].mxu1 %v204_v21  ;;  %v25_v20 = vld [vmem:[%s2658_s0 + $0x28] sm:$0xff]  ;;  %v139_v21 = vld [vmem:[%s2656_s1 + $0x138] sm:$0xff] }
  0x54   :  { %349 = vmatprep.mubr.f32.mxu0 %v111_v22  ;;  %589 = vmatprep.mubr.f32.mxu1 %v207_v23  ;;  %v26_v22 = vld [vmem:[%s2658_s0 + $0x30] sm:$0xff] }
  0x55   :  { %1445 = vmatpush3.bf16.msra.mxu1 %v1442_v17  ;;  %v137_v17 = vld [vmem:[%s2656_s1 + $0x128] sm:$0xff]  ;;  %v138_v23 = vld [vmem:[%s2656_s1 + $0x130] sm:$0xff] }
  0x56   :  { %1447 = vmatprep.subr.bf16.mxu1 %v1446_v24 }
  0x57   :  { %350 = vmatmul.mubr.f32.gmra.mrb[10].mxu0 %v110_v27  ;;  %590 = vmatmul.mubr.f32.gmra.mrb[10].mxu1 %v206_v28  ;;  %v140_v27 = vld [vmem:[%s2656_s1 + $0x140] sm:$0xff]  ;;  %v29_v28 = vld [vmem:[%s2658_s0 + $0x48] sm:$0xff] }
  0x58   :  { %354 = vmatprep.mubr.f32.mxu0 %v113_v29  ;;  %594 = vmatprep.mubr.f32.mxu1 %v209_v30  ;;  %v143_v29 = vld [vmem:[%s2656_s1 + $0x158] sm:$0xff]  ;;  %v30_v30 = vld [vmem:[%s2658_s0 + $0x50] sm:$0xff] }
  0x59   :  { %1449 = vmatpush3.bf16.msra.mxu1 %v1446_v24  ;;  %v27_v24 = vld [vmem:[%s2658_s0 + $0x38] sm:$0xff] }
  0x5a   :  { %1451 = vmatprep.subr.bf16.mxu1 %v1450_v31 }
  0x5b   :  { %355 = vmatmul.mubr.f32.gmra.mrb[12].mxu0 %v112_v34  ;;  %595 = vmatmul.mubr.f32.gmra.mrb[12].mxu1 %v208_v35  ;;  %v32_v34 = vld [vmem:[%s2658_s0 + $0x60] sm:$0xff] }
  0x5c   :  { %359 = vmatprep.mubr.f32.mxu0 %v115_v36  ;;  %599 = vmatprep.mubr.f32.mxu1 %v211_v37  ;;  %v144_v35 = vld [vmem:[%s2656_s1 + $0x160] sm:$0xff]  ;;  %v33_v36 = vld [vmem:[%s2658_s0 + $0x68] sm:$0xff]  ;;  %v147_v37 = vld [vmem:[%s2656_s1 + $0x178] sm:$0xff] }
  0x5d   :  { %1453 = vmatpush3.bf16.msra.mxu1 %v1450_v31  ;;  %v142_v31 = vld [vmem:[%s2656_s1 + $0x150] sm:$0xff] }
  0x5e   :  { %1455 = vmatprep.subr.bf16.mxu1 %v1454_v38 }
  0x5f   :  { %360 = vmatmul.mubr.f32.gmra.mrb[14].mxu0 %v114_v39  ;;  %600 = vmatmul.mubr.f32.gmra.mrb[14].mxu1 %v210_v40  ;;  %v146_v39 = vld [vmem:[%s2656_s1 + $0x170] sm:$0xff]  ;;  %v35_v40 = vld [vmem:[%s2658_s0 + $0x78] sm:$0xff] }
  0x60   :  { %364 = vmatprep.mubr.f32.mxu0 %v117_v41  ;;  %604 = vmatprep.mubr.f32.mxu1 %v213_v42  ;;  %v149_v41 = vld [vmem:[%s2656_s1 + $0x188] sm:$0xff]  ;;  %v36_v42 = vld [vmem:[%s2658_s0 + $0x80] sm:$0xff] }
  0x61   :  { %1457 = vmatpush3.bf16.msra.mxu1 %v1454_v38  ;;  %v34_v38 = vld [vmem:[%s2658_s0 + $0x70] sm:$0xff] }
  0x63   :  { %365 = vmatmul.mubr.f32.gmra.mrb[16].mxu0 %v116_v43  ;;  %605 = vmatmul.mubr.f32.gmra.mrb[16].mxu1 %v212_v44  ;;  %v148_v43 = vld [vmem:[%s2656_s1 + $0x180] sm:$0xff]  ;;  %v37_v44 = vld [vmem:[%s2658_s0 + $0x88] sm:$0xff] }
  0x64   :  { %369 = vmatprep.mubr.f32.mxu0 %v119_v45  ;;  %609 = vmatprep.mubr.f32.mxu1 %v215_v46  ;;  %v151_v45 = vld [vmem:[%s2656_s1 + $0x198] sm:$0xff]  ;;  %v38_v46 = vld [vmem:[%s2658_s0 + $0x90] sm:$0xff] }
  0x67   :  { %370 = vmatmul.mubr.f32.gmra.mrb[18].mxu0 %v118_v47  ;;  %610 = vmatmul.mubr.f32.gmra.mrb[18].mxu1 %v214_v48  ;;  %v150_v47 = vld [vmem:[%s2656_s1 + $0x190] sm:$0xff]  ;;  %v39_v48 = vld [vmem:[%s2658_s0 + $0x98] sm:$0xff] }
  0x68   :  { %374 = vmatprep.mubr.f32.mxu0 %v121_v49  ;;  %614 = vmatprep.mubr.f32.mxu1 %v217_v50  ;;  %v153_v49 = vld [vmem:[%s2656_s1 + $0x1a8] sm:$0xff]  ;;  %v40_v50 = vld [vmem:[%s2658_s0 + $0xa0] sm:$0xff] }
  0x6b   :  { %375 = vmatmul.mubr.f32.gmra.mrb[20].mxu0 %v120_v51  ;;  %615 = vmatmul.mubr.f32.gmra.mrb[20].mxu1 %v216_v52  ;;  %v152_v51 = vld [vmem:[%s2656_s1 + $0x1a0] sm:$0xff]  ;;  %v41_v52 = vld [vmem:[%s2658_s0 + $0xa8] sm:$0xff] }
  0x6c   :  { %379 = vmatprep.mubr.f32.mxu0 %v123_v53  ;;  %619 = vmatprep.mubr.f32.mxu1 %v219_v54  ;;  %v155_v53 = vld [vmem:[%s2656_s1 + $0x1b8] sm:$0xff]  ;;  %v42_v54 = vld [vmem:[%s2658_s0 + $0xb0] sm:$0xff] }
  0x6f   :  { %380 = vmatmul.mubr.f32.gmra.mrb[22].mxu0 %v122_v55  ;;  %620 = vmatmul.mubr.f32.gmra.mrb[22].mxu1 %v218_v56  ;;  %v154_v55 = vld [vmem:[%s2656_s1 + $0x1b0] sm:$0xff]  ;;  %v43_v56 = vld [vmem:[%s2658_s0 + $0xb8] sm:$0xff] }
  0x70   :  { %384 = vmatprep.mubr.f32.mxu0 %v125_v57  ;;  %624 = vmatprep.mubr.f32.mxu1 %v221_v58  ;;  %v157_v57 = vld [vmem:[%s2656_s1 + $0x1c8] sm:$0xff]  ;;  %v44_v58 = vld [vmem:[%s2658_s0 + $0xc0] sm:$0xff] }
  0x73   :  { %385 = vmatmul.mubr.f32.gmra.mrb[24].mxu0 %v124_v59  ;;  %625 = vmatmul.mubr.f32.gmra.mrb[24].mxu1 %v220_v60  ;;  %v156_v59 = vld [vmem:[%s2656_s1 + $0x1c0] sm:$0xff]  ;;  %v45_v60 = vld [vmem:[%s2658_s0 + $0xc8] sm:$0xff] }
  0x74   :  { %389 = vmatprep.mubr.f32.mxu0 %v127_v61  ;;  %629 = vmatprep.mubr.f32.mxu1 %v223_v62  ;;  %v159_v61 = vld [vmem:[%s2656_s1 + $0x1d8] sm:$0xff]  ;;  %v46_v62 = vld [vmem:[%s2658_s0 + $0xd0] sm:$0xff] }
  0x77   :  { %390 = vmatmul.mubr.f32.gmra.mrb[26].mxu0 %v126_v63  ;;  %630 = vmatmul.mubr.f32.gmra.mrb[26].mxu1 %v222_v0  ;;  %v158_v63 = vld [vmem:[%s2656_s1 + $0x1d0] sm:$0xff]  ;;  %v47_v0 = vld [vmem:[%s2658_s0 + $0xd8] sm:$0xff] }
  0x78   :  { %394 = vmatprep.mubr.f32.mxu0 %v129_v1  ;;  %634 = vmatprep.mubr.f32.mxu1 %v225_v2  ;;  %v161_v1 = vld [vmem:[%s2656_s1 + $0x1e8] sm:$0xff]  ;;  %v48_v2 = vld [vmem:[%s2658_s0 + $0xe0] sm:$0xff] }
  0x7b   :  { %395 = vmatmul.mubr.f32.gmra.mrb[28].mxu0 %v128_v3  ;;  %635 = vmatmul.mubr.f32.gmra.mrb[28].mxu1 %v224_v4  ;;  %v160_v3 = vld [vmem:[%s2656_s1 + $0x1e0] sm:$0xff]  ;;  %v49_v4 = vld [vmem:[%s2658_s0 + $0xe8] sm:$0xff] }
  0x7c   :  { %399 = vmatprep.mubr.f32.mxu0 %v131_v5  ;;  %639 = vmatprep.mubr.f32.mxu1 %v227_v6  ;;  %v163_v5 = vld [vmem:[%s2656_s1 + $0x1f8] sm:$0xff]  ;;  %v50_v6 = vld [vmem:[%s2658_s0 + $0xf0] sm:$0xff] }
  0x7f   :  { %400 = vmatmul.mubr.f32.gmra.mrb[30].mxu0 %v130_v7  ;;  %640 = vmatmul.mubr.f32.gmra.mrb[30].mxu1 %v226_v8  ;;  %v162_v7 = vld [vmem:[%s2656_s1 + $0x1f0] sm:$0xff]  ;;  %v51_v8 = vld [vmem:[%s2658_s0 + $0xf8] sm:$0xff] }
  0x80   :  { %404 = vmatprep.mubr.f32.mxu0 %v133_v9  ;;  %1282 = vmatprep.mubr.f32.mxu1 %v20_v10  ;;  %v165_v9 = vld [vmem:[%s2656_s1 + $0x208] sm:$0xff]  ;;  %v52_v10 = vld [vmem:[%s2658_s0 + $0x100] sm:$0xff] }
  0x83   :  { %405 = vmatmul.mubr.f32.gmra.mrb[32].mxu0 %v132_v11  ;;  %1283 = vmatmul.mubr.f32.vlgmr.msra.gmra.mrb[32].mxu1 %v21_v12  ;;  %v164_v11 = vld [vmem:[%s2656_s1 + $0x200] sm:$0xff]  ;;  %v53_v12 = vld [vmem:[%s2658_s0 + $0x108] sm:$0xff] }
  0x84   :  { %409 = vmatprep.mubr.f32.mxu0 %v135_v13  ;;  %1285 = vmatprep.mubr.f32.mxu1 %v22_v14  ;;  %v167_v13 = vld [vmem:[%s2656_s1 + $0x218] sm:$0xff]  ;;  %v54_v14 = vld [vmem:[%s2658_s0 + $0x110] sm:$0xff] }
  0x87   :  { %410 = vmatmul.mubr.f32.gmra.mrb[34].mxu0 %v134_v15  ;;  %1286 = vmatmul.mubr.f32.gmra.mrb[34].mxu1 %v23_v16  ;;  %v166_v15 = vld [vmem:[%s2656_s1 + $0x210] sm:$0xff]  ;;  %v55_v16 = vld [vmem:[%s2658_s0 + $0x118] sm:$0xff] }
  0x88   :  { %414 = vmatprep.mubr.f32.mxu0 %v137_v17  ;;  %1288 = vmatprep.mubr.f32.mxu1 %v24_v18  ;;  %v169_v17 = vld [vmem:[%s2656_s1 + $0x228] sm:$0xff]  ;;  %v56_v18 = vld [vmem:[%s2658_s0 + $0x120] sm:$0xff] }
  0x8b   :  { %415 = vmatmul.mubr.f32.gmra.mrb[36].mxu0 %v136_v19  ;;  %1289 = vmatmul.mubr.f32.gmra.mrb[36].mxu1 %v25_v20  ;;  %v168_v19 = vld [vmem:[%s2656_s1 + $0x220] sm:$0xff]  ;;  %v57_v20 = vld [vmem:[%s2658_s0 + $0x128] sm:$0xff] }
  0x8c   :  { %419 = vmatprep.mubr.f32.mxu0 %v139_v21  ;;  %1291 = vmatprep.mubr.f32.mxu1 %v26_v22  ;;  %v171_v21 = vld [vmem:[%s2656_s1 + $0x238] sm:$0xff]  ;;  %v58_v22 = vld [vmem:[%s2658_s0 + $0x130] sm:$0xff] }
  0x8f   :  { %420 = vmatmul.mubr.f32.gmra.mrb[38].mxu0 %v138_v23  ;;  %1292 = vmatmul.mubr.f32.gmra.mrb[38].mxu1 %v27_v24  ;;  %v170_v23 = vld [vmem:[%s2656_s1 + $0x230] sm:$0xff]  ;;  %v59_v24 = vld [vmem:[%s2658_s0 + $0x138] sm:$0xff] }
  0x90   :  { %424 = vmatprep.mubr.f32.mxu0 %v141_v25  ;;  %1294 = vmatprep.mubr.f32.mxu1 %v28_v26  ;;  %v173_v25 = vld [vmem:[%s2656_s1 + $0x248] sm:$0xff]  ;;  %v60_v26 = vld [vmem:[%s2658_s0 + $0x140] sm:$0xff] }
  0x93   :  { %425 = vmatmul.mubr.f32.gmra.mrb[40].mxu0 %v140_v27  ;;  %1295 = vmatmul.mubr.f32.gmra.mrb[40].mxu1 %v29_v28  ;;  %v172_v27 = vld [vmem:[%s2656_s1 + $0x240] sm:$0xff]  ;;  %v61_v28 = vld [vmem:[%s2658_s0 + $0x148] sm:$0xff] }
  0x94   :  { %429 = vmatprep.mubr.f32.mxu0 %v143_v29  ;;  %1297 = vmatprep.mubr.f32.mxu1 %v30_v30  ;;  %v175_v29 = vld [vmem:[%s2656_s1 + $0x258] sm:$0xff]  ;;  %v62_v30 = vld [vmem:[%s2658_s0 + $0x150] sm:$0xff] }
  0x97   :  { %430 = vmatmul.mubr.f32.gmra.mrb[42].mxu0 %v142_v31  ;;  %1298 = vmatmul.mubr.f32.gmra.mrb[42].mxu1 %v31_v32  ;;  %v174_v31 = vld [vmem:[%s2656_s1 + $0x250] sm:$0xff]  ;;  %v63_v32 = vld [vmem:[%s2658_s0 + $0x158] sm:$0xff] }
  0x98   :  { %434 = vmatprep.mubr.f32.mxu0 %v145_v33  ;;  %1300 = vmatprep.mubr.f32.mxu1 %v32_v34  ;;  %v177_v33 = vld [vmem:[%s2656_s1 + $0x268] sm:$0xff]  ;;  %v64_v34 = vld [vmem:[%s2658_s0 + $0x160] sm:$0xff] }
  0x9b   :  { %435 = vmatmul.mubr.f32.gmra.mrb[44].mxu0 %v144_v35  ;;  %1301 = vmatmul.mubr.f32.gmra.mrb[44].mxu1 %v33_v36  ;;  %v176_v35 = vld [vmem:[%s2656_s1 + $0x260] sm:$0xff]  ;;  %v65_v36 = vld [vmem:[%s2658_s0 + $0x168] sm:$0xff] }
  0x9c   :  { %439 = vmatprep.mubr.f32.mxu0 %v147_v37  ;;  %1303 = vmatprep.mubr.f32.mxu1 %v34_v38  ;;  %v179_v37 = vld [vmem:[%s2656_s1 + $0x278] sm:$0xff]  ;;  %v66_v38 = vld [vmem:[%s2658_s0 + $0x170] sm:$0xff] }
  0x9f   :  { %440 = vmatmul.mubr.f32.gmra.mrb[46].mxu0 %v146_v39  ;;  %1304 = vmatmul.mubr.f32.gmra.mrb[46].mxu1 %v35_v40  ;;  %v178_v39 = vld [vmem:[%s2656_s1 + $0x270] sm:$0xff]  ;;  %v67_v40 = vld [vmem:[%s2658_s0 + $0x178] sm:$0xff] }
  0xa0   :  { %444 = vmatprep.mubr.f32.mxu0 %v149_v41  ;;  %1306 = vmatprep.mubr.f32.mxu1 %v36_v42  ;;  %v181_v41 = vld [vmem:[%s2656_s1 + $0x288] sm:$0xff]  ;;  %v68_v42 = vld [vmem:[%s2658_s0 + $0x180] sm:$0xff] }
  0xa3   :  { %445 = vmatmul.mubr.f32.gmra.mrb[48].mxu0 %v148_v43  ;;  %1307 = vmatmul.mubr.f32.gmra.mrb[48].mxu1 %v37_v44  ;;  %v180_v43 = vld [vmem:[%s2656_s1 + $0x280] sm:$0xff]  ;;  %v69_v44 = vld [vmem:[%s2658_s0 + $0x188] sm:$0xff] }
  0xa4   :  { %449 = vmatprep.mubr.f32.mxu0 %v151_v45  ;;  %1309 = vmatprep.mubr.f32.mxu1 %v38_v46  ;;  %v183_v45 = vld [vmem:[%s2656_s1 + $0x298] sm:$0xff]  ;;  %v70_v46 = vld [vmem:[%s2658_s0 + $0x190] sm:$0xff] }
  0xa7   :  { %450 = vmatmul.mubr.f32.gmra.mrb[50].mxu0 %v150_v47  ;;  %1310 = vmatmul.mubr.f32.gmra.mrb[50].mxu1 %v39_v48  ;;  %v182_v47 = vld [vmem:[%s2656_s1 + $0x290] sm:$0xff]  ;;  %v71_v48 = vld [vmem:[%s2658_s0 + $0x198] sm:$0xff] }
  0xa8   :  { %454 = vmatprep.mubr.f32.mxu0 %v153_v49  ;;  %1312 = vmatprep.mubr.f32.mxu1 %v40_v50  ;;  %v185_v49 = vld [vmem:[%s2656_s1 + $0x2a8] sm:$0xff]  ;;  %v72_v50 = vld [vmem:[%s2658_s0 + $0x1a0] sm:$0xff] }
  0xab   :  { %455 = vmatmul.mubr.f32.gmra.mrb[52].mxu0 %v152_v51  ;;  %1313 = vmatmul.mubr.f32.gmra.mrb[52].mxu1 %v41_v52  ;;  %v184_v51 = vld [vmem:[%s2656_s1 + $0x2a0] sm:$0xff]  ;;  %v73_v52 = vld [vmem:[%s2658_s0 + $0x1a8] sm:$0xff] }
  0xac   :  { %459 = vmatprep.mubr.f32.mxu0 %v155_v53  ;;  %1315 = vmatprep.mubr.f32.mxu1 %v42_v54  ;;  %v187_v53 = vld [vmem:[%s2656_s1 + $0x2b8] sm:$0xff]  ;;  %v74_v54 = vld [vmem:[%s2658_s0 + $0x1b0] sm:$0xff] }
  0xaf   :  { %460 = vmatmul.mubr.f32.gmra.mrb[54].mxu0 %v154_v55  ;;  %1316 = vmatmul.mubr.f32.gmra.mrb[54].mxu1 %v43_v56  ;;  %v186_v55 = vld [vmem:[%s2656_s1 + $0x2b0] sm:$0xff]  ;;  %v75_v56 = vld [vmem:[%s2658_s0 + $0x1b8] sm:$0xff] }
  0xb0   :  { %464 = vmatprep.mubr.f32.mxu0 %v157_v57  ;;  %1318 = vmatprep.mubr.f32.mxu1 %v44_v58  ;;  %v189_v57 = vld [vmem:[%s2656_s1 + $0x2c8] sm:$0xff]  ;;  %v76_v58 = vld [vmem:[%s2658_s0 + $0x1c0] sm:$0xff] }
  0xb3   :  { %465 = vmatmul.mubr.f32.gmra.mrb[56].mxu0 %v156_v59  ;;  %1319 = vmatmul.mubr.f32.gmra.mrb[56].mxu1 %v45_v60  ;;  %v188_v59 = vld [vmem:[%s2656_s1 + $0x2c0] sm:$0xff]  ;;  %v77_v60 = vld [vmem:[%s2658_s0 + $0x1c8] sm:$0xff] }
  0xb4   :  { %469 = vmatprep.mubr.f32.mxu0 %v159_v61  ;;  %1321 = vmatprep.mubr.f32.mxu1 %v46_v62  ;;  %v191_v61 = vld [vmem:[%s2656_s1 + $0x2d8] sm:$0xff]  ;;  %v78_v62 = vld [vmem:[%s2658_s0 + $0x1d0] sm:$0xff] }
  0xb7   :  { %470 = vmatmul.mubr.f32.gmra.mrb[58].mxu0 %v158_v63  ;;  %1322 = vmatmul.mubr.f32.gmra.mrb[58].mxu1 %v47_v0  ;;  %v190_v63 = vld [vmem:[%s2656_s1 + $0x2d0] sm:$0xff]  ;;  %v79_v0 = vld [vmem:[%s2658_s0 + $0x1d8] sm:$0xff] }
  0xb8   :  { %474 = vmatprep.mubr.f32.mxu0 %v161_v1  ;;  %1324 = vmatprep.mubr.f32.mxu1 %v48_v2  ;;  %v193_v1 = vld [vmem:[%s2656_s1 + $0x2e8] sm:$0xff]  ;;  %v80_v2 = vld [vmem:[%s2658_s0 + $0x1e0] sm:$0xff] }
  0xbb   :  { %475 = vmatmul.mubr.f32.gmra.mrb[60].mxu0 %v160_v3  ;;  %1325 = vmatmul.mubr.f32.gmra.mrb[60].mxu1 %v49_v4  ;;  %v192_v3 = vld [vmem:[%s2656_s1 + $0x2e0] sm:$0xff]  ;;  %v81_v4 = vld [vmem:[%s2658_s0 + $0x1e8] sm:$0xff] }
  0xbc   :  { %479 = vmatprep.mubr.f32.mxu0 %v163_v5  ;;  %1327 = vmatprep.mubr.f32.mxu1 %v50_v6  ;;  %v195_v5 = vld [vmem:[%s2656_s1 + $0x2f8] sm:$0xff]  ;;  %v82_v6 = vld [vmem:[%s2658_s0 + $0x1f0] sm:$0xff] }
  0xbf   :  { %480 = vmatmul.mubr.f32.gmra.mrb[62].mxu0 %v162_v7  ;;  %1328 = vmatmul.mubr.f32.gmra.mrb[62].mxu1 %v51_v8  ;;  %v194_v7 = vld [vmem:[%s2656_s1 + $0x2f0] sm:$0xff]  ;;  %v83_v8 = vld [vmem:[%s2658_s0 + $0x1f8] sm:$0xff] }
  0xc0   :  { %484 = vmatprep.mubr.f32.mxu0 %v165_v9  ;;  %1330 = vmatprep.mubr.f32.mxu1 %v52_v10 }
  0xc3   :  { %485 = vmatmul.mubr.f32.gmra.mrb[64].mxu0 %v164_v11  ;;  %1331 = vmatmul.mubr.f32.gmra.mrb[64].mxu1 %v53_v12 }
  0xc4   :  { %489 = vmatprep.mubr.f32.mxu0 %v167_v13  ;;  %1333 = vmatprep.mubr.f32.mxu1 %v54_v14 }
  0xc7   :  { %490 = vmatmul.mubr.f32.gmra.mrb[66].mxu0 %v166_v15  ;;  %1334 = vmatmul.mubr.f32.gmra.mrb[66].mxu1 %v55_v16 }
  0xc8   :  { %494 = vmatprep.mubr.f32.mxu0 %v169_v17  ;;  %1336 = vmatprep.mubr.f32.mxu1 %v56_v18 }
  0xcb   :  { %495 = vmatmul.mubr.f32.gmra.mrb[68].mxu0 %v168_v19  ;;  %1337 = vmatmul.mubr.f32.gmra.mrb[68].mxu1 %v57_v20 }
  0xcc   :  { %499 = vmatprep.mubr.f32.mxu0 %v171_v21  ;;  %1339 = vmatprep.mubr.f32.mxu1 %v58_v22 }
  0xcf   :  { %500 = vmatmul.mubr.f32.gmra.mrb[70].mxu0 %v170_v23  ;;  %1340 = vmatmul.mubr.f32.gmra.mrb[70].mxu1 %v59_v24 }
  0xd0   :  { %504 = vmatprep.mubr.f32.mxu0 %v173_v25  ;;  %1342 = vmatprep.mubr.f32.mxu1 %v60_v26 }
  0xd3   :  { %505 = vmatmul.mubr.f32.gmra.mrb[72].mxu0 %v172_v27  ;;  %1343 = vmatmul.mubr.f32.gmra.mrb[72].mxu1 %v61_v28 }
  0xd4   :  { %509 = vmatprep.mubr.f32.mxu0 %v175_v29  ;;  %1345 = vmatprep.mubr.f32.mxu1 %v62_v30 }
  0xd7   :  { %510 = vmatmul.mubr.f32.gmra.mrb[74].mxu0 %v174_v31  ;;  %1346 = vmatmul.mubr.f32.gmra.mrb[74].mxu1 %v63_v32 }
  0xd8   :  { %514 = vmatprep.mubr.f32.mxu0 %v177_v33  ;;  %1348 = vmatprep.mubr.f32.mxu1 %v64_v34 }
  0xdb   :  { %515 = vmatmul.mubr.f32.gmra.mrb[76].mxu0 %v176_v35  ;;  %1349 = vmatmul.mubr.f32.gmra.mrb[76].mxu1 %v65_v36 }
  0xdc   :  { %519 = vmatprep.mubr.f32.mxu0 %v179_v37  ;;  %1351 = vmatprep.mubr.f32.mxu1 %v66_v38 }
  0xdf   :  { %520 = vmatmul.mubr.f32.gmra.mrb[78].mxu0 %v178_v39  ;;  %1352 = vmatmul.mubr.f32.gmra.mrb[78].mxu1 %v67_v40 }
  0xe0   :  { %524 = vmatprep.mubr.f32.mxu0 %v181_v41  ;;  %1354 = vmatprep.mubr.f32.mxu1 %v68_v42 }
  0xe3   :  { %525 = vmatmul.mubr.f32.gmra.mrb[80].mxu0 %v180_v43  ;;  %1355 = vmatmul.mubr.f32.gmra.mrb[80].mxu1 %v69_v44 }
  0xe4   :  { %529 = vmatprep.mubr.f32.mxu0 %v183_v45  ;;  %1357 = vmatprep.mubr.f32.mxu1 %v70_v46 }
  0xe7   :  { %530 = vmatmul.mubr.f32.gmra.mrb[82].mxu0 %v182_v47  ;;  %1358 = vmatmul.mubr.f32.gmra.mrb[82].mxu1 %v71_v48 }
  0xe8   :  { %534 = vmatprep.mubr.f32.mxu0 %v185_v49  ;;  %1360 = vmatprep.mubr.f32.mxu1 %v72_v50 }
  0xeb   :  { %535 = vmatmul.mubr.f32.gmra.mrb[84].mxu0 %v184_v51  ;;  %1361 = vmatmul.mubr.f32.gmra.mrb[84].mxu1 %v73_v52 }
  0xec   :  { %539 = vmatprep.mubr.f32.mxu0 %v187_v53  ;;  %1363 = vmatprep.mubr.f32.mxu1 %v74_v54 }
  0xef   :  { %540 = vmatmul.mubr.f32.gmra.mrb[86].mxu0 %v186_v55  ;;  %1364 = vmatmul.mubr.f32.gmra.mrb[86].mxu1 %v75_v56 }
  0xf0   :  { %544 = vmatprep.mubr.f32.mxu0 %v189_v57  ;;  %1366 = vmatprep.mubr.f32.mxu1 %v76_v58 }
  0xf3   :  { %545 = vmatmul.mubr.f32.gmra.mrb[88].mxu0 %v188_v59  ;;  %1367 = vmatmul.mubr.f32.gmra.mrb[88].mxu1 %v77_v60 }
  0xf4   :  { %549 = vmatprep.mubr.f32.mxu0 %v191_v61  ;;  %1369 = vmatprep.mubr.f32.mxu1 %v78_v62 }
  0xf7   :  { %550 = vmatmul.mubr.f32.gmra.mrb[90].mxu0 %v190_v63  ;;  %1370 = vmatmul.mubr.f32.gmra.mrb[90].mxu1 %v79_v0 }
  0xf8   :  { %554 = vmatprep.mubr.f32.mxu0 %v193_v1  ;;  %1372 = vmatprep.mubr.f32.mxu1 %v80_v2 }
  0xfb   :  { %555 = vmatmul.mubr.f32.gmra.mrb[92].mxu0 %v192_v3  ;;  %1373 = vmatmul.mubr.f32.gmra.mrb[92].mxu1 %v81_v4 }
  0xfc   :  { %559 = vmatprep.mubr.f32.mxu0 %v195_v5  ;;  %1375 = vmatprep.mubr.f32.mxu1 %v82_v6 }
  0xff   :  { %560 = vmatmul.mubr.f32.gmra.mrb[94].mxu0 %v194_v7  ;;  %1376 = vmatmul.mubr.f32.gmra.mrb[94].mxu1 %v83_v8 }
 0x116   :  { %v2274_v9 = vpop.f32.mrb[0].mxu1  ;;  %v2276_v10 = vpop.f32.mrb[0].mxu0 }
 0x117   :  { %v568_v11 = vpop.f32.mrb[1].mxu1  ;;  %v328_v12 = vpop.f32.mrb[1].mxu0 }
 0x118   :  { %v2341_v12 = vld [vmem:[%s2659_s4] ss:$0 sm:$0xff] }
 0x11a   :  { %v2278_v13 = vpop.f32.mrb[2].mxu1  ;;  %v2280_v14 = vpop.f32.mrb[2].mxu0 }
 0x11b   :  { %v573_v15 = vpop.f32.mrb[3].mxu1  ;;  %v333_v16 = vpop.f32.mrb[3].mxu0 }
 0x11e   :  { %v2282_v17 = vpop.f32.mrb[4].mxu1  ;;  %v2284_v18 = vpop.f32.mrb[4].mxu0 }
 0x11f   :  { %v578_v19 = vpop.f32.mrb[5].mxu1  ;;  %v338_v20 = vpop.f32.mrb[5].mxu0 }
 0x122   :  { %v2286_v21 = vpop.f32.mrb[6].mxu1  ;;  %v2288_v22 = vpop.f32.mrb[6].mxu0 }
 0x123   :  { %v583_v23 = vpop.f32.mrb[7].mxu1  ;;  %v343_v24 = vpop.f32.mrb[7].mxu0 }
 0x126   :  { %v2290_v25 = vpop.f32.mrb[8].mxu1  ;;  %v2292_v26 = vpop.f32.mrb[8].mxu0 }
 0x127   :  { %v588_v27 = vpop.f32.mrb[9].mxu1  ;;  %v348_v28 = vpop.f32.mrb[9].mxu0 }
 0x12a   :  { %v2294_v29 = vpop.f32.mrb[10].mxu1  ;;  %v2296_v30 = vpop.f32.mrb[10].mxu0 }
 0x12b   :  { %v593_v31 = vpop.f32.mrb[11].mxu1  ;;  %v353_v32 = vpop.f32.mrb[11].mxu0 }
 0x12e   :  { %v2298_v33 = vpop.f32.mrb[12].mxu1  ;;  %v2300_v34 = vpop.f32.mrb[12].mxu0 }
 0x12f   :  { %v598_v35 = vpop.f32.mrb[13].mxu1  ;;  %v358_v36 = vpop.f32.mrb[13].mxu0 }
 0x132   :  { %v2302_v37 = vpop.f32.mrb[14].mxu1  ;;  %v2304_v38 = vpop.f32.mrb[14].mxu0 }
 0x133   :  { %v603_v39 = vpop.f32.mrb[15].mxu1  ;;  %v363_v40 = vpop.f32.mrb[15].mxu0 }
 0x136   :  { %v2306_v41 = vpop.f32.mrb[16].mxu1  ;;  %v2308_v42 = vpop.f32.mrb[16].mxu0 }
 0x137   :  { %v608_v43 = vpop.f32.mrb[17].mxu1  ;;  %v368_v44 = vpop.f32.mrb[17].mxu0 }
 0x13a   :  { %v2310_v45 = vpop.f32.mrb[18].mxu1  ;;  %v2312_v46 = vpop.f32.mrb[18].mxu0 }
 0x13b   :  { %v613_v47 = vpop.f32.mrb[19].mxu1  ;;  %v373_v48 = vpop.f32.mrb[19].mxu0 }
 0x13e   :  { %v2314_v49 = vpop.f32.mrb[20].mxu1  ;;  %v2316_v50 = vpop.f32.mrb[20].mxu0 }
 0x13f   :  { %v618_v51 = vpop.f32.mrb[21].mxu1  ;;  %v378_v52 = vpop.f32.mrb[21].mxu0 }
 0x142   :  { %v2318_v53 = vpop.f32.mrb[22].mxu1  ;;  %v2320_v54 = vpop.f32.mrb[22].mxu0 }
 0x143   :  { %v623_v55 = vpop.f32.mrb[23].mxu1  ;;  %v383_v56 = vpop.f32.mrb[23].mxu0 }
 0x146   :  { %v2322_v57 = vpop.f32.mrb[24].mxu1  ;;  %v2324_v58 = vpop.f32.mrb[24].mxu0 }
 0x147   :  { %v628_v59 = vpop.f32.mrb[25].mxu1  ;;  %v388_v60 = vpop.f32.mrb[25].mxu0 }
 0x14a   :  { %v2326_v61 = vpop.f32.mrb[26].mxu1  ;;  %v2328_v62 = vpop.f32.mrb[26].mxu0 }
 0x14b   :  { %v633_v63 = vpop.f32.mrb[27].mxu1  ;;  %v393_v0 = vpop.f32.mrb[27].mxu0 }
 0x14e   :  { %v2330_v1 = vpop.f32.mrb[28].mxu1  ;;  %v2332_v2 = vpop.f32.mrb[28].mxu0 }
 0x14f   :  { %v638_v3 = vpop.f32.mrb[29].mxu1  ;;  %v398_v4 = vpop.f32.mrb[29].mxu0 }
 0x152   :  { %v2334_v5 = vpop.f32.mrb[30].mxu1  ;;  %v2336_v6 = vpop.f32.mrb[30].mxu0 }
 0x153   :  { %v643_v7 = vpop.f32.mrb[31].mxu1  ;;  %v403_v8 = vpop.f32.mrb[31].mxu0 }
 0x156   :  { %v1284_v11 = vpop.f32.mrb[32].mxu1  ;;  %v2343_v15 = vpop.f32.mrb[32].mxu0 }
 0x157   :  { %v717_v16 = vadd.f32 %v1284_v11, %v2280_v14  ;;  %v711_v19 = vpop.f32.mrb[33].mxu1  ;;  %v408_v20 = vpop.f32.mrb[33].mxu0 }
 0x158   :  { %v712_v23 = vadd.f32 %v711_v19, %v2276_v10 }
 0x159   :  { %v1038_v24 = vadd.f32 %v2341_v12, %v717_v16 }
 0x15a   :  { %v1037_v27 = vadd.f32 %v2341_v12, %v712_v23  ;;  %v1287_v28 = vpop.f32.mrb[34].mxu1  ;;  %v2349_v31 = vpop.f32.mrb[34].mxu0 }
 0x15b   :  { %1102 = vst [vmem:[%s2660_s5 + $0x8] sm:$0xff] %v1038_v24  ;;  %v727_v32 = vadd.f32 %v1287_v28, %v2288_v22  ;;  %v721_v35 = vpop.f32.mrb[35].mxu1  ;;  %v413_v36 = vpop.f32.mrb[35].mxu0 }
 0x15c   :  { %1101 = vst [vmem:[%s2660_s5] sm:$0xff] %v1037_v27  ;;  %v722_v10 = vadd.f32 %v721_v35, %v2284_v18 }
 0x15d   :  { %v1040_v14 = vadd.f32 %v2341_v12, %v727_v32 }
 0x15e   :  { %v1039_v39 = vadd.f32 %v2341_v12, %v722_v10  ;;  %v1290_v40 = vpop.f32.mrb[36].mxu1  ;;  %v2361_v43 = vpop.f32.mrb[36].mxu0 }
 0x15f   :  { %1104 = vst [vmem:[%s2660_s5 + $0x18] sm:$0xff] %v1040_v14  ;;  %v737_v22 = vadd.f32 %v1290_v40, %v2296_v30  ;;  %v731_v44 = vpop.f32.mrb[37].mxu1  ;;  %v418_v47 = vpop.f32.mrb[37].mxu0 }
 0x160   :  { %1103 = vst [vmem:[%s2660_s5 + $0x10] sm:$0xff] %v1039_v39  ;;  %v732_v18 = vadd.f32 %v731_v44, %v2292_v26 }
 0x161   :  { %v1042_v48 = vadd.f32 %v2341_v12, %v737_v22 }
 0x162   :  { %v1041_v51 = vadd.f32 %v2341_v12, %v732_v18  ;;  %v1293_v52 = vpop.f32.mrb[38].mxu1  ;;  %v421_v55 = vpop.f32.mrb[38].mxu0 }
 0x163   :  { %1106 = vst [vmem:[%s2660_s5 + $0x28] sm:$0xff] %v1042_v48  ;;  %v747_v30 = vadd.f32 %v1293_v52, %v2304_v38  ;;  %v741_v56 = vpop.f32.mrb[39].mxu1  ;;  %v423_v59 = vpop.f32.mrb[39].mxu0 }
 0x164   :  { %1105 = vst [vmem:[%s2660_s5 + $0x20] sm:$0xff] %v1041_v51  ;;  %v742_v26 = vadd.f32 %v741_v56, %v2300_v34 }
 0x165   :  { %v1044_v60 = vadd.f32 %v2341_v12, %v747_v30 }
 0x166   :  { %v1043_v63 = vadd.f32 %v2341_v12, %v742_v26  ;;  %v1296_v0 = vpop.f32.mrb[40].mxu1  ;;  %v2383_v3 = vpop.f32.mrb[40].mxu0 }
 0x167   :  { %1108 = vst [vmem:[%s2660_s5 + $0x38] sm:$0xff] %v1044_v60  ;;  %v757_v38 = vadd.f32 %v1296_v0, %v2312_v46  ;;  %v751_v4 = vpop.f32.mrb[41].mxu1  ;;  %v428_v7 = vpop.f32.mrb[41].mxu0 }
 0x168   :  { %1107 = vst [vmem:[%s2660_s5 + $0x30] sm:$0xff] %v1043_v63  ;;  %v752_v34 = vadd.f32 %v751_v4, %v2308_v42 }
 0x169   :  { %v1046_v8 = vadd.f32 %v2341_v12, %v757_v38 }
 0x16a   :  { %v1045_v11 = vadd.f32 %v2341_v12, %v752_v34  ;;  %v1299_v16 = vpop.f32.mrb[42].mxu1  ;;  %v431_v19 = vpop.f32.mrb[42].mxu0 }
 0x16b   :  { %1110 = vst [vmem:[%s2660_s5 + $0x48] sm:$0xff] %v1046_v8  ;;  %v767_v46 = vadd.f32 %v1299_v16, %v2320_v54  ;;  %v761_v20 = vpop.f32.mrb[43].mxu1  ;;  %v433_v23 = vpop.f32.mrb[43].mxu0 }
 0x16c   :  { %1109 = vst [vmem:[%s2660_s5 + $0x40] sm:$0xff] %v1045_v11  ;;  %v762_v42 = vadd.f32 %v761_v20, %v2316_v50 }
 0x16d   :  { %v1048_v24 = vadd.f32 %v2341_v12, %v767_v46 }
 0x16e   :  { %v1047_v27 = vadd.f32 %v2341_v12, %v762_v42  ;;  %v1302_v28 = vpop.f32.mrb[44].mxu1  ;;  %v436_v32 = vpop.f32.mrb[44].mxu0 }
 0x16f   :  { %1112 = vst [vmem:[%s2660_s5 + $0x58] sm:$0xff] %v1048_v24  ;;  %v777_v54 = vadd.f32 %v1302_v28, %v2328_v62  ;;  %v771_v35 = vpop.f32.mrb[45].mxu1  ;;  %v438_v36 = vpop.f32.mrb[45].mxu0 }
 0x170   :  { %1111 = vst [vmem:[%s2660_s5 + $0x50] sm:$0xff] %v1047_v27  ;;  %v772_v50 = vadd.f32 %v771_v35, %v2324_v58 }
 0x171   :  { %v1050_v10 = vadd.f32 %v2341_v12, %v777_v54 }
 0x172   :  { %v1049_v14 = vadd.f32 %v2341_v12, %v772_v50  ;;  %v1305_v39 = vpop.f32.mrb[46].mxu1  ;;  %v441_v40 = vpop.f32.mrb[46].mxu0 }
 0x173   :  { %1114 = vst [vmem:[%s2660_s5 + $0x68] sm:$0xff] %v1050_v10  ;;  %v787_v62 = vadd.f32 %v1305_v39, %v2336_v6  ;;  %v781_v22 = vpop.f32.mrb[47].mxu1  ;;  %v443_v44 = vpop.f32.mrb[47].mxu0 }
 0x174   :  { %1113 = vst [vmem:[%s2660_s5 + $0x60] sm:$0xff] %v1049_v14  ;;  %v782_v58 = vadd.f32 %v781_v22, %v2332_v2 }
 0x175   :  { %v1052_v47 = vadd.f32 %v2341_v12, %v787_v62 }
 0x176   :  { %v1051_v18 = vadd.f32 %v2341_v12, %v782_v58  ;;  %v1308_v48 = vpop.f32.mrb[48].mxu1  ;;  %v446_v51 = vpop.f32.mrb[48].mxu0 }
 0x177   :  { %1116 = vst [vmem:[%s2660_s5 + $0x78] sm:$0xff] %v1052_v47  ;;  %v797_v6 = vadd.f32 %v1308_v48, %v2349_v31  ;;  %v791_v52 = vpop.f32.mrb[49].mxu1  ;;  %v448_v30 = vpop.f32.mrb[49].mxu0 }
 0x178   :  { %1115 = vst [vmem:[%s2660_s5 + $0x70] sm:$0xff] %v1051_v18  ;;  %v792_v2 = vadd.f32 %v791_v52, %v2343_v15 }
 0x179   :  { %v1054_v56 = vadd.f32 %v2341_v12, %v797_v6 }
 0x17a   :  { %v1053_v59 = vadd.f32 %v2341_v12, %v792_v2  ;;  %v1311_v26 = vpop.f32.mrb[50].mxu1  ;;  %v451_v60 = vpop.f32.mrb[50].mxu0 }
 0x17b   :  { %1118 = vst [vmem:[%s2660_s5 + $0x88] sm:$0xff] %v1054_v56  ;;  %v807_v63 = vadd.f32 %v1311_v26, %v421_v55  ;;  %v801_v31 = vpop.f32.mrb[51].mxu1  ;;  %v453_v0 = vpop.f32.mrb[51].mxu0 }
 0x17c   :  { %1117 = vst [vmem:[%s2660_s5 + $0x80] sm:$0xff] %v1053_v59  ;;  %v802_v38 = vadd.f32 %v801_v31, %v2361_v43 }
 0x17d   :  { %v1056_v15 = vadd.f32 %v2341_v12, %v807_v63 }
 0x17e   :  { %v1055_v4 = vadd.f32 %v2341_v12, %v802_v38  ;;  %v1314_v7 = vpop.f32.mrb[52].mxu1  ;;  %v456_v34 = vpop.f32.mrb[52].mxu0 }
 0x17f   :  { %1120 = vst [vmem:[%s2660_s5 + $0x98] sm:$0xff] %v1056_v15  ;;  %v817_v8 = vadd.f32 %v1314_v7, %v431_v19  ;;  %v811_v55 = vpop.f32.mrb[53].mxu1  ;;  %v458_v11 = vpop.f32.mrb[53].mxu0 }
 0x180   :  { %1119 = vst [vmem:[%s2660_s5 + $0x90] sm:$0xff] %v1055_v4  ;;  %v812_v16 = vadd.f32 %v811_v55, %v2383_v3 }
 0x181   :  { %v1058_v43 = vadd.f32 %v2341_v12, %v817_v8 }
 0x182   :  { %v1057_v46 = vadd.f32 %v2341_v12, %v812_v16  ;;  %v1317_v20 = vpop.f32.mrb[54].mxu1  ;;  %v461_v23 = vpop.f32.mrb[54].mxu0 }
 0x183   :  { %1122 = vst [vmem:[%s2660_s5 + $0xa8] sm:$0xff] %v1058_v43  ;;  %v827_v42 = vadd.f32 %v1317_v20, %v441_v40  ;;  %v821_v19 = vpop.f32.mrb[55].mxu1  ;;  %v463_v24 = vpop.f32.mrb[55].mxu0 }
 0x184   :  { %1121 = vst [vmem:[%s2660_s5 + $0xa0] sm:$0xff] %v1057_v46  ;;  %v822_v27 = vadd.f32 %v821_v19, %v436_v32 }
 0x185   :  { %v1060_v3 = vadd.f32 %v2341_v12, %v827_v42 }
 0x186   :  { %v1059_v28 = vadd.f32 %v2341_v12, %v822_v27  ;;  %v1320_v54 = vpop.f32.mrb[56].mxu1  ;;  %v466_v35 = vpop.f32.mrb[56].mxu0 }
 0x187   :  { %1124 = vst [vmem:[%s2660_s5 + $0xb8] sm:$0xff] %v1060_v3  ;;  %v837_v36 = vadd.f32 %v1320_v54, %v451_v60  ;;  %v831_v50 = vpop.f32.mrb[57].mxu1  ;;  %v468_v10 = vpop.f32.mrb[57].mxu0 }
 0x188   :  { %1123 = vst [vmem:[%s2660_s5 + $0xb0] sm:$0xff] %v1059_v28  ;;  %v832_v14 = vadd.f32 %v831_v50, %v446_v51 }
 0x189   :  { %v1062_v32 = vadd.f32 %v2341_v12, %v837_v36 }
 0x18a   :  { %v1061_v39 = vadd.f32 %v2341_v12, %v832_v14  ;;  %v1323_v40 = vpop.f32.mrb[58].mxu1  ;;  %v471_v62 = vpop.f32.mrb[58].mxu0 }
 0x18b   :  { %1126 = vst [vmem:[%s2660_s5 + $0xc8] sm:$0xff] %v1062_v32  ;;  %v847_v22 = vadd.f32 %v1323_v40, %v461_v23  ;;  %v841_v44 = vpop.f32.mrb[59].mxu1  ;;  %v473_v58 = vpop.f32.mrb[59].mxu0 }
 0x18c   :  { %1125 = vst [vmem:[%s2660_s5 + $0xc0] sm:$0xff] %v1061_v39  ;;  %v842_v47 = vadd.f32 %v841_v44, %v456_v34 }
 0x18d   :  { %v1064_v18 = vadd.f32 %v2341_v12, %v847_v22 }
 0x18e   :  { %v1063_v48 = vadd.f32 %v2341_v12, %v842_v47  ;;  %v1326_v51 = vpop.f32.mrb[60].mxu1  ;;  %v476_v6 = vpop.f32.mrb[60].mxu0 }
 0x18f   :  { %1128 = vst [vmem:[%s2660_s5 + $0xd8] sm:$0xff] %v1064_v18  ;;  %v857_v52 = vadd.f32 %v1326_v51, %v471_v62  ;;  %v851_v30 = vpop.f32.mrb[61].mxu1  ;;  %v478_v2 = vpop.f32.mrb[61].mxu0 }
 0x190   :  { %1127 = vst [vmem:[%s2660_s5 + $0xd0] sm:$0xff] %v1063_v48  ;;  %v852_v56 = vadd.f32 %v851_v30, %v466_v35 }
 0x191   :  { %v1066_v59 = vadd.f32 %v2341_v12, %v857_v52 }
 0x192   :  { %v1065_v26 = vadd.f32 %v2341_v12, %v852_v56  ;;  %v1329_v60 = vpop.f32.mrb[62].mxu1  ;;  %v481_v63 = vpop.f32.mrb[62].mxu0 }
 0x193   :  { %1130 = vst [vmem:[%s2660_s5 + $0xe8] sm:$0xff] %v1066_v59  ;;  %v867_v31 = vadd.f32 %v1329_v60, %v481_v63  ;;  %v861_v0 = vpop.f32.mrb[63].mxu1  ;;  %v483_v38 = vpop.f32.mrb[63].mxu0 }
 0x194   :  { %1129 = vst [vmem:[%s2660_s5 + $0xe0] sm:$0xff] %v1065_v26  ;;  %v862_v15 = vadd.f32 %v861_v0, %v476_v6 }
 0x195   :  { %v1068_v4 = vadd.f32 %v2341_v12, %v867_v31 }
 0x196   :  { %v1067_v7 = vadd.f32 %v2341_v12, %v862_v15  ;;  %v1332_v34 = vpop.f32.mrb[64].mxu1  ;;  %v486_v8 = vpop.f32.mrb[64].mxu0 }
 0x197   :  { %1132 = vst [vmem:[%s2660_s5 + $0xf8] sm:$0xff] %v1068_v4  ;;  %v871_v55 = vpop.f32.mrb[65].mxu1  ;;  %v488_v11 = vpop.f32.mrb[65].mxu0 }
 0x198   :  { %1131 = vst [vmem:[%s2660_s5 + $0xf0] sm:$0xff] %v1067_v7  ;;  %v872_v16 = vadd.f32 %v871_v55, %v486_v8 }
 0x19a   :  { %v1069_v43 = vadd.f32 %v2341_v12, %v872_v16  ;;  %v491_v46 = vpop.f32.mrb[66].mxu0  ;;  %v1335_v20 = vpop.f32.mrb[66].mxu1 }
 0x19b   :  { %v877_v23 = vadd.f32 %v1332_v34, %v491_v46  ;;  %v881_v42 = vpop.f32.mrb[67].mxu1  ;;  %v493_v19 = vpop.f32.mrb[67].mxu0 }
 0x19c   :  { %1133 = vst [vmem:[%s2660_s5 + $0x100] sm:$0xff] %v1069_v43 }
 0x19d   :  { %v1070_v24 = vadd.f32 %v2341_v12, %v877_v23 }
 0x19e   :  { %v496_v27 = vpop.f32.mrb[68].mxu0  ;;  %v1338_v3 = vpop.f32.mrb[68].mxu1 }
 0x19f   :  { %1134 = vst [vmem:[%s2660_s5 + $0x108] sm:$0xff] %v1070_v24  ;;  %v882_v28 = vadd.f32 %v881_v42, %v496_v27  ;;  %v891_v54 = vpop.f32.mrb[69].mxu1  ;;  %v498_v35 = vpop.f32.mrb[69].mxu0 }
 0x1a1   :  { %v1071_v36 = vadd.f32 %v2341_v12, %v882_v28 }
 0x1a2   :  { %v501_v50 = vpop.f32.mrb[70].mxu0  ;;  %v1341_v10 = vpop.f32.mrb[70].mxu1 }
 0x1a3   :  { %1135 = vst [vmem:[%s2660_s5 + $0x110] sm:$0xff] %v1071_v36  ;;  %v887_v14 = vadd.f32 %v1335_v20, %v501_v50  ;;  %v901_v32 = vpop.f32.mrb[71].mxu1  ;;  %v503_v39 = vpop.f32.mrb[71].mxu0 }
 0x1a5   :  { %v1072_v40 = vadd.f32 %v2341_v12, %v887_v14 }
 0x1a6   :  { %v506_v62 = vpop.f32.mrb[72].mxu0  ;;  %v1344_v22 = vpop.f32.mrb[72].mxu1 }
 0x1a7   :  { %1136 = vst [vmem:[%s2660_s5 + $0x118] sm:$0xff] %v1072_v40  ;;  %v892_v44 = vadd.f32 %v891_v54, %v506_v62  ;;  %v911_v58 = vpop.f32.mrb[73].mxu1  ;;  %v508_v47 = vpop.f32.mrb[73].mxu0 }
 0x1a9   :  { %v1073_v18 = vadd.f32 %v2341_v12, %v892_v44 }
 0x1aa   :  { %v511_v48 = vpop.f32.mrb[74].mxu0  ;;  %v1347_v51 = vpop.f32.mrb[74].mxu1 }
 0x1ab   :  { %1137 = vst [vmem:[%s2660_s5 + $0x120] sm:$0xff] %v1073_v18  ;;  %v897_v6 = vadd.f32 %v1338_v3, %v511_v48  ;;  %v921_v52 = vpop.f32.mrb[75].mxu1  ;;  %v513_v30 = vpop.f32.mrb[75].mxu0 }
 0x1ad   :  { %v1074_v2 = vadd.f32 %v2341_v12, %v897_v6 }
 0x1ae   :  { %v516_v56 = vpop.f32.mrb[76].mxu0  ;;  %v2520_v59 = vpop.f32.mrb[76].mxu1 }
 0x1af   :  { %1138 = vst [vmem:[%s2660_s5 + $0x128] sm:$0xff] %v1074_v2  ;;  %v902_v26 = vadd.f32 %v901_v32, %v516_v56  ;;  %v2525_v60 = vpop.f32.mrb[77].mxu1  ;;  %v518_v63 = vpop.f32.mrb[77].mxu0 }
 0x1b1   :  { %v1075_v31 = vadd.f32 %v2341_v12, %v902_v26 }
 0x1b2   :  { %v521_v0 = vpop.f32.mrb[78].mxu0  ;;  %v2528_v38 = vpop.f32.mrb[78].mxu1 }
 0x1b3   :  { %1139 = vst [vmem:[%s2660_s5 + $0x130] sm:$0xff] %v1075_v31  ;;  %v907_v15 = vadd.f32 %v1341_v10, %v521_v0  ;;  %v2533_v4 = vpop.f32.mrb[79].mxu1  ;;  %v523_v7 = vpop.f32.mrb[79].mxu0 }
 0x1b5   :  { %v1076_v34 = vadd.f32 %v2341_v12, %v907_v15 }
 0x1b6   :  { %v526_v8 = vpop.f32.mrb[80].mxu0  ;;  %v1356_v55 = vpop.f32.mrb[80].mxu1 }
 0x1b7   :  { %1140 = vst [vmem:[%s2660_s5 + $0x138] sm:$0xff] %v1076_v34  ;;  %v912_v11 = vadd.f32 %v911_v58, %v526_v8  ;;  %v957_v16 = vadd.f32 %v1356_v55, %v2278_v13  ;;  %v951_v43 = vpop.f32.mrb[81].mxu1  ;;  %v528_v46 = vpop.f32.mrb[81].mxu0 }
 0x1b8   :  { %v952_v20 = vadd.f32 %v951_v43, %v2274_v9 }
 0x1b9   :  { %v1077_v23 = vadd.f32 %v2341_v12, %v912_v11  ;;  %v1086_v42 = vadd.f32 %v2341_v12, %v957_v16 }
 0x1ba   :  { %v1085_v19 = vadd.f32 %v2341_v12, %v952_v20  ;;  %v531_v24 = vpop.f32.mrb[82].mxu0  ;;  %v1359_v27 = vpop.f32.mrb[82].mxu1 }
 0x1bb   :  { %1141 = vst [vmem:[%s2660_s5 + $0x140] sm:$0xff] %v1077_v23  ;;  %1150 = vst [vmem:[%s2660_s5 + $0x188] sm:$0xff] %v1086_v42  ;;  %v917_v13 = vadd.f32 %v1344_v22, %v531_v24  ;;  %v967_v3 = vadd.f32 %v1359_v27, %v2286_v21  ;;  %v961_v9 = vpop.f32.mrb[83].mxu1  ;;  %v533_v28 = vpop.f32.mrb[83].mxu0 }
 0x1bc   :  { %1149 = vst [vmem:[%s2660_s5 + $0x180] sm:$0xff] %v1085_v19  ;;  %v962_v54 = vadd.f32 %v961_v9, %v2282_v17 }
 0x1bd   :  { %v1078_v35 = vadd.f32 %v2341_v12, %v917_v13  ;;  %v1088_v36 = vadd.f32 %v2341_v12, %v967_v3 }
 0x1be   :  { %v1087_v50 = vadd.f32 %v2341_v12, %v962_v54  ;;  %v536_v10 = vpop.f32.mrb[84].mxu0  ;;  %v1362_v14 = vpop.f32.mrb[84].mxu1 }
 0x1bf   :  { %1142 = vst [vmem:[%s2660_s5 + $0x148] sm:$0xff] %v1078_v35  ;;  %1152 = vst [vmem:[%s2660_s5 + $0x198] sm:$0xff] %v1088_v36  ;;  %v922_v21 = vadd.f32 %v921_v52, %v536_v10  ;;  %v977_v32 = vadd.f32 %v1362_v14, %v2294_v29  ;;  %v971_v17 = vpop.f32.mrb[85].mxu1  ;;  %v538_v39 = vpop.f32.mrb[85].mxu0 }
 0x1c0   :  { %1151 = vst [vmem:[%s2660_s5 + $0x190] sm:$0xff] %v1087_v50  ;;  %v972_v40 = vadd.f32 %v971_v17, %v2290_v25 }
 0x1c1   :  { %v1079_v62 = vadd.f32 %v2341_v12, %v922_v21  ;;  %v1090_v22 = vadd.f32 %v2341_v12, %v977_v32 }
 0x1c2   :  { %v1089_v44 = vadd.f32 %v2341_v12, %v972_v40  ;;  %v541_v58 = vpop.f32.mrb[86].mxu0  ;;  %v1365_v47 = vpop.f32.mrb[86].mxu1 }
 0x1c3   :  { %1143 = vst [vmem:[%s2660_s5 + $0x150] sm:$0xff] %v1079_v62  ;;  %1154 = vst [vmem:[%s2660_s5 + $0x1a8] sm:$0xff] %v1090_v22  ;;  %v927_v29 = vadd.f32 %v1347_v51, %v541_v58  ;;  %v987_v18 = vadd.f32 %v1365_v47, %v2302_v37  ;;  %v981_v25 = vpop.f32.mrb[87].mxu1  ;;  %v543_v48 = vpop.f32.mrb[87].mxu0 }
 0x1c4   :  { %1153 = vst [vmem:[%s2660_s5 + $0x1a0] sm:$0xff] %v1089_v44  ;;  %v982_v6 = vadd.f32 %v981_v25, %v2298_v33 }
 0x1c5   :  { %v1080_v52 = vadd.f32 %v2341_v12, %v927_v29  ;;  %v1092_v30 = vadd.f32 %v2341_v12, %v987_v18 }
 0x1c6   :  { %v1091_v2 = vadd.f32 %v2341_v12, %v982_v6  ;;  %v546_v56 = vpop.f32.mrb[88].mxu0  ;;  %v1368_v26 = vpop.f32.mrb[88].mxu1 }
 0x1c7   :  { %1144 = vst [vmem:[%s2660_s5 + $0x158] sm:$0xff] %v1080_v52  ;;  %1156 = vst [vmem:[%s2660_s5 + $0x1b8] sm:$0xff] %v1092_v30  ;;  %v932_v37 = vadd.f32 %v2525_v60, %v546_v56  ;;  %v997_v33 = vadd.f32 %v1368_v26, %v2310_v45  ;;  %v991_v51 = vpop.f32.mrb[89].mxu1  ;;  %v548_v63 = vpop.f32.mrb[89].mxu0 }
 0x1c8   :  { %1155 = vst [vmem:[%s2660_s5 + $0x1b0] sm:$0xff] %v1091_v2  ;;  %v992_v31 = vadd.f32 %v991_v51, %v2306_v41 }
 0x1c9   :  { %v1081_v0 = vadd.f32 %v2341_v12, %v932_v37  ;;  %v1094_v15 = vadd.f32 %v2341_v12, %v997_v33 }
 0x1ca   :  { %v1093_v7 = vadd.f32 %v2341_v12, %v992_v31  ;;  %v551_v34 = vpop.f32.mrb[90].mxu0  ;;  %v1371_v8 = vpop.f32.mrb[90].mxu1 }
 0x1cb   :  { %1145 = vst [vmem:[%s2660_s5 + $0x160] sm:$0xff] %v1081_v0  ;;  %1158 = vst [vmem:[%s2660_s5 + $0x1c8] sm:$0xff] %v1094_v15  ;;  %v937_v45 = vadd.f32 %v2520_v59, %v551_v34  ;;  %v1007_v41 = vadd.f32 %v1371_v8, %v2318_v53  ;;  %v1001_v60 = vpop.f32.mrb[91].mxu1  ;;  %v553_v55 = vpop.f32.mrb[91].mxu0 }
 0x1cc   :  { %1157 = vst [vmem:[%s2660_s5 + $0x1c0] sm:$0xff] %v1093_v7  ;;  %v1002_v11 = vadd.f32 %v1001_v60, %v2314_v49 }
 0x1cd   :  { %v1082_v16 = vadd.f32 %v2341_v12, %v937_v45  ;;  %v1096_v43 = vadd.f32 %v2341_v12, %v1007_v41 }
 0x1ce   :  { %v1095_v46 = vadd.f32 %v2341_v12, %v1002_v11  ;;  %v556_v20 = vpop.f32.mrb[92].mxu0  ;;  %v1374_v23 = vpop.f32.mrb[92].mxu1 }
 0x1cf   :  { %1146 = vst [vmem:[%s2660_s5 + $0x168] sm:$0xff] %v1082_v16  ;;  %1160 = vst [vmem:[%s2660_s5 + $0x1d8] sm:$0xff] %v1096_v43  ;;  %v942_v53 = vadd.f32 %v2533_v4, %v556_v20  ;;  %v1017_v49 = vadd.f32 %v1374_v23, %v2326_v61  ;;  %v1011_v59 = vpop.f32.mrb[93].mxu1  ;;  %v558_v42 = vpop.f32.mrb[93].mxu0 }
 0x1d0   :  { %1159 = vst [vmem:[%s2660_s5 + $0x1d0] sm:$0xff] %v1095_v46  ;;  %v1012_v19 = vadd.f32 %v1011_v59, %v2322_v57 }
 0x1d1   :  { %v1083_v24 = vadd.f32 %v2341_v12, %v942_v53  ;;  %v1098_v27 = vadd.f32 %v2341_v12, %v1017_v49 }
 0x1d2   :  { %v1097_v13 = vadd.f32 %v2341_v12, %v1012_v19  ;;  %v561_v3 = vpop.f32.mrb[94].mxu0  ;;  %v1377_v9 = vpop.f32.mrb[94].mxu1 }
 0x1d3   :  { %1147 = vst [vmem:[%s2660_s5 + $0x170] sm:$0xff] %v1083_v24  ;;  %1162 = vst [vmem:[%s2660_s5 + $0x1e8] sm:$0xff] %v1098_v27  ;;  %v947_v61 = vadd.f32 %v2528_v38, %v561_v3  ;;  %v1027_v57 = vadd.f32 %v1377_v9, %v2334_v5  ;;  %v1021_v4 = vpop.f32.mrb[95].mxu1  ;;  %v563_v28 = vpop.f32.mrb[95].mxu0 }
 0x1d4   :  { %1161 = vst [vmem:[%s2660_s5 + $0x1e0] sm:$0xff] %v1097_v13  ;;  %v1022_v54 = vadd.f32 %v1021_v4, %v2330_v1 }
 0x1d5   :  { %v1084_v35 = vadd.f32 %v2341_v12, %v947_v61  ;;  %v1100_v36 = vadd.f32 %v2341_v12, %v1027_v57 }
 0x1d6   :  { %v1099_v50 = vadd.f32 %v2341_v12, %v1022_v54 }
 0x1d7   :  { %1148 = vst [vmem:[%s2660_s5 + $0x178] sm:$0xff] %v1084_v35  ;;  %1164 = vst [vmem:[%s2660_s5 + $0x1f8] sm:$0xff] %v1100_v36 }
 0x1d8   :  { %1163 = vst [vmem:[%s2660_s5 + $0x1f0] sm:$0xff] %v1099_v50 }

// kernel: h2gcn_forward.4
= control target key start
LH: loop header
LB: loop body
LE: loop exit
PB: predicated region body
PF: predicated region fallthrough
CT: control target
= control target key end

     0   :  { %8 = vsyncpa [#allocation3], 0  ;;  %s2753_s12 = smov [#allocation2]   ;;  %s4197_s0 = inlined_call_operand.vmem [shape: f32[512,512], index: 0, kind: input, shape index: {}]   ;;  %s4198_s1 = inlined_call_operand.hbm [shape: f32[512,512], index: 1, kind: input, shape index: {}]   ;;  %s4199_s2 = inlined_call_operand.vmem [shape: f32[512,128], index: 2, kind: input, shape index: {}]   ;;  %s4200_s3 = inlined_call_operand.vmem [shape: f32[512,256], index: 3, kind: output, shape index: {}]  }
   0x1   :  { %s16_s13 = sshll.u32 %s2753_s12, 4  ;;  %s2729_s16 = scalar_lea.hbm %s4198_s1, 32768  ;;  %s17_s13 = int_to_ptr.vmem [resolvable:$true] %s16_s13 }
   0x2   :  { %p2730_p0 = scmp.ne.s32.totalorder %s4198_s1, %s2729_s16  ;;  %p2733_p1 = scmp.lt.u32.totalorder %s2729_s16, %s4198_s1 }
   0x4   :  { %p2735_p2 = pnand %p2733_p1, %p2730_p0 }
   0x6   :  { %2738 = shalt.err (!%p2735_p2)
}
   0x7   :  { %s2739_s21 = scalar_lea.vmem %s17_s13, 32768  ;;  %p2744_p4 = scmp.lt.s32.totalorder %s17_s13, %s17_s13 }
   0x8   :  { %p2740_p3 = scmp.ne.s32.totalorder %s17_s13, %s2739_s21  ;;  %p2745_p5 = scmp.lt.s32.totalorder %s2739_s21, %s2739_s21 }
   0xa   :  { %p2746_p6 = por %p2745_p5, %p2744_p4 }
   0xc   :  { %p2747_p7 = pnand %p2746_p6, %p2740_p3 }
   0xe   :  { %2750 = shalt.err (!%p2747_p7)
}
   0xf   :  { %s2754_s22 = smov 512   ;;  %s2755_s23 = smov 32  }
  0x10   :  { %22 = dma.hbm_to_vmem [thread:$0]  %s4198_s1, 32768, %s17_s13, [#allocation3], %s2754_s22, %s2754_s22, %s2755_s23  }
  0x11   :  { %2751 = dma.done.wait [#allocation3], 32768  }
  0x12   :  { %2752 = vsyncadd [#allocation3], 4294934528  ;;  %v2756_v0 = vmov 0.0|0.0   ;;  %v28_v1 = vld [vmem:[%s4199_s2] sm:$0xff]  ;;  %v29_v2 = vld [vmem:[%s4199_s2 + $0x8] sm:$0xff] }
  0x13   :  { %2277 = vmatprep.subr.bf16.mxu0 %v2756_v0  ;;  %2373 = vmatprep.subr.bf16.mxu1 %v2756_v0  ;;  %v30_v3 = vld [vmem:[%s4199_s2 + $0x10] sm:$0xff]  ;;  %v2278_v4 = vpack.c.bf16 %v29_v2, %v28_v1  ;;  %v31_v5 = vld [vmem:[%s4199_s2 + $0x18] sm:$0xff]  ;;  %v32_v7 = vld [vmem:[%s4199_s2 + $0x20] sm:$0xff] }
  0x14   :  { %v2281_v6 = vpack.c.bf16 %v31_v5, %v30_v3  ;;  %v33_v8 = vld [vmem:[%s4199_s2 + $0x28] sm:$0xff]  ;;  %v34_v10 = vld [vmem:[%s4199_s2 + $0x30] sm:$0xff]  ;;  %v35_v11 = vld [vmem:[%s4199_s2 + $0x38] sm:$0xff] }
  0x15   :  { %2279 = vmatpush1.bf16.msra.mxu0 %v2278_v4  ;;  %2375 = vmatpush1.bf16.msra.mxu1 %v2278_v4  ;;  %v2284_v9 = vpack.c.bf16 %v33_v8, %v32_v7  ;;  %v93_v12 = vld [vmem:[%s4197_s0 + $0x8] sm:$0xff]  ;;  %v2287_v13 = vpack.c.bf16 %v35_v11, %v34_v10  ;;  %v36_v15 = vld [vmem:[%s4199_s2 + $0x40] sm:$0xff]  ;;  %v38_v18 = vld [vmem:[%s4199_s2 + $0x50] sm:$0xff] }
  0x16   :  { %2280 = vmatprep.subr.bf16.mxu0 %v2756_v0  ;;  %2376 = vmatprep.subr.bf16.mxu1 %v2756_v0  ;;  %v1183_v14 = vld [vmem:[#allocation2 + $0x8] sm:$0xff]  ;;  %v39_v19 = vld [vmem:[%s4199_s2 + $0x58] sm:$0xff]  ;;  %v40_v21 = vld [vmem:[%s4199_s2 + $0x60] sm:$0xff] }
  0x17   :  { %v37_v16 = vld [vmem:[%s4199_s2 + $0x48] sm:$0xff]  ;;  %412 = vmatprep.mubr.f32.mxu0 %v93_v12  ;;  %1502 = vmatprep.mubr.f32.mxu1 %v1183_v14  ;;  %v2293_v20 = vpack.c.bf16 %v39_v19, %v38_v18  ;;  %v42_v24 = vld [vmem:[%s4199_s2 + $0x70] sm:$0xff]  ;;  %v43_v25 = vld [vmem:[%s4199_s2 + $0x78] sm:$0xff] }
  0x18   :  { %v2290_v17 = vpack.c.bf16 %v37_v16, %v36_v15  ;;  %v41_v22 = vld [vmem:[%s4199_s2 + $0x68] sm:$0xff]  ;;  %v2299_v26 = vpack.c.bf16 %v43_v25, %v42_v24  ;;  %v44_v27 = vld [vmem:[%s4199_s2 + $0x80] sm:$0xff]  ;;  %v46_v30 = vld [vmem:[%s4199_s2 + $0x90] sm:$0xff] }
  0x19   :  { %2282 = vmatpush1.bf16.msra.mxu0 %v2281_v6  ;;  %2378 = vmatpush1.bf16.msra.mxu1 %v2281_v6  ;;  %v2296_v23 = vpack.c.bf16 %v41_v22, %v40_v21  ;;  %v45_v28 = vld [vmem:[%s4199_s2 + $0x88] sm:$0xff]  ;;  %v47_v31 = vld [vmem:[%s4199_s2 + $0x98] sm:$0xff]  ;;  %v48_v33 = vld [vmem:[%s4199_s2 + $0xa0] sm:$0xff] }
  0x1a   :  { %2283 = vmatprep.subr.bf16.mxu0 %v2756_v0  ;;  %2379 = vmatprep.subr.bf16.mxu1 %v2756_v0  ;;  %v2302_v29 = vpack.c.bf16 %v45_v28, %v44_v27  ;;  %v2305_v32 = vpack.c.bf16 %v47_v31, %v46_v30  ;;  %v49_v34 = vld [vmem:[%s4199_s2 + $0xa8] sm:$0xff]  ;;  %v50_v36 = vld [vmem:[%s4199_s2 + $0xb0] sm:$0xff]  ;;  %v51_v37 = vld [vmem:[%s4199_s2 + $0xb8] sm:$0xff] }
  0x1b   :  { %v2308_v35 = vpack.c.bf16 %v49_v34, %v48_v33  ;;  %v2311_v38 = vpack.c.bf16 %v51_v37, %v50_v36  ;;  %v52_v39 = vld [vmem:[%s4199_s2 + $0xc0] sm:$0xff]  ;;  %v53_v40 = vld [vmem:[%s4199_s2 + $0xc8] sm:$0xff]  ;;  %v54_v42 = vld [vmem:[%s4199_s2 + $0xd0] sm:$0xff] }
  0x1c   :  { %v2314_v41 = vpack.c.bf16 %v53_v40, %v52_v39  ;;  %v55_v43 = vld [vmem:[%s4199_s2 + $0xd8] sm:$0xff]  ;;  %v56_v45 = vld [vmem:[%s4199_s2 + $0xe0] sm:$0xff]  ;;  %v57_v46 = vld [vmem:[%s4199_s2 + $0xe8] sm:$0xff] }
  0x1d   :  { %2285 = vmatpush1.bf16.msra.mxu0 %v2284_v9  ;;  %2381 = vmatpush1.bf16.msra.mxu1 %v2284_v9  ;;  %v2317_v44 = vpack.c.bf16 %v55_v43, %v54_v42  ;;  %v2320_v47 = vpack.c.bf16 %v57_v46, %v56_v45  ;;  %v58_v48 = vld [vmem:[%s4199_s2 + $0xf0] sm:$0xff]  ;;  %v59_v49 = vld [vmem:[%s4199_s2 + $0xf8] sm:$0xff]  ;;  %v60_v51 = vld [vmem:[%s4199_s2 + $0x100] sm:$0xff] }
  0x1e   :  { %2286 = vmatprep.subr.bf16.mxu0 %v2756_v0  ;;  %2382 = vmatprep.subr.bf16.mxu1 %v2756_v0  ;;  %v2323_v50 = vpack.c.bf16 %v59_v49, %v58_v48  ;;  %v61_v52 = vld [vmem:[%s4199_s2 + $0x108] sm:$0xff]  ;;  %v92_v53 = vld [vmem:[%s4197_s0] sm:$0xff]  ;;  %v62_v58 = vld [vmem:[%s4199_s2 + $0x110] sm:$0xff] }
  0x1f   :  { %v1182_v54 = vld [vmem:[#allocation2] sm:$0xff]  ;;  %v2326_v55 = vpack.c.bf16 %v61_v52, %v60_v51  ;;  %v97_v56 = vld [vmem:[%s4197_s0 + $0x28] sm:$0xff]  ;;  %v63_v59 = vld [vmem:[%s4199_s2 + $0x118] sm:$0xff] }
  0x20   :  { %v1187_v57 = vld [vmem:[#allocation2 + $0x28] sm:$0xff]  ;;  %v96_v60 = vld [vmem:[%s4197_s0 + $0x20] sm:$0xff]  ;;  %v2329_v1 = vpack.c.bf16 %v63_v59, %v62_v58  ;;  %v66_v9 = vld [vmem:[%s4199_s2 + $0x130] sm:$0xff] }
  0x21   :  { %2288 = vmatpush1.bf16.msra.mxu0 %v2287_v13  ;;  %2384 = vmatpush1.bf16.msra.mxu1 %v2287_v13  ;;  %v1186_v61 = vld [vmem:[#allocation2 + $0x20] sm:$0xff]  ;;  %v101_v62 = vld [vmem:[%s4197_s0 + $0x48] sm:$0xff]  ;;  %v67_v10 = vld [vmem:[%s4199_s2 + $0x138] sm:$0xff] }
  0x22   :  { %2289 = vmatprep.subr.bf16.mxu0 %v2756_v0  ;;  %2385 = vmatprep.subr.bf16.mxu1 %v2756_v0  ;;  %v1191_v63 = vld [vmem:[#allocation2 + $0x48] sm:$0xff]  ;;  %v64_v2 = vld [vmem:[%s4199_s2 + $0x120] sm:$0xff]  ;;  %v2335_v15 = vpack.c.bf16 %v67_v10, %v66_v9  ;;  %v71_v24 = vld [vmem:[%s4199_s2 + $0x158] sm:$0xff] }
  0x23   :  { %v65_v3 = vld [vmem:[%s4199_s2 + $0x128] sm:$0xff]  ;;  %v100_v4 = vld [vmem:[%s4197_s0 + $0x40] sm:$0xff]  ;;  %v74_v37 = vld [vmem:[%s4199_s2 + $0x170] sm:$0xff] }
  0x24   :  { %v1190_v5 = vld [vmem:[#allocation2 + $0x40] sm:$0xff]  ;;  %v105_v6 = vld [vmem:[%s4197_s0 + $0x68] sm:$0xff]  ;;  %v2332_v8 = vpack.c.bf16 %v65_v3, %v64_v2  ;;  %v78_v51 = vld [vmem:[%s4199_s2 + $0x190] sm:$0xff] }
  0x25   :  { %2291 = vmatpush1.bf16.msra.mxu0 %v2290_v17  ;;  %2387 = vmatpush1.bf16.msra.mxu1 %v2290_v17  ;;  %v1195_v7 = vld [vmem:[#allocation2 + $0x68] sm:$0xff]  ;;  %v104_v11 = vld [vmem:[%s4197_s0 + $0x60] sm:$0xff]  ;;  %v79_v52 = vld [vmem:[%s4199_s2 + $0x198] sm:$0xff] }
  0x26   :  { %2292 = vmatprep.subr.bf16.mxu0 %v2756_v0  ;;  %2388 = vmatprep.subr.bf16.mxu1 %v2756_v0  ;;  %v1194_v12 = vld [vmem:[#allocation2 + $0x60] sm:$0xff]  ;;  %v109_v13 = vld [vmem:[%s4197_s0 + $0x88] sm:$0xff]  ;;  %v82_v10 = vld [vmem:[%s4199_s2 + $0x1b0] sm:$0xff] }
  0x27   :  { %v1199_v14 = vld [vmem:[#allocation2 + $0x88] sm:$0xff]  ;;  %v68_v16 = vld [vmem:[%s4199_s2 + $0x140] sm:$0xff] }
  0x28   :  { %v69_v17 = vld [vmem:[%s4199_s2 + $0x148] sm:$0xff]  ;;  %v108_v18 = vld [vmem:[%s4197_s0 + $0x80] sm:$0xff] }
  0x29   :  { %2294 = vmatpush1.bf16.msra.mxu0 %v2293_v20  ;;  %2390 = vmatpush1.bf16.msra.mxu1 %v2293_v20  ;;  %v1198_v19 = vld [vmem:[#allocation2 + $0x80] sm:$0xff]  ;;  %v113_v20 = vld [vmem:[%s4197_s0 + $0xa8] sm:$0xff]  ;;  %v2338_v22 = vpack.c.bf16 %v69_v17, %v68_v16 }
  0x2a   :  { %2295 = vmatprep.subr.bf16.mxu0 %v2756_v0  ;;  %2391 = vmatprep.subr.bf16.mxu1 %v2756_v0  ;;  %v1203_v21 = vld [vmem:[#allocation2 + $0xa8] sm:$0xff]  ;;  %v112_v25 = vld [vmem:[%s4197_s0 + $0xa0] sm:$0xff] }
  0x2b   :  { %v117_v27 = vld [vmem:[%s4197_s0 + $0xc8] sm:$0xff]  ;;  %v72_v30 = vld [vmem:[%s4199_s2 + $0x160] sm:$0xff] }
  0x2c   :  { %v1207_v28 = vld [vmem:[#allocation2 + $0xc8] sm:$0xff]  ;;  %v1206_v33 = vld [vmem:[#allocation2 + $0xc0] sm:$0xff] }
  0x2d   :  { %2297 = vmatpush1.bf16.msra.mxu0 %v2296_v23  ;;  %2393 = vmatpush1.bf16.msra.mxu1 %v2296_v23  ;;  %v70_v23 = vld [vmem:[%s4199_s2 + $0x150] sm:$0xff]  ;;  %v73_v31 = vld [vmem:[%s4199_s2 + $0x168] sm:$0xff]  ;;  %v120_v39 = vld [vmem:[%s4197_s0 + $0xe0] sm:$0xff] }
  0x2e   :  { %2298 = vmatprep.subr.bf16.mxu0 %v2756_v0  ;;  %2394 = vmatprep.subr.bf16.mxu1 %v2756_v0  ;;  %v121_v34 = vld [vmem:[%s4197_s0 + $0xe8] sm:$0xff]  ;;  %v2344_v36 = vpack.c.bf16 %v73_v31, %v72_v30  ;;  %v1210_v40 = vld [vmem:[#allocation2 + $0xe0] sm:$0xff] }
  0x2f   :  { %v1215_v42 = vld [vmem:[#allocation2 + $0x108] sm:$0xff]  ;;  %v124_v46 = vld [vmem:[%s4197_s0 + $0x100] sm:$0xff] }
  0x30   :  { %v77_v45 = vld [vmem:[%s4199_s2 + $0x188] sm:$0xff]  ;;  %v80_v58 = vld [vmem:[%s4199_s2 + $0x1a0] sm:$0xff] }
  0x31   :  { %2300 = vmatpush1.bf16.msra.mxu0 %v2299_v26  ;;  %2396 = vmatpush1.bf16.msra.mxu1 %v2299_v26  ;;  %v1202_v26 = vld [vmem:[#allocation2 + $0xa0] sm:$0xff]  ;;  %v129_v48 = vld [vmem:[%s4197_s0 + $0x128] sm:$0xff] }
  0x32   :  { %2301 = vmatprep.subr.bf16.mxu0 %v2756_v0  ;;  %2397 = vmatprep.subr.bf16.mxu1 %v2756_v0  ;;  %v1219_v49 = vld [vmem:[#allocation2 + $0x128] sm:$0xff]  ;;  %v136_v2 = vld [vmem:[%s4197_s0 + $0x160] sm:$0xff] }
  0x33   :  { %v81_v59 = vld [vmem:[%s4199_s2 + $0x1a8] sm:$0xff]  ;;  %v1226_v3 = vld [vmem:[#allocation2 + $0x160] sm:$0xff] }
  0x34   :  { %v1235_v9 = vld [vmem:[#allocation2 + $0x1a8] sm:$0xff]  ;;  %v148_v17 = vld [vmem:[%s4197_s0 + $0x1c0] sm:$0xff] }
  0x35   :  { %2303 = vmatpush1.bf16.msra.mxu0 %v2302_v29  ;;  %2399 = vmatpush1.bf16.msra.mxu1 %v2302_v29  ;;  %v2341_v29 = vpack.c.bf16 %v71_v24, %v70_v23  ;;  %v1239_v16 = vld [vmem:[#allocation2 + $0x1c8] sm:$0xff]  ;;  %v160_v31 = vld [vmem:[%s4197_s0 + $0x220] sm:$0xff] }
  0x36   :  { %2304 = vmatprep.subr.bf16.mxu0 %v2756_v0  ;;  %2400 = vmatprep.subr.bf16.mxu1 %v2756_v0  ;;  %v157_v23 = vld [vmem:[%s4197_s0 + $0x208] sm:$0xff] }
  0x37   :  { %v1247_v24 = vld [vmem:[#allocation2 + $0x208] sm:$0xff] }
  0x38   :  { %v85_v30 = vld [vmem:[%s4199_s2 + $0x1c8] sm:$0xff] }
  0x39   :  { %2306 = vmatpush1.bf16.msra.mxu0 %v2305_v32  ;;  %2402 = vmatpush1.bf16.msra.mxu1 %v2305_v32  ;;  %v116_v32 = vld [vmem:[%s4197_s0 + $0xc0] sm:$0xff] }
  0x3a   :  { %2307 = vmatprep.subr.bf16.mxu0 %v2756_v0  ;;  %2403 = vmatprep.subr.bf16.mxu1 %v2756_v0 }
  0x3d   :  { %2309 = vmatpush1.bf16.msra.mxu0 %v2308_v35  ;;  %2405 = vmatpush1.bf16.msra.mxu1 %v2308_v35  ;;  %v1211_v35 = vld [vmem:[#allocation2 + $0xe8] sm:$0xff] }
  0x3e   :  { %2310 = vmatprep.subr.bf16.mxu0 %v2756_v0  ;;  %2406 = vmatprep.subr.bf16.mxu1 %v2756_v0 }
  0x41   :  { %2312 = vmatpush1.bf16.msra.mxu0 %v2311_v38  ;;  %2408 = vmatpush1.bf16.msra.mxu1 %v2311_v38  ;;  %v75_v38 = vld [vmem:[%s4199_s2 + $0x178] sm:$0xff] }
  0x42   :  { %2313 = vmatprep.subr.bf16.mxu0 %v2756_v0  ;;  %2409 = vmatprep.subr.bf16.mxu1 %v2756_v0  ;;  %v2347_v43 = vpack.c.bf16 %v75_v38, %v74_v37  ;;  %v1254_v37 = vld [vmem:[#allocation2 + $0x240] sm:$0xff]  ;;  %v169_v38 = vld [vmem:[%s4197_s0 + $0x268] sm:$0xff] }
  0x45   :  { %2315 = vmatpush1.bf16.msra.mxu0 %v2314_v41  ;;  %2411 = vmatpush1.bf16.msra.mxu1 %v2314_v41  ;;  %v125_v41 = vld [vmem:[%s4197_s0 + $0x108] sm:$0xff] }
  0x46   :  { %2316 = vmatprep.subr.bf16.mxu0 %v2756_v0  ;;  %2412 = vmatprep.subr.bf16.mxu1 %v2756_v0 }
  0x49   :  { %2318 = vmatpush1.bf16.msra.mxu0 %v2317_v44  ;;  %2414 = vmatpush1.bf16.msra.mxu1 %v2317_v44  ;;  %v76_v44 = vld [vmem:[%s4199_s2 + $0x180] sm:$0xff] }
  0x4a   :  { %2319 = vmatprep.subr.bf16.mxu0 %v2756_v0  ;;  %2415 = vmatprep.subr.bf16.mxu1 %v2756_v0 }
  0x4d   :  { %2321 = vmatpush1.bf16.msra.mxu0 %v2320_v47  ;;  %2417 = vmatpush1.bf16.msra.mxu1 %v2320_v47  ;;  %v1214_v47 = vld [vmem:[#allocation2 + $0x100] sm:$0xff] }
  0x4e   :  { %2322 = vmatprep.subr.bf16.mxu0 %v2756_v0  ;;  %2418 = vmatprep.subr.bf16.mxu1 %v2756_v0 }
  0x51   :  { %2324 = vmatpush1.bf16.msra.mxu0 %v2323_v50  ;;  %2420 = vmatpush1.bf16.msra.mxu1 %v2323_v50  ;;  %v2350_v50 = vpack.c.bf16 %v77_v45, %v76_v44  ;;  %v172_v44 = vld [vmem:[%s4197_s0 + $0x280] sm:$0xff] }
  0x52   :  { %2325 = vmatprep.subr.bf16.mxu0 %v2756_v0  ;;  %2421 = vmatprep.subr.bf16.mxu1 %v2756_v0  ;;  %v1262_v45 = vld [vmem:[#allocation2 + $0x280] sm:$0xff] }
  0x54   :  { %413 = vmatmul.mubr.f32.vlgmr.msra.gmra.mrb[0].mxu0 %v92_v53  ;;  %1503 = vmatmul.mubr.f32.vlgmr.msra.gmra.mrb[0].mxu1 %v1182_v54  ;;  %v128_v53 = vld [vmem:[%s4197_s0 + $0x120] sm:$0xff] }
  0x55   :  { %2327 = vmatpush1.bf16.msra.mxu0 %v2326_v55  ;;  %2423 = vmatpush1.bf16.msra.mxu1 %v2326_v55  ;;  %v1218_v54 = vld [vmem:[#allocation2 + $0x120] sm:$0xff]  ;;  %v133_v55 = vld [vmem:[%s4197_s0 + $0x148] sm:$0xff] }
  0x56   :  { %417 = vmatprep.mubr.f32.mxu0 %v97_v56  ;;  %1507 = vmatprep.mubr.f32.mxu1 %v1187_v57  ;;  %v1223_v56 = vld [vmem:[#allocation2 + $0x148] sm:$0xff]  ;;  %v2353_v57 = vpack.c.bf16 %v79_v52, %v78_v51  ;;  %v1266_v51 = vld [vmem:[#allocation2 + $0x2a0] sm:$0xff] }
  0x57   :  { %2328 = vmatprep.subr.bf16.mxu0 %v2756_v0  ;;  %2424 = vmatprep.subr.bf16.mxu1 %v2756_v0 }
  0x58   :  { %418 = vmatmul.mubr.f32.gmra.mrb[2].mxu0 %v96_v60  ;;  %1508 = vmatmul.mubr.f32.gmra.mrb[2].mxu1 %v1186_v61  ;;  %v132_v60 = vld [vmem:[%s4197_s0 + $0x140] sm:$0xff] }
  0x59   :  { %422 = vmatprep.mubr.f32.mxu0 %v101_v62  ;;  %1512 = vmatprep.mubr.f32.mxu1 %v1191_v63  ;;  %v1222_v61 = vld [vmem:[#allocation2 + $0x140] sm:$0xff]  ;;  %v137_v62 = vld [vmem:[%s4197_s0 + $0x168] sm:$0xff] }
  0x5a   :  { %2330 = vmatpush1.bf16.msra.mxu0 %v2329_v1  ;;  %2426 = vmatpush1.bf16.msra.mxu1 %v2329_v1  ;;  %v1227_v63 = vld [vmem:[#allocation2 + $0x168] sm:$0xff]  ;;  %v2356_v1 = vpack.c.bf16 %v81_v59, %v80_v58  ;;  %v184_v59 = vld [vmem:[%s4197_s0 + $0x2e0] sm:$0xff] }
  0x5b   :  { %2331 = vmatprep.subr.bf16.mxu0 %v2756_v0  ;;  %2427 = vmatprep.subr.bf16.mxu1 %v2756_v0  ;;  %v1275_v58 = vld [vmem:[#allocation2 + $0x2e8] sm:$0xff] }
  0x5c   :  { %423 = vmatmul.mubr.f32.gmra.mrb[4].mxu0 %v100_v4  ;;  %1513 = vmatmul.mubr.f32.gmra.mrb[4].mxu1 %v1190_v5  ;;  %v141_v4 = vld [vmem:[%s4197_s0 + $0x188] sm:$0xff] }
  0x5d   :  { %427 = vmatprep.mubr.f32.mxu0 %v105_v6  ;;  %1517 = vmatprep.mubr.f32.mxu1 %v1195_v7  ;;  %v1231_v5 = vld [vmem:[#allocation2 + $0x188] sm:$0xff]  ;;  %v140_v6 = vld [vmem:[%s4197_s0 + $0x180] sm:$0xff] }
  0x5e   :  { %2333 = vmatpush1.bf16.msra.mxu0 %v2332_v8  ;;  %2429 = vmatpush1.bf16.msra.mxu1 %v2332_v8  ;;  %v1230_v7 = vld [vmem:[#allocation2 + $0x180] sm:$0xff]  ;;  %v145_v8 = vld [vmem:[%s4197_s0 + $0x1a8] sm:$0xff] }
  0x5f   :  { %2334 = vmatprep.subr.bf16.mxu0 %v2756_v0  ;;  %2430 = vmatprep.subr.bf16.mxu1 %v2756_v0 }
  0x60   :  { %428 = vmatmul.mubr.f32.gmra.mrb[6].mxu0 %v104_v11  ;;  %1518 = vmatmul.mubr.f32.gmra.mrb[6].mxu1 %v1194_v12  ;;  %v83_v11 = vld [vmem:[%s4199_s2 + $0x1b8] sm:$0xff]  ;;  %v144_v12 = vld [vmem:[%s4197_s0 + $0x1a0] sm:$0xff] }
  0x61   :  { %432 = vmatprep.mubr.f32.mxu0 %v109_v13  ;;  %1522 = vmatprep.mubr.f32.mxu1 %v1199_v14  ;;  %v1234_v13 = vld [vmem:[#allocation2 + $0x1a0] sm:$0xff]  ;;  %v2359_v14 = vpack.c.bf16 %v83_v11, %v82_v10  ;;  %v1287_v10 = vld [vmem:[#allocation2 + $0x348] sm:$0xff] }
  0x62   :  { %2336 = vmatpush1.bf16.msra.mxu0 %v2335_v15  ;;  %2432 = vmatpush1.bf16.msra.mxu1 %v2335_v15  ;;  %v149_v15 = vld [vmem:[%s4197_s0 + $0x1c8] sm:$0xff]  ;;  %v196_v11 = vld [vmem:[%s4197_s0 + $0x340] sm:$0xff] }
  0x63   :  { %2337 = vmatprep.subr.bf16.mxu0 %v2756_v0  ;;  %2433 = vmatprep.subr.bf16.mxu1 %v2756_v0 }
  0x64   :  { %433 = vmatmul.mubr.f32.gmra.mrb[8].mxu0 %v108_v18  ;;  %1523 = vmatmul.mubr.f32.gmra.mrb[8].mxu1 %v1198_v19  ;;  %v1238_v18 = vld [vmem:[#allocation2 + $0x1c0] sm:$0xff]  ;;  %v153_v19 = vld [vmem:[%s4197_s0 + $0x1e8] sm:$0xff] }
  0x65   :  { %437 = vmatprep.mubr.f32.mxu0 %v113_v20  ;;  %1527 = vmatprep.mubr.f32.mxu1 %v1203_v21  ;;  %v1243_v20 = vld [vmem:[#allocation2 + $0x1e8] sm:$0xff]  ;;  %v152_v21 = vld [vmem:[%s4197_s0 + $0x1e0] sm:$0xff] }
  0x66   :  { %2339 = vmatpush1.bf16.msra.mxu0 %v2338_v22  ;;  %2435 = vmatpush1.bf16.msra.mxu1 %v2338_v22  ;;  %v1242_v22 = vld [vmem:[#allocation2 + $0x1e0] sm:$0xff] }
  0x67   :  { %2340 = vmatprep.subr.bf16.mxu0 %v2756_v0  ;;  %2436 = vmatprep.subr.bf16.mxu1 %v2756_v0 }
  0x68   :  { %438 = vmatmul.mubr.f32.gmra.mrb[10].mxu0 %v112_v25  ;;  %1528 = vmatmul.mubr.f32.gmra.mrb[10].mxu1 %v1202_v26  ;;  %v156_v25 = vld [vmem:[%s4197_s0 + $0x200] sm:$0xff] }
  0x69   :  { %442 = vmatprep.mubr.f32.mxu0 %v117_v27  ;;  %1532 = vmatprep.mubr.f32.mxu1 %v1207_v28  ;;  %v1246_v26 = vld [vmem:[#allocation2 + $0x200] sm:$0xff]  ;;  %v161_v27 = vld [vmem:[%s4197_s0 + $0x228] sm:$0xff] }
  0x6a   :  { %2342 = vmatpush1.bf16.msra.mxu0 %v2341_v29  ;;  %2438 = vmatpush1.bf16.msra.mxu1 %v2341_v29  ;;  %v1251_v28 = vld [vmem:[#allocation2 + $0x228] sm:$0xff]  ;;  %v84_v29 = vld [vmem:[%s4199_s2 + $0x1c0] sm:$0xff] }
  0x6b   :  { %2343 = vmatprep.subr.bf16.mxu0 %v2756_v0  ;;  %2439 = vmatprep.subr.bf16.mxu1 %v2756_v0 }
  0x6c   :  { %443 = vmatmul.mubr.f32.gmra.mrb[12].mxu0 %v116_v32  ;;  %1533 = vmatmul.mubr.f32.gmra.mrb[12].mxu1 %v1206_v33  ;;  %v1250_v32 = vld [vmem:[#allocation2 + $0x220] sm:$0xff]  ;;  %v2362_v33 = vpack.c.bf16 %v85_v30, %v84_v29 }
  0x6d   :  { %447 = vmatprep.mubr.f32.mxu0 %v121_v34  ;;  %1537 = vmatprep.mubr.f32.mxu1 %v1211_v35  ;;  %v165_v34 = vld [vmem:[%s4197_s0 + $0x248] sm:$0xff]  ;;  %v212_v29 = vld [vmem:[%s4197_s0 + $0x3c0] sm:$0xff] }
  0x6e   :  { %2345 = vmatpush1.bf16.msra.mxu0 %v2344_v36  ;;  %2441 = vmatpush1.bf16.msra.mxu1 %v2344_v36  ;;  %v1255_v35 = vld [vmem:[#allocation2 + $0x248] sm:$0xff]  ;;  %v164_v36 = vld [vmem:[%s4197_s0 + $0x240] sm:$0xff] }
  0x6f   :  { %2346 = vmatprep.subr.bf16.mxu0 %v2756_v0  ;;  %2442 = vmatprep.subr.bf16.mxu1 %v2756_v0  ;;  %v1302_v30 = vld [vmem:[#allocation2 + $0x3c0] sm:$0xff] }
  0x70   :  { %448 = vmatmul.mubr.f32.gmra.mrb[14].mxu0 %v120_v39  ;;  %1538 = vmatmul.mubr.f32.gmra.mrb[14].mxu1 %v1210_v40  ;;  %v1259_v39 = vld [vmem:[#allocation2 + $0x268] sm:$0xff]  ;;  %v168_v40 = vld [vmem:[%s4197_s0 + $0x260] sm:$0xff] }
  0x71   :  { %452 = vmatprep.mubr.f32.mxu0 %v125_v41  ;;  %1542 = vmatprep.mubr.f32.mxu1 %v1215_v42  ;;  %v1258_v41 = vld [vmem:[#allocation2 + $0x260] sm:$0xff]  ;;  %v173_v42 = vld [vmem:[%s4197_s0 + $0x288] sm:$0xff] }
  0x72   :  { %2348 = vmatpush1.bf16.msra.mxu0 %v2347_v43  ;;  %2444 = vmatpush1.bf16.msra.mxu1 %v2347_v43  ;;  %v1263_v43 = vld [vmem:[#allocation2 + $0x288] sm:$0xff] }
  0x73   :  { %2349 = vmatprep.subr.bf16.mxu0 %v2756_v0  ;;  %2445 = vmatprep.subr.bf16.mxu1 %v2756_v0 }
  0x74   :  { %453 = vmatmul.mubr.f32.gmra.mrb[16].mxu0 %v124_v46  ;;  %1543 = vmatmul.mubr.f32.gmra.mrb[16].mxu1 %v1214_v47  ;;  %v177_v46 = vld [vmem:[%s4197_s0 + $0x2a8] sm:$0xff] }
  0x75   :  { %457 = vmatprep.mubr.f32.mxu0 %v129_v48  ;;  %1547 = vmatprep.mubr.f32.mxu1 %v1219_v49  ;;  %v1267_v47 = vld [vmem:[#allocation2 + $0x2a8] sm:$0xff]  ;;  %v86_v48 = vld [vmem:[%s4199_s2 + $0x1d0] sm:$0xff]  ;;  %v87_v49 = vld [vmem:[%s4199_s2 + $0x1d8] sm:$0xff] }
  0x76   :  { %2351 = vmatpush1.bf16.msra.mxu0 %v2350_v50  ;;  %2447 = vmatpush1.bf16.msra.mxu1 %v2350_v50  ;;  %v176_v50 = vld [vmem:[%s4197_s0 + $0x2a0] sm:$0xff]  ;;  %v2365_v52 = vpack.c.bf16 %v87_v49, %v86_v48  ;;  %v1323_v48 = vld [vmem:[#allocation2 + $0x468] sm:$0xff] }
  0x77   :  { %2352 = vmatprep.subr.bf16.mxu0 %v2756_v0  ;;  %2448 = vmatprep.subr.bf16.mxu1 %v2756_v0  ;;  %v232_v49 = vld [vmem:[%s4197_s0 + $0x460] sm:$0xff] }
  0x78   :  { %458 = vmatmul.mubr.f32.gmra.mrb[18].mxu0 %v128_v53  ;;  %1548 = vmatmul.mubr.f32.gmra.mrb[18].mxu1 %v1218_v54  ;;  %v181_v53 = vld [vmem:[%s4197_s0 + $0x2c8] sm:$0xff] }
  0x79   :  { %462 = vmatprep.mubr.f32.mxu0 %v133_v55  ;;  %1552 = vmatprep.mubr.f32.mxu1 %v1223_v56  ;;  %v1271_v54 = vld [vmem:[#allocation2 + $0x2c8] sm:$0xff]  ;;  %v180_v55 = vld [vmem:[%s4197_s0 + $0x2c0] sm:$0xff] }
  0x7a   :  { %2354 = vmatpush1.bf16.msra.mxu0 %v2353_v57  ;;  %2450 = vmatpush1.bf16.msra.mxu1 %v2353_v57  ;;  %v1270_v56 = vld [vmem:[#allocation2 + $0x2c0] sm:$0xff]  ;;  %v185_v57 = vld [vmem:[%s4197_s0 + $0x2e8] sm:$0xff] }
  0x7b   :  { %2355 = vmatprep.subr.bf16.mxu0 %v2756_v0  ;;  %2451 = vmatprep.subr.bf16.mxu1 %v2756_v0 }
  0x7c   :  { %463 = vmatmul.mubr.f32.gmra.mrb[20].mxu0 %v132_v60  ;;  %1553 = vmatmul.mubr.f32.gmra.mrb[20].mxu1 %v1222_v61  ;;  %v1274_v60 = vld [vmem:[#allocation2 + $0x2e0] sm:$0xff]  ;;  %v189_v61 = vld [vmem:[%s4197_s0 + $0x308] sm:$0xff] }
  0x7d   :  { %467 = vmatprep.mubr.f32.mxu0 %v137_v62  ;;  %1557 = vmatprep.mubr.f32.mxu1 %v1227_v63  ;;  %v1279_v62 = vld [vmem:[#allocation2 + $0x308] sm:$0xff]  ;;  %v188_v63 = vld [vmem:[%s4197_s0 + $0x300] sm:$0xff] }
  0x7e   :  { %2357 = vmatpush1.bf16.msra.mxu0 %v2356_v1  ;;  %2453 = vmatpush1.bf16.msra.mxu1 %v2356_v1  ;;  %v1278_v1 = vld [vmem:[#allocation2 + $0x300] sm:$0xff] }
  0x7f   :  { %2358 = vmatprep.subr.bf16.mxu0 %v2756_v0  ;;  %2454 = vmatprep.subr.bf16.mxu1 %v2756_v0 }
  0x80   :  { %468 = vmatmul.mubr.f32.gmra.mrb[22].mxu0 %v136_v2  ;;  %1558 = vmatmul.mubr.f32.gmra.mrb[22].mxu1 %v1226_v3  ;;  %v193_v2 = vld [vmem:[%s4197_s0 + $0x328] sm:$0xff] }
  0x81   :  { %472 = vmatprep.mubr.f32.mxu0 %v141_v4  ;;  %1562 = vmatprep.mubr.f32.mxu1 %v1231_v5  ;;  %v1283_v3 = vld [vmem:[#allocation2 + $0x328] sm:$0xff]  ;;  %v88_v4 = vld [vmem:[%s4199_s2 + $0x1e0] sm:$0xff] }
  0x82   :  { %2360 = vmatpush1.bf16.msra.mxu0 %v2359_v14  ;;  %2456 = vmatpush1.bf16.msra.mxu1 %v2359_v14  ;;  %v89_v5 = vld [vmem:[%s4199_s2 + $0x1e8] sm:$0xff] }
  0x83   :  { %2361 = vmatprep.subr.bf16.mxu0 %v2756_v0  ;;  %2457 = vmatprep.subr.bf16.mxu1 %v2756_v0  ;;  %v1291_v14 = vld [vmem:[#allocation2 + $0x368] sm:$0xff] }
  0x84   :  { %473 = vmatmul.mubr.f32.gmra.mrb[24].mxu0 %v140_v6  ;;  %1563 = vmatmul.mubr.f32.gmra.mrb[24].mxu1 %v1230_v7  ;;  %v192_v6 = vld [vmem:[%s4197_s0 + $0x320] sm:$0xff] }
  0x85   :  { %477 = vmatprep.mubr.f32.mxu0 %v145_v8  ;;  %1567 = vmatprep.mubr.f32.mxu1 %v1235_v9  ;;  %v1282_v7 = vld [vmem:[#allocation2 + $0x320] sm:$0xff]  ;;  %v2368_v8 = vpack.c.bf16 %v89_v5, %v88_v4  ;;  %v197_v9 = vld [vmem:[%s4197_s0 + $0x348] sm:$0xff] }
  0x86   :  { %2363 = vmatpush1.bf16.msra.mxu0 %v2362_v33  ;;  %2459 = vmatpush1.bf16.msra.mxu1 %v2362_v33  ;;  %v216_v33 = vld [vmem:[%s4197_s0 + $0x3e0] sm:$0xff]  ;;  %v253_v4 = vld [vmem:[%s4197_s0 + $0x508] sm:$0xff] }
  0x87   :  { %2364 = vmatprep.subr.bf16.mxu0 %v2756_v0  ;;  %2460 = vmatprep.subr.bf16.mxu1 %v2756_v0  ;;  %v1343_v5 = vld [vmem:[#allocation2 + $0x508] sm:$0xff] }
  0x88   :  { %478 = vmatmul.mubr.f32.gmra.mrb[26].mxu0 %v144_v12  ;;  %1568 = vmatmul.mubr.f32.gmra.mrb[26].mxu1 %v1234_v13  ;;  %v1286_v12 = vld [vmem:[#allocation2 + $0x340] sm:$0xff]  ;;  %v201_v13 = vld [vmem:[%s4197_s0 + $0x368] sm:$0xff] }
  0x89   :  { %482 = vmatprep.mubr.f32.mxu0 %v149_v15  ;;  %1572 = vmatprep.mubr.f32.mxu1 %v1239_v16  ;;  %v200_v15 = vld [vmem:[%s4197_s0 + $0x360] sm:$0xff] }
  0x8a   :  { %2366 = vmatpush1.bf16.msra.mxu0 %v2365_v52  ;;  %2462 = vmatpush1.bf16.msra.mxu1 %v2365_v52  ;;  %v1290_v16 = vld [vmem:[#allocation2 + $0x360] sm:$0xff]  ;;  %v1327_v52 = vld [vmem:[#allocation2 + $0x488] sm:$0xff] }
  0x8b   :  { %2367 = vmatprep.subr.bf16.mxu0 %v2756_v0  ;;  %2463 = vmatprep.subr.bf16.mxu1 %v2756_v0 }
  0x8c   :  { %483 = vmatmul.mubr.f32.gmra.mrb[28].mxu0 %v148_v17  ;;  %1573 = vmatmul.mubr.f32.gmra.mrb[28].mxu1 %v1238_v18  ;;  %v205_v17 = vld [vmem:[%s4197_s0 + $0x388] sm:$0xff] }
  0x8d   :  { %487 = vmatprep.mubr.f32.mxu0 %v153_v19  ;;  %1577 = vmatprep.mubr.f32.mxu1 %v1243_v20  ;;  %v1295_v18 = vld [vmem:[#allocation2 + $0x388] sm:$0xff]  ;;  %v1294_v19 = vld [vmem:[#allocation2 + $0x380] sm:$0xff] }
  0x8e   :  { %2369 = vmatpush1.bf16.msra.mxu0 %v2368_v8  ;;  %2465 = vmatpush1.bf16.msra.mxu1 %v2368_v8  ;;  %v209_v20 = vld [vmem:[%s4197_s0 + $0x3a8] sm:$0xff] }
  0x8f   :  { %2370 = vmatprep.subr.bf16.mxu0 %v2756_v0  ;;  %2466 = vmatprep.subr.bf16.mxu1 %v2756_v0  ;;  %v204_v0 = vld [vmem:[%s4197_s0 + $0x380] sm:$0xff]  ;;  %v257_v8 = vld [vmem:[%s4197_s0 + $0x528] sm:$0xff] }
  0x90   :  { %488 = vmatmul.mubr.f32.gmra.mrb[30].mxu0 %v152_v21  ;;  %1578 = vmatmul.mubr.f32.gmra.mrb[30].mxu1 %v1242_v22  ;;  %v1299_v21 = vld [vmem:[#allocation2 + $0x3a8] sm:$0xff]  ;;  %v90_v22 = vld [vmem:[%s4199_s2 + $0x1f0] sm:$0xff] }
  0x91   :  { %492 = vmatprep.mubr.f32.mxu0 %v157_v23  ;;  %1582 = vmatprep.mubr.f32.mxu1 %v1247_v24  ;;  %v91_v23 = vld [vmem:[%s4199_s2 + $0x1f8] sm:$0xff]  ;;  %v208_v24 = vld [vmem:[%s4197_s0 + $0x3a0] sm:$0xff] }
  0x94   :  { %493 = vmatmul.mubr.f32.gmra.mrb[32].mxu0 %v156_v25  ;;  %1583 = vmatmul.mubr.f32.gmra.mrb[32].mxu1 %v1246_v26  ;;  %v1298_v25 = vld [vmem:[#allocation2 + $0x3a0] sm:$0xff]  ;;  %v2371_v26 = vpack.c.bf16 %v91_v23, %v90_v22  ;;  %v273_v23 = vld [vmem:[%s4197_s0 + $0x5a8] sm:$0xff] }
  0x95   :  { %497 = vmatprep.mubr.f32.mxu0 %v161_v27  ;;  %1587 = vmatprep.mubr.f32.mxu1 %v1251_v28  ;;  %v213_v27 = vld [vmem:[%s4197_s0 + $0x3c8] sm:$0xff]  ;;  %v1358_v22 = vld [vmem:[#allocation2 + $0x580] sm:$0xff] }
  0x96   :  { %v1303_v28 = vld [vmem:[#allocation2 + $0x3c8] sm:$0xff]  ;;  %2372 = vmatpush1.bf16.msra.mxu0 %v2371_v26  ;;  %2468 = vmatpush1.bf16.msra.mxu1 %v2371_v26  ;;  %v1362_v26 = vld [vmem:[#allocation2 + $0x5a0] sm:$0xff] }
  0x98   :  { %498 = vmatmul.mubr.f32.gmra.mrb[34].mxu0 %v160_v31  ;;  %1588 = vmatmul.mubr.f32.gmra.mrb[34].mxu1 %v1250_v32  ;;  %v217_v31 = vld [vmem:[%s4197_s0 + $0x3e8] sm:$0xff] }
  0x99   :  { %502 = vmatprep.mubr.f32.mxu0 %v165_v34  ;;  %1592 = vmatprep.mubr.f32.mxu1 %v1255_v35  ;;  %v1307_v32 = vld [vmem:[#allocation2 + $0x3e8] sm:$0xff]  ;;  %v1306_v34 = vld [vmem:[#allocation2 + $0x3e0] sm:$0xff] }
  0x9a   :  { %v221_v35 = vld [vmem:[%s4197_s0 + $0x408] sm:$0xff] }
  0x9c   :  { %503 = vmatmul.mubr.f32.gmra.mrb[36].mxu0 %v164_v36  ;;  %1593 = vmatmul.mubr.f32.gmra.mrb[36].mxu1 %v1254_v37  ;;  %v1311_v36 = vld [vmem:[#allocation2 + $0x408] sm:$0xff]  ;;  %v220_v37 = vld [vmem:[%s4197_s0 + $0x400] sm:$0xff] }
  0x9d   :  { %507 = vmatprep.mubr.f32.mxu0 %v169_v38  ;;  %1597 = vmatprep.mubr.f32.mxu1 %v1259_v39  ;;  %v1310_v38 = vld [vmem:[#allocation2 + $0x400] sm:$0xff]  ;;  %v225_v39 = vld [vmem:[%s4197_s0 + $0x428] sm:$0xff] }
  0xa0   :  { %508 = vmatmul.mubr.f32.gmra.mrb[38].mxu0 %v168_v40  ;;  %1598 = vmatmul.mubr.f32.gmra.mrb[38].mxu1 %v1258_v41  ;;  %v1315_v40 = vld [vmem:[#allocation2 + $0x428] sm:$0xff]  ;;  %v224_v41 = vld [vmem:[%s4197_s0 + $0x420] sm:$0xff] }
  0xa1   :  { %512 = vmatprep.mubr.f32.mxu0 %v173_v42  ;;  %1602 = vmatprep.mubr.f32.mxu1 %v1263_v43  ;;  %v1314_v42 = vld [vmem:[#allocation2 + $0x420] sm:$0xff]  ;;  %v229_v43 = vld [vmem:[%s4197_s0 + $0x448] sm:$0xff] }
  0xa4   :  { %513 = vmatmul.mubr.f32.gmra.mrb[40].mxu0 %v172_v44  ;;  %1603 = vmatmul.mubr.f32.gmra.mrb[40].mxu1 %v1262_v45  ;;  %v1319_v44 = vld [vmem:[#allocation2 + $0x448] sm:$0xff]  ;;  %v228_v45 = vld [vmem:[%s4197_s0 + $0x440] sm:$0xff] }
  0xa5   :  { %517 = vmatprep.mubr.f32.mxu0 %v177_v46  ;;  %1607 = vmatprep.mubr.f32.mxu1 %v1267_v47  ;;  %v1318_v46 = vld [vmem:[#allocation2 + $0x440] sm:$0xff]  ;;  %v233_v47 = vld [vmem:[%s4197_s0 + $0x468] sm:$0xff] }
  0xa8   :  { %518 = vmatmul.mubr.f32.gmra.mrb[42].mxu0 %v176_v50  ;;  %1608 = vmatmul.mubr.f32.gmra.mrb[42].mxu1 %v1266_v51  ;;  %v1322_v50 = vld [vmem:[#allocation2 + $0x460] sm:$0xff]  ;;  %v237_v51 = vld [vmem:[%s4197_s0 + $0x488] sm:$0xff] }
  0xa9   :  { %522 = vmatprep.mubr.f32.mxu0 %v181_v53  ;;  %1612 = vmatprep.mubr.f32.mxu1 %v1271_v54  ;;  %v236_v53 = vld [vmem:[%s4197_s0 + $0x480] sm:$0xff] }
  0xaa   :  { %v1326_v54 = vld [vmem:[#allocation2 + $0x480] sm:$0xff] }
  0xac   :  { %523 = vmatmul.mubr.f32.gmra.mrb[44].mxu0 %v180_v55  ;;  %1613 = vmatmul.mubr.f32.gmra.mrb[44].mxu1 %v1270_v56  ;;  %v241_v55 = vld [vmem:[%s4197_s0 + $0x4a8] sm:$0xff] }
  0xad   :  { %527 = vmatprep.mubr.f32.mxu0 %v185_v57  ;;  %1617 = vmatprep.mubr.f32.mxu1 %v1275_v58  ;;  %v1331_v56 = vld [vmem:[#allocation2 + $0x4a8] sm:$0xff]  ;;  %v240_v57 = vld [vmem:[%s4197_s0 + $0x4a0] sm:$0xff] }
  0xae   :  { %v1330_v58 = vld [vmem:[#allocation2 + $0x4a0] sm:$0xff] }
  0xb0   :  { %528 = vmatmul.mubr.f32.gmra.mrb[46].mxu0 %v184_v59  ;;  %1618 = vmatmul.mubr.f32.gmra.mrb[46].mxu1 %v1274_v60  ;;  %v245_v59 = vld [vmem:[%s4197_s0 + $0x4c8] sm:$0xff] }
  0xb1   :  { %532 = vmatprep.mubr.f32.mxu0 %v189_v61  ;;  %1622 = vmatprep.mubr.f32.mxu1 %v1279_v62  ;;  %v1335_v60 = vld [vmem:[#allocation2 + $0x4c8] sm:$0xff]  ;;  %v244_v61 = vld [vmem:[%s4197_s0 + $0x4c0] sm:$0xff] }
  0xb2   :  { %v1334_v62 = vld [vmem:[#allocation2 + $0x4c0] sm:$0xff] }
  0xb4   :  { %533 = vmatmul.mubr.f32.gmra.mrb[48].mxu0 %v188_v63  ;;  %1623 = vmatmul.mubr.f32.gmra.mrb[48].mxu1 %v1278_v1  ;;  %v249_v63 = vld [vmem:[%s4197_s0 + $0x4e8] sm:$0xff] }
  0xb5   :  { %537 = vmatprep.mubr.f32.mxu0 %v193_v2  ;;  %1627 = vmatprep.mubr.f32.mxu1 %v1283_v3  ;;  %v1339_v1 = vld [vmem:[#allocation2 + $0x4e8] sm:$0xff]  ;;  %v248_v2 = vld [vmem:[%s4197_s0 + $0x4e0] sm:$0xff] }
  0xb6   :  { %v1338_v3 = vld [vmem:[#allocation2 + $0x4e0] sm:$0xff] }
  0xb8   :  { %538 = vmatmul.mubr.f32.gmra.mrb[50].mxu0 %v192_v6  ;;  %1628 = vmatmul.mubr.f32.gmra.mrb[50].mxu1 %v1282_v7  ;;  %v252_v6 = vld [vmem:[%s4197_s0 + $0x500] sm:$0xff] }
  0xb9   :  { %542 = vmatprep.mubr.f32.mxu0 %v197_v9  ;;  %1632 = vmatprep.mubr.f32.mxu1 %v1287_v10  ;;  %v1342_v7 = vld [vmem:[#allocation2 + $0x500] sm:$0xff]  ;;  %v1347_v9 = vld [vmem:[#allocation2 + $0x528] sm:$0xff] }
  0xba   :  { %v256_v10 = vld [vmem:[%s4197_s0 + $0x520] sm:$0xff] }
  0xbc   :  { %543 = vmatmul.mubr.f32.gmra.mrb[52].mxu0 %v196_v11  ;;  %1633 = vmatmul.mubr.f32.gmra.mrb[52].mxu1 %v1286_v12  ;;  %v1346_v11 = vld [vmem:[#allocation2 + $0x520] sm:$0xff]  ;;  %v261_v12 = vld [vmem:[%s4197_s0 + $0x548] sm:$0xff] }
  0xbd   :  { %547 = vmatprep.mubr.f32.mxu0 %v201_v13  ;;  %1637 = vmatprep.mubr.f32.mxu1 %v1291_v14  ;;  %v1351_v13 = vld [vmem:[#allocation2 + $0x548] sm:$0xff]  ;;  %v260_v14 = vld [vmem:[%s4197_s0 + $0x540] sm:$0xff] }
  0xc0   :  { %548 = vmatmul.mubr.f32.gmra.mrb[54].mxu0 %v200_v15  ;;  %1638 = vmatmul.mubr.f32.gmra.mrb[54].mxu1 %v1290_v16  ;;  %v1350_v15 = vld [vmem:[#allocation2 + $0x540] sm:$0xff]  ;;  %v265_v16 = vld [vmem:[%s4197_s0 + $0x568] sm:$0xff] }
  0xc1   :  { %552 = vmatprep.mubr.f32.mxu0 %v205_v17  ;;  %1642 = vmatprep.mubr.f32.mxu1 %v1295_v18  ;;  %v1355_v17 = vld [vmem:[#allocation2 + $0x568] sm:$0xff]  ;;  %v264_v18 = vld [vmem:[%s4197_s0 + $0x560] sm:$0xff] }
  0xc4   :  { %553 = vmatmul.mubr.f32.gmra.mrb[56].mxu0 %v204_v0  ;;  %1643 = vmatmul.mubr.f32.gmra.mrb[56].mxu1 %v1294_v19  ;;  %v1354_v0 = vld [vmem:[#allocation2 + $0x560] sm:$0xff]  ;;  %v269_v19 = vld [vmem:[%s4197_s0 + $0x588] sm:$0xff] }
  0xc5   :  { %557 = vmatprep.mubr.f32.mxu0 %v209_v20  ;;  %1647 = vmatprep.mubr.f32.mxu1 %v1299_v21  ;;  %v1359_v20 = vld [vmem:[#allocation2 + $0x588] sm:$0xff]  ;;  %v268_v21 = vld [vmem:[%s4197_s0 + $0x580] sm:$0xff] }
  0xc8   :  { %558 = vmatmul.mubr.f32.gmra.mrb[58].mxu0 %v208_v24  ;;  %1648 = vmatmul.mubr.f32.gmra.mrb[58].mxu1 %v1298_v25  ;;  %v1363_v24 = vld [vmem:[#allocation2 + $0x5a8] sm:$0xff]  ;;  %v272_v25 = vld [vmem:[%s4197_s0 + $0x5a0] sm:$0xff] }
  0xc9   :  { %562 = vmatprep.mubr.f32.mxu0 %v213_v27  ;;  %1652 = vmatprep.mubr.f32.mxu1 %v1303_v28  ;;  %v277_v27 = vld [vmem:[%s4197_s0 + $0x5c8] sm:$0xff] }
  0xca   :  { %v1367_v28 = vld [vmem:[#allocation2 + $0x5c8] sm:$0xff] }
  0xcc   :  { %563 = vmatmul.mubr.f32.gmra.mrb[60].mxu0 %v212_v29  ;;  %1653 = vmatmul.mubr.f32.gmra.mrb[60].mxu1 %v1302_v30  ;;  %v276_v29 = vld [vmem:[%s4197_s0 + $0x5c0] sm:$0xff] }
  0xcd   :  { %567 = vmatprep.mubr.f32.mxu0 %v217_v31  ;;  %1657 = vmatprep.mubr.f32.mxu1 %v1307_v32  ;;  %v1366_v30 = vld [vmem:[#allocation2 + $0x5c0] sm:$0xff]  ;;  %v281_v31 = vld [vmem:[%s4197_s0 + $0x5e8] sm:$0xff] }
  0xce   :  { %v1371_v32 = vld [vmem:[#allocation2 + $0x5e8] sm:$0xff] }
  0xd0   :  { %568 = vmatmul.mubr.f32.gmra.mrb[62].mxu0 %v216_v33  ;;  %1658 = vmatmul.mubr.f32.gmra.mrb[62].mxu1 %v1306_v34  ;;  %v280_v33 = vld [vmem:[%s4197_s0 + $0x5e0] sm:$0xff] }
  0xd1   :  { %572 = vmatprep.mubr.f32.mxu0 %v221_v35  ;;  %1662 = vmatprep.mubr.f32.mxu1 %v1311_v36  ;;  %v1370_v34 = vld [vmem:[#allocation2 + $0x5e0] sm:$0xff]  ;;  %v285_v35 = vld [vmem:[%s4197_s0 + $0x608] sm:$0xff] }
  0xd2   :  { %v1375_v36 = vld [vmem:[#allocation2 + $0x608] sm:$0xff] }
  0xd4   :  { %573 = vmatmul.mubr.f32.gmra.mrb[64].mxu0 %v220_v37  ;;  %1663 = vmatmul.mubr.f32.gmra.mrb[64].mxu1 %v1310_v38  ;;  %v284_v37 = vld [vmem:[%s4197_s0 + $0x600] sm:$0xff] }
  0xd5   :  { %577 = vmatprep.mubr.f32.mxu0 %v225_v39  ;;  %1667 = vmatprep.mubr.f32.mxu1 %v1315_v40  ;;  %v1374_v38 = vld [vmem:[#allocation2 + $0x600] sm:$0xff]  ;;  %v289_v39 = vld [vmem:[%s4197_s0 + $0x628] sm:$0xff] }
  0xd6   :  { %v1379_v40 = vld [vmem:[#allocation2 + $0x628] sm:$0xff] }
  0xd8   :  { %578 = vmatmul.mubr.f32.gmra.mrb[66].mxu0 %v224_v41  ;;  %1668 = vmatmul.mubr.f32.gmra.mrb[66].mxu1 %v1314_v42  ;;  %v288_v41 = vld [vmem:[%s4197_s0 + $0x620] sm:$0xff] }
  0xd9   :  { %582 = vmatprep.mubr.f32.mxu0 %v229_v43  ;;  %1672 = vmatprep.mubr.f32.mxu1 %v1319_v44  ;;  %v1378_v42 = vld [vmem:[#allocation2 + $0x620] sm:$0xff]  ;;  %v293_v43 = vld [vmem:[%s4197_s0 + $0x648] sm:$0xff] }
  0xda   :  { %v1383_v44 = vld [vmem:[#allocation2 + $0x648] sm:$0xff] }
  0xdc   :  { %583 = vmatmul.mubr.f32.gmra.mrb[68].mxu0 %v228_v45  ;;  %1673 = vmatmul.mubr.f32.gmra.mrb[68].mxu1 %v1318_v46  ;;  %v292_v45 = vld [vmem:[%s4197_s0 + $0x640] sm:$0xff] }
  0xdd   :  { %587 = vmatprep.mubr.f32.mxu0 %v233_v47  ;;  %1677 = vmatprep.mubr.f32.mxu1 %v1323_v48  ;;  %v1382_v46 = vld [vmem:[#allocation2 + $0x640] sm:$0xff]  ;;  %v297_v47 = vld [vmem:[%s4197_s0 + $0x668] sm:$0xff] }
  0xde   :  { %v1387_v48 = vld [vmem:[#allocation2 + $0x668] sm:$0xff] }
  0xe0   :  { %588 = vmatmul.mubr.f32.gmra.mrb[70].mxu0 %v232_v49  ;;  %1678 = vmatmul.mubr.f32.gmra.mrb[70].mxu1 %v1322_v50  ;;  %v296_v49 = vld [vmem:[%s4197_s0 + $0x660] sm:$0xff] }
  0xe1   :  { %592 = vmatprep.mubr.f32.mxu0 %v237_v51  ;;  %1682 = vmatprep.mubr.f32.mxu1 %v1327_v52  ;;  %v1386_v50 = vld [vmem:[#allocation2 + $0x660] sm:$0xff]  ;;  %v301_v51 = vld [vmem:[%s4197_s0 + $0x688] sm:$0xff] }
  0xe2   :  { %v1391_v52 = vld [vmem:[#allocation2 + $0x688] sm:$0xff] }
  0xe4   :  { %593 = vmatmul.mubr.f32.gmra.mrb[72].mxu0 %v236_v53  ;;  %1683 = vmatmul.mubr.f32.gmra.mrb[72].mxu1 %v1326_v54  ;;  %v300_v53 = vld [vmem:[%s4197_s0 + $0x680] sm:$0xff] }
  0xe5   :  { %597 = vmatprep.mubr.f32.mxu0 %v241_v55  ;;  %1687 = vmatprep.mubr.f32.mxu1 %v1331_v56  ;;  %v1390_v54 = vld [vmem:[#allocation2 + $0x680] sm:$0xff]  ;;  %v305_v55 = vld [vmem:[%s4197_s0 + $0x6a8] sm:$0xff] }
  0xe6   :  { %v1395_v56 = vld [vmem:[#allocation2 + $0x6a8] sm:$0xff] }
  0xe8   :  { %598 = vmatmul.mubr.f32.gmra.mrb[74].mxu0 %v240_v57  ;;  %1688 = vmatmul.mubr.f32.gmra.mrb[74].mxu1 %v1330_v58  ;;  %v304_v57 = vld [vmem:[%s4197_s0 + $0x6a0] sm:$0xff] }
  0xe9   :  { %602 = vmatprep.mubr.f32.mxu0 %v245_v59  ;;  %1692 = vmatprep.mubr.f32.mxu1 %v1335_v60  ;;  %v1394_v58 = vld [vmem:[#allocation2 + $0x6a0] sm:$0xff]  ;;  %v309_v59 = vld [vmem:[%s4197_s0 + $0x6c8] sm:$0xff] }
  0xea   :  { %v1399_v60 = vld [vmem:[#allocation2 + $0x6c8] sm:$0xff] }
  0xec   :  { %603 = vmatmul.mubr.f32.gmra.mrb[76].mxu0 %v244_v61  ;;  %1693 = vmatmul.mubr.f32.gmra.mrb[76].mxu1 %v1334_v62  ;;  %v308_v61 = vld [vmem:[%s4197_s0 + $0x6c0] sm:$0xff] }
  0xed   :  { %607 = vmatprep.mubr.f32.mxu0 %v249_v63  ;;  %1697 = vmatprep.mubr.f32.mxu1 %v1339_v1  ;;  %v1398_v62 = vld [vmem:[#allocation2 + $0x6c0] sm:$0xff]  ;;  %v313_v63 = vld [vmem:[%s4197_s0 + $0x6e8] sm:$0xff] }
  0xee   :  { %v1403_v1 = vld [vmem:[#allocation2 + $0x6e8] sm:$0xff] }
  0xf0   :  { %608 = vmatmul.mubr.f32.gmra.mrb[78].mxu0 %v248_v2  ;;  %1698 = vmatmul.mubr.f32.gmra.mrb[78].mxu1 %v1338_v3  ;;  %v312_v2 = vld [vmem:[%s4197_s0 + $0x6e0] sm:$0xff] }
  0xf1   :  { %612 = vmatprep.mubr.f32.mxu0 %v253_v4  ;;  %1702 = vmatprep.mubr.f32.mxu1 %v1343_v5  ;;  %v1402_v3 = vld [vmem:[#allocation2 + $0x6e0] sm:$0xff]  ;;  %v317_v4 = vld [vmem:[%s4197_s0 + $0x708] sm:$0xff] }
  0xf2   :  { %v1407_v5 = vld [vmem:[#allocation2 + $0x708] sm:$0xff] }
  0xf4   :  { %613 = vmatmul.mubr.f32.gmra.mrb[80].mxu0 %v252_v6  ;;  %1703 = vmatmul.mubr.f32.gmra.mrb[80].mxu1 %v1342_v7  ;;  %v316_v6 = vld [vmem:[%s4197_s0 + $0x700] sm:$0xff] }
  0xf5   :  { %617 = vmatprep.mubr.f32.mxu0 %v257_v8  ;;  %1707 = vmatprep.mubr.f32.mxu1 %v1347_v9  ;;  %v1406_v7 = vld [vmem:[#allocation2 + $0x700] sm:$0xff]  ;;  %v321_v8 = vld [vmem:[%s4197_s0 + $0x728] sm:$0xff] }
  0xf6   :  { %v1411_v9 = vld [vmem:[#allocation2 + $0x728] sm:$0xff] }
  0xf8   :  { %618 = vmatmul.mubr.f32.gmra.mrb[82].mxu0 %v256_v10  ;;  %1708 = vmatmul.mubr.f32.gmra.mrb[82].mxu1 %v1346_v11  ;;  %v320_v10 = vld [vmem:[%s4197_s0 + $0x720] sm:$0xff] }
  0xf9   :  { %622 = vmatprep.mubr.f32.mxu0 %v261_v12  ;;  %1712 = vmatprep.mubr.f32.mxu1 %v1351_v13  ;;  %v1410_v11 = vld [vmem:[#allocation2 + $0x720] sm:$0xff]  ;;  %v325_v12 = vld [vmem:[%s4197_s0 + $0x748] sm:$0xff] }
  0xfa   :  { %v1415_v13 = vld [vmem:[#allocation2 + $0x748] sm:$0xff] }
  0xfc   :  { %623 = vmatmul.mubr.f32.gmra.mrb[84].mxu0 %v260_v14  ;;  %1713 = vmatmul.mubr.f32.gmra.mrb[84].mxu1 %v1350_v15  ;;  %v324_v14 = vld [vmem:[%s4197_s0 + $0x740] sm:$0xff] }
  0xfd   :  { %627 = vmatprep.mubr.f32.mxu0 %v265_v16  ;;  %1717 = vmatprep.mubr.f32.mxu1 %v1355_v17  ;;  %v1414_v15 = vld [vmem:[#allocation2 + $0x740] sm:$0xff]  ;;  %v329_v16 = vld [vmem:[%s4197_s0 + $0x768] sm:$0xff] }
  0xfe   :  { %v1419_v17 = vld [vmem:[#allocation2 + $0x768] sm:$0xff] }
 0x100   :  { %628 = vmatmul.mubr.f32.gmra.mrb[86].mxu0 %v264_v18  ;;  %1718 = vmatmul.mubr.f32.gmra.mrb[86].mxu1 %v1354_v0  ;;  %v328_v18 = vld [vmem:[%s4197_s0 + $0x760] sm:$0xff] }
 0x101   :  { %632 = vmatprep.mubr.f32.mxu0 %v269_v19  ;;  %1722 = vmatprep.mubr.f32.mxu1 %v1359_v20  ;;  %v1418_v0 = vld [vmem:[#allocation2 + $0x760] sm:$0xff]  ;;  %v333_v19 = vld [vmem:[%s4197_s0 + $0x788] sm:$0xff] }
 0x102   :  { %v1423_v20 = vld [vmem:[#allocation2 + $0x788] sm:$0xff] }
 0x104   :  { %633 = vmatmul.mubr.f32.gmra.mrb[88].mxu0 %v268_v21  ;;  %1723 = vmatmul.mubr.f32.gmra.mrb[88].mxu1 %v1358_v22  ;;  %v332_v21 = vld [vmem:[%s4197_s0 + $0x780] sm:$0xff] }
 0x105   :  { %637 = vmatprep.mubr.f32.mxu0 %v273_v23  ;;  %1727 = vmatprep.mubr.f32.mxu1 %v1363_v24  ;;  %v1422_v22 = vld [vmem:[#allocation2 + $0x780] sm:$0xff]  ;;  %v337_v23 = vld [vmem:[%s4197_s0 + $0x7a8] sm:$0xff] }
 0x106   :  { %v1427_v24 = vld [vmem:[#allocation2 + $0x7a8] sm:$0xff] }
 0x108   :  { %638 = vmatmul.mubr.f32.gmra.mrb[90].mxu0 %v272_v25  ;;  %1728 = vmatmul.mubr.f32.gmra.mrb[90].mxu1 %v1362_v26  ;;  %v336_v25 = vld [vmem:[%s4197_s0 + $0x7a0] sm:$0xff] }
 0x109   :  { %642 = vmatprep.mubr.f32.mxu0 %v277_v27  ;;  %1732 = vmatprep.mubr.f32.mxu1 %v1367_v28  ;;  %v1426_v26 = vld [vmem:[#allocation2 + $0x7a0] sm:$0xff]  ;;  %v341_v27 = vld [vmem:[%s4197_s0 + $0x7c8] sm:$0xff] }
 0x10a   :  { %v1431_v28 = vld [vmem:[#allocation2 + $0x7c8] sm:$0xff] }
 0x10c   :  { %643 = vmatmul.mubr.f32.gmra.mrb[92].mxu0 %v276_v29  ;;  %1733 = vmatmul.mubr.f32.gmra.mrb[92].mxu1 %v1366_v30  ;;  %v340_v29 = vld [vmem:[%s4197_s0 + $0x7c0] sm:$0xff] }
 0x10d   :  { %647 = vmatprep.mubr.f32.mxu0 %v281_v31  ;;  %1737 = vmatprep.mubr.f32.mxu1 %v1371_v32  ;;  %v1430_v30 = vld [vmem:[#allocation2 + $0x7c0] sm:$0xff]  ;;  %v345_v31 = vld [vmem:[%s4197_s0 + $0x7e8] sm:$0xff] }
 0x10e   :  { %v1435_v32 = vld [vmem:[#allocation2 + $0x7e8] sm:$0xff] }
 0x110   :  { %648 = vmatmul.mubr.f32.gmra.mrb[94].mxu0 %v280_v33  ;;  %1738 = vmatmul.mubr.f32.gmra.mrb[94].mxu1 %v1370_v34  ;;  %v344_v33 = vld [vmem:[%s4197_s0 + $0x7e0] sm:$0xff] }
 0x111   :  { %652 = vmatprep.mubr.f32.mxu0 %v285_v35  ;;  %1742 = vmatprep.mubr.f32.mxu1 %v1375_v36  ;;  %v1434_v34 = vld [vmem:[#allocation2 + $0x7e0] sm:$0xff]  ;;  %v95_v35 = vld [vmem:[%s4197_s0 + $0x18] sm:$0xff] }
 0x112   :  { %v1185_v36 = vld [vmem:[#allocation2 + $0x18] sm:$0xff] }
 0x114   :  { %653 = vmatmul.mubr.f32.gmra.mrb[96].mxu0 %v284_v37  ;;  %1743 = vmatmul.mubr.f32.gmra.mrb[96].mxu1 %v1374_v38  ;;  %v94_v37 = vld [vmem:[%s4197_s0 + $0x10] sm:$0xff] }
 0x115   :  { %657 = vmatprep.mubr.f32.mxu0 %v289_v39  ;;  %1747 = vmatprep.mubr.f32.mxu1 %v1379_v40  ;;  %v1184_v38 = vld [vmem:[#allocation2 + $0x10] sm:$0xff]  ;;  %v99_v39 = vld [vmem:[%s4197_s0 + $0x38] sm:$0xff] }
 0x116   :  { %v1189_v40 = vld [vmem:[#allocation2 + $0x38] sm:$0xff] }
 0x118   :  { %658 = vmatmul.mubr.f32.gmra.mrb[98].mxu0 %v288_v41  ;;  %1748 = vmatmul.mubr.f32.gmra.mrb[98].mxu1 %v1378_v42  ;;  %v98_v41 = vld [vmem:[%s4197_s0 + $0x30] sm:$0xff] }
 0x119   :  { %662 = vmatprep.mubr.f32.mxu0 %v293_v43  ;;  %1752 = vmatprep.mubr.f32.mxu1 %v1383_v44  ;;  %v1188_v42 = vld [vmem:[#allocation2 + $0x30] sm:$0xff]  ;;  %v103_v43 = vld [vmem:[%s4197_s0 + $0x58] sm:$0xff] }
 0x11a   :  { %v1193_v44 = vld [vmem:[#allocation2 + $0x58] sm:$0xff] }
 0x11c   :  { %663 = vmatmul.mubr.f32.gmra.mrb[100].mxu0 %v292_v45  ;;  %1753 = vmatmul.mubr.f32.gmra.mrb[100].mxu1 %v1382_v46  ;;  %v102_v45 = vld [vmem:[%s4197_s0 + $0x50] sm:$0xff] }
 0x11d   :  { %667 = vmatprep.mubr.f32.mxu0 %v297_v47  ;;  %1757 = vmatprep.mubr.f32.mxu1 %v1387_v48  ;;  %v1192_v46 = vld [vmem:[#allocation2 + $0x50] sm:$0xff]  ;;  %v107_v47 = vld [vmem:[%s4197_s0 + $0x78] sm:$0xff] }
 0x11e   :  { %v1197_v48 = vld [vmem:[#allocation2 + $0x78] sm:$0xff] }
 0x120   :  { %668 = vmatmul.mubr.f32.gmra.mrb[102].mxu0 %v296_v49  ;;  %1758 = vmatmul.mubr.f32.gmra.mrb[102].mxu1 %v1386_v50  ;;  %v106_v49 = vld [vmem:[%s4197_s0 + $0x70] sm:$0xff] }
 0x121   :  { %672 = vmatprep.mubr.f32.mxu0 %v301_v51  ;;  %1762 = vmatprep.mubr.f32.mxu1 %v1391_v52  ;;  %v1196_v50 = vld [vmem:[#allocation2 + $0x70] sm:$0xff]  ;;  %v111_v51 = vld [vmem:[%s4197_s0 + $0x98] sm:$0xff] }
 0x122   :  { %v1201_v52 = vld [vmem:[#allocation2 + $0x98] sm:$0xff] }
 0x124   :  { %673 = vmatmul.mubr.f32.gmra.mrb[104].mxu0 %v300_v53  ;;  %1763 = vmatmul.mubr.f32.gmra.mrb[104].mxu1 %v1390_v54  ;;  %v110_v53 = vld [vmem:[%s4197_s0 + $0x90] sm:$0xff] }
 0x125   :  { %677 = vmatprep.mubr.f32.mxu0 %v305_v55  ;;  %1767 = vmatprep.mubr.f32.mxu1 %v1395_v56  ;;  %v1200_v54 = vld [vmem:[#allocation2 + $0x90] sm:$0xff]  ;;  %v115_v55 = vld [vmem:[%s4197_s0 + $0xb8] sm:$0xff] }
 0x126   :  { %v1205_v56 = vld [vmem:[#allocation2 + $0xb8] sm:$0xff] }
 0x128   :  { %678 = vmatmul.mubr.f32.gmra.mrb[106].mxu0 %v304_v57  ;;  %1768 = vmatmul.mubr.f32.gmra.mrb[106].mxu1 %v1394_v58  ;;  %v114_v57 = vld [vmem:[%s4197_s0 + $0xb0] sm:$0xff] }
 0x129   :  { %682 = vmatprep.mubr.f32.mxu0 %v309_v59  ;;  %1772 = vmatprep.mubr.f32.mxu1 %v1399_v60  ;;  %v1204_v58 = vld [vmem:[#allocation2 + $0xb0] sm:$0xff]  ;;  %v119_v59 = vld [vmem:[%s4197_s0 + $0xd8] sm:$0xff] }
 0x12a   :  { %v1209_v60 = vld [vmem:[#allocation2 + $0xd8] sm:$0xff] }
 0x12c   :  { %683 = vmatmul.mubr.f32.gmra.mrb[108].mxu0 %v308_v61  ;;  %1773 = vmatmul.mubr.f32.gmra.mrb[108].mxu1 %v1398_v62  ;;  %v118_v61 = vld [vmem:[%s4197_s0 + $0xd0] sm:$0xff] }
 0x12d   :  { %687 = vmatprep.mubr.f32.mxu0 %v313_v63  ;;  %1777 = vmatprep.mubr.f32.mxu1 %v1403_v1  ;;  %v1208_v62 = vld [vmem:[#allocation2 + $0xd0] sm:$0xff]  ;;  %v123_v63 = vld [vmem:[%s4197_s0 + $0xf8] sm:$0xff] }
 0x12e   :  { %v1213_v1 = vld [vmem:[#allocation2 + $0xf8] sm:$0xff] }
 0x130   :  { %688 = vmatmul.mubr.f32.gmra.mrb[110].mxu0 %v312_v2  ;;  %1778 = vmatmul.mubr.f32.gmra.mrb[110].mxu1 %v1402_v3  ;;  %v122_v2 = vld [vmem:[%s4197_s0 + $0xf0] sm:$0xff] }
 0x131   :  { %692 = vmatprep.mubr.f32.mxu0 %v317_v4  ;;  %1782 = vmatprep.mubr.f32.mxu1 %v1407_v5  ;;  %v1212_v3 = vld [vmem:[#allocation2 + $0xf0] sm:$0xff]  ;;  %v127_v4 = vld [vmem:[%s4197_s0 + $0x118] sm:$0xff] }
 0x132   :  { %v1217_v5 = vld [vmem:[#allocation2 + $0x118] sm:$0xff] }
 0x134   :  { %693 = vmatmul.mubr.f32.gmra.mrb[112].mxu0 %v316_v6  ;;  %1783 = vmatmul.mubr.f32.gmra.mrb[112].mxu1 %v1406_v7  ;;  %v126_v6 = vld [vmem:[%s4197_s0 + $0x110] sm:$0xff] }
 0x135   :  { %697 = vmatprep.mubr.f32.mxu0 %v321_v8  ;;  %1787 = vmatprep.mubr.f32.mxu1 %v1411_v9  ;;  %v1216_v7 = vld [vmem:[#allocation2 + $0x110] sm:$0xff]  ;;  %v131_v8 = vld [vmem:[%s4197_s0 + $0x138] sm:$0xff] }
 0x136   :  { %v1221_v9 = vld [vmem:[#allocation2 + $0x138] sm:$0xff] }
 0x138   :  { %698 = vmatmul.mubr.f32.gmra.mrb[114].mxu0 %v320_v10  ;;  %1788 = vmatmul.mubr.f32.gmra.mrb[114].mxu1 %v1410_v11  ;;  %v130_v10 = vld [vmem:[%s4197_s0 + $0x130] sm:$0xff] }
 0x139   :  { %702 = vmatprep.mubr.f32.mxu0 %v325_v12  ;;  %1792 = vmatprep.mubr.f32.mxu1 %v1415_v13  ;;  %v1220_v11 = vld [vmem:[#allocation2 + $0x130] sm:$0xff]  ;;  %v135_v12 = vld [vmem:[%s4197_s0 + $0x158] sm:$0xff] }
 0x13a   :  { %v1225_v13 = vld [vmem:[#allocation2 + $0x158] sm:$0xff] }
 0x13c   :  { %703 = vmatmul.mubr.f32.gmra.mrb[116].mxu0 %v324_v14  ;;  %1793 = vmatmul.mubr.f32.gmra.mrb[116].mxu1 %v1414_v15  ;;  %v134_v14 = vld [vmem:[%s4197_s0 + $0x150] sm:$0xff] }
 0x13d   :  { %707 = vmatprep.mubr.f32.mxu0 %v329_v16  ;;  %1797 = vmatprep.mubr.f32.mxu1 %v1419_v17  ;;  %v1224_v15 = vld [vmem:[#allocation2 + $0x150] sm:$0xff]  ;;  %v139_v16 = vld [vmem:[%s4197_s0 + $0x178] sm:$0xff] }
 0x13e   :  { %v1229_v17 = vld [vmem:[#allocation2 + $0x178] sm:$0xff] }
 0x140   :  { %708 = vmatmul.mubr.f32.gmra.mrb[118].mxu0 %v328_v18  ;;  %1798 = vmatmul.mubr.f32.gmra.mrb[118].mxu1 %v1418_v0  ;;  %v138_v18 = vld [vmem:[%s4197_s0 + $0x170] sm:$0xff] }
 0x141   :  { %712 = vmatprep.mubr.f32.mxu0 %v333_v19  ;;  %1802 = vmatprep.mubr.f32.mxu1 %v1423_v20  ;;  %v1228_v0 = vld [vmem:[#allocation2 + $0x170] sm:$0xff]  ;;  %v143_v19 = vld [vmem:[%s4197_s0 + $0x198] sm:$0xff] }
 0x142   :  { %v1233_v20 = vld [vmem:[#allocation2 + $0x198] sm:$0xff] }
 0x144   :  { %713 = vmatmul.mubr.f32.gmra.mrb[120].mxu0 %v332_v21  ;;  %1803 = vmatmul.mubr.f32.gmra.mrb[120].mxu1 %v1422_v22  ;;  %v142_v21 = vld [vmem:[%s4197_s0 + $0x190] sm:$0xff] }
 0x145   :  { %717 = vmatprep.mubr.f32.mxu0 %v337_v23  ;;  %1807 = vmatprep.mubr.f32.mxu1 %v1427_v24  ;;  %v1232_v22 = vld [vmem:[#allocation2 + $0x190] sm:$0xff]  ;;  %v147_v23 = vld [vmem:[%s4197_s0 + $0x1b8] sm:$0xff] }
 0x146   :  { %v1237_v24 = vld [vmem:[#allocation2 + $0x1b8] sm:$0xff] }
 0x148   :  { %718 = vmatmul.mubr.f32.gmra.mrb[122].mxu0 %v336_v25  ;;  %1808 = vmatmul.mubr.f32.gmra.mrb[122].mxu1 %v1426_v26  ;;  %v146_v25 = vld [vmem:[%s4197_s0 + $0x1b0] sm:$0xff] }
 0x149   :  { %722 = vmatprep.mubr.f32.mxu0 %v341_v27  ;;  %1812 = vmatprep.mubr.f32.mxu1 %v1431_v28  ;;  %v1236_v26 = vld [vmem:[#allocation2 + $0x1b0] sm:$0xff]  ;;  %v151_v27 = vld [vmem:[%s4197_s0 + $0x1d8] sm:$0xff] }
 0x14a   :  { %v1241_v28 = vld [vmem:[#allocation2 + $0x1d8] sm:$0xff] }
 0x14c   :  { %723 = vmatmul.mubr.f32.gmra.mrb[124].mxu0 %v340_v29  ;;  %1813 = vmatmul.mubr.f32.gmra.mrb[124].mxu1 %v1430_v30  ;;  %v150_v29 = vld [vmem:[%s4197_s0 + $0x1d0] sm:$0xff] }
 0x14d   :  { %727 = vmatprep.mubr.f32.mxu0 %v345_v31  ;;  %1817 = vmatprep.mubr.f32.mxu1 %v1435_v32  ;;  %v1240_v30 = vld [vmem:[#allocation2 + $0x1d0] sm:$0xff]  ;;  %v155_v31 = vld [vmem:[%s4197_s0 + $0x1f8] sm:$0xff] }
 0x14e   :  { %v1245_v32 = vld [vmem:[#allocation2 + $0x1f8] sm:$0xff] }
 0x150   :  { %728 = vmatmul.mubr.f32.gmra.mrb[126].mxu0 %v344_v33  ;;  %1818 = vmatmul.mubr.f32.gmra.mrb[126].mxu1 %v1434_v34  ;;  %v154_v33 = vld [vmem:[%s4197_s0 + $0x1f0] sm:$0xff] }
 0x151   :  { %797 = vmatprep.mubr.f32.mxu0 %v95_v35  ;;  %1887 = vmatprep.mubr.f32.mxu1 %v1185_v36  ;;  %v1244_v34 = vld [vmem:[#allocation2 + $0x1f0] sm:$0xff]  ;;  %v159_v35 = vld [vmem:[%s4197_s0 + $0x218] sm:$0xff] }
 0x152   :  { %v1249_v36 = vld [vmem:[#allocation2 + $0x218] sm:$0xff] }
 0x154   :  { %798 = vmatmul.mubr.f32.vlgmr.msra.gmra.mrb[0].mxu0 %v94_v37  ;;  %1888 = vmatmul.mubr.f32.vlgmr.msra.gmra.mrb[0].mxu1 %v1184_v38  ;;  %v158_v37 = vld [vmem:[%s4197_s0 + $0x210] sm:$0xff] }
 0x155   :  { %802 = vmatprep.mubr.f32.mxu0 %v99_v39  ;;  %1892 = vmatprep.mubr.f32.mxu1 %v1189_v40  ;;  %v1248_v38 = vld [vmem:[#allocation2 + $0x210] sm:$0xff]  ;;  %v163_v39 = vld [vmem:[%s4197_s0 + $0x238] sm:$0xff] }
 0x156   :  { %v1253_v40 = vld [vmem:[#allocation2 + $0x238] sm:$0xff] }
 0x158   :  { %803 = vmatmul.mubr.f32.gmra.mrb[2].mxu0 %v98_v41  ;;  %1893 = vmatmul.mubr.f32.gmra.mrb[2].mxu1 %v1188_v42  ;;  %v162_v41 = vld [vmem:[%s4197_s0 + $0x230] sm:$0xff] }
 0x159   :  { %807 = vmatprep.mubr.f32.mxu0 %v103_v43  ;;  %1897 = vmatprep.mubr.f32.mxu1 %v1193_v44  ;;  %v1252_v42 = vld [vmem:[#allocation2 + $0x230] sm:$0xff]  ;;  %v167_v43 = vld [vmem:[%s4197_s0 + $0x258] sm:$0xff] }
 0x15a   :  { %v1257_v44 = vld [vmem:[#allocation2 + $0x258] sm:$0xff] }
 0x15c   :  { %808 = vmatmul.mubr.f32.gmra.mrb[4].mxu0 %v102_v45  ;;  %1898 = vmatmul.mubr.f32.gmra.mrb[4].mxu1 %v1192_v46  ;;  %v166_v45 = vld [vmem:[%s4197_s0 + $0x250] sm:$0xff] }
 0x15d   :  { %812 = vmatprep.mubr.f32.mxu0 %v107_v47  ;;  %1902 = vmatprep.mubr.f32.mxu1 %v1197_v48  ;;  %v1256_v46 = vld [vmem:[#allocation2 + $0x250] sm:$0xff]  ;;  %v171_v47 = vld [vmem:[%s4197_s0 + $0x278] sm:$0xff] }
 0x15e   :  { %v1261_v48 = vld [vmem:[#allocation2 + $0x278] sm:$0xff] }
 0x160   :  { %813 = vmatmul.mubr.f32.gmra.mrb[6].mxu0 %v106_v49  ;;  %1903 = vmatmul.mubr.f32.gmra.mrb[6].mxu1 %v1196_v50  ;;  %v170_v49 = vld [vmem:[%s4197_s0 + $0x270] sm:$0xff] }
 0x161   :  { %817 = vmatprep.mubr.f32.mxu0 %v111_v51  ;;  %1907 = vmatprep.mubr.f32.mxu1 %v1201_v52  ;;  %v1260_v50 = vld [vmem:[#allocation2 + $0x270] sm:$0xff]  ;;  %v175_v51 = vld [vmem:[%s4197_s0 + $0x298] sm:$0xff] }
 0x162   :  { %v1265_v52 = vld [vmem:[#allocation2 + $0x298] sm:$0xff] }
 0x164   :  { %818 = vmatmul.mubr.f32.gmra.mrb[8].mxu0 %v110_v53  ;;  %1908 = vmatmul.mubr.f32.gmra.mrb[8].mxu1 %v1200_v54  ;;  %v174_v53 = vld [vmem:[%s4197_s0 + $0x290] sm:$0xff] }
 0x165   :  { %822 = vmatprep.mubr.f32.mxu0 %v115_v55  ;;  %1912 = vmatprep.mubr.f32.mxu1 %v1205_v56  ;;  %v1264_v54 = vld [vmem:[#allocation2 + $0x290] sm:$0xff]  ;;  %v179_v55 = vld [vmem:[%s4197_s0 + $0x2b8] sm:$0xff] }
 0x166   :  { %v1269_v56 = vld [vmem:[#allocation2 + $0x2b8] sm:$0xff] }
 0x168   :  { %823 = vmatmul.mubr.f32.gmra.mrb[10].mxu0 %v114_v57  ;;  %1913 = vmatmul.mubr.f32.gmra.mrb[10].mxu1 %v1204_v58  ;;  %v178_v57 = vld [vmem:[%s4197_s0 + $0x2b0] sm:$0xff] }
 0x169   :  { %827 = vmatprep.mubr.f32.mxu0 %v119_v59  ;;  %1917 = vmatprep.mubr.f32.mxu1 %v1209_v60  ;;  %v1268_v58 = vld [vmem:[#allocation2 + $0x2b0] sm:$0xff]  ;;  %v183_v59 = vld [vmem:[%s4197_s0 + $0x2d8] sm:$0xff] }
 0x16a   :  { %v1273_v60 = vld [vmem:[#allocation2 + $0x2d8] sm:$0xff] }
 0x16c   :  { %828 = vmatmul.mubr.f32.gmra.mrb[12].mxu0 %v118_v61  ;;  %1918 = vmatmul.mubr.f32.gmra.mrb[12].mxu1 %v1208_v62  ;;  %v182_v61 = vld [vmem:[%s4197_s0 + $0x2d0] sm:$0xff] }
 0x16d   :  { %832 = vmatprep.mubr.f32.mxu0 %v123_v63  ;;  %1922 = vmatprep.mubr.f32.mxu1 %v1213_v1  ;;  %v1272_v62 = vld [vmem:[#allocation2 + $0x2d0] sm:$0xff]  ;;  %v187_v63 = vld [vmem:[%s4197_s0 + $0x2f8] sm:$0xff] }
 0x16e   :  { %v1277_v1 = vld [vmem:[#allocation2 + $0x2f8] sm:$0xff] }
 0x170   :  { %833 = vmatmul.mubr.f32.gmra.mrb[14].mxu0 %v122_v2  ;;  %1923 = vmatmul.mubr.f32.gmra.mrb[14].mxu1 %v1212_v3  ;;  %v186_v2 = vld [vmem:[%s4197_s0 + $0x2f0] sm:$0xff] }
 0x171   :  { %837 = vmatprep.mubr.f32.mxu0 %v127_v4  ;;  %1927 = vmatprep.mubr.f32.mxu1 %v1217_v5  ;;  %v1276_v3 = vld [vmem:[#allocation2 + $0x2f0] sm:$0xff]  ;;  %v191_v4 = vld [vmem:[%s4197_s0 + $0x318] sm:$0xff] }
 0x172   :  { %v1281_v5 = vld [vmem:[#allocation2 + $0x318] sm:$0xff] }
 0x174   :  { %838 = vmatmul.mubr.f32.gmra.mrb[16].mxu0 %v126_v6  ;;  %1928 = vmatmul.mubr.f32.gmra.mrb[16].mxu1 %v1216_v7  ;;  %v190_v6 = vld [vmem:[%s4197_s0 + $0x310] sm:$0xff] }
 0x175   :  { %842 = vmatprep.mubr.f32.mxu0 %v131_v8  ;;  %1932 = vmatprep.mubr.f32.mxu1 %v1221_v9  ;;  %v1280_v7 = vld [vmem:[#allocation2 + $0x310] sm:$0xff]  ;;  %v195_v8 = vld [vmem:[%s4197_s0 + $0x338] sm:$0xff] }
 0x176   :  { %v1285_v9 = vld [vmem:[#allocation2 + $0x338] sm:$0xff] }
 0x178   :  { %843 = vmatmul.mubr.f32.gmra.mrb[18].mxu0 %v130_v10  ;;  %1933 = vmatmul.mubr.f32.gmra.mrb[18].mxu1 %v1220_v11  ;;  %v194_v10 = vld [vmem:[%s4197_s0 + $0x330] sm:$0xff] }
 0x179   :  { %847 = vmatprep.mubr.f32.mxu0 %v135_v12  ;;  %1937 = vmatprep.mubr.f32.mxu1 %v1225_v13  ;;  %v1284_v11 = vld [vmem:[#allocation2 + $0x330] sm:$0xff]  ;;  %v199_v12 = vld [vmem:[%s4197_s0 + $0x358] sm:$0xff] }
 0x17a   :  { %v1289_v13 = vld [vmem:[#allocation2 + $0x358] sm:$0xff] }
 0x17c   :  { %848 = vmatmul.mubr.f32.gmra.mrb[20].mxu0 %v134_v14  ;;  %1938 = vmatmul.mubr.f32.gmra.mrb[20].mxu1 %v1224_v15  ;;  %v198_v14 = vld [vmem:[%s4197_s0 + $0x350] sm:$0xff] }
 0x17d   :  { %852 = vmatprep.mubr.f32.mxu0 %v139_v16  ;;  %1942 = vmatprep.mubr.f32.mxu1 %v1229_v17  ;;  %v1288_v15 = vld [vmem:[#allocation2 + $0x350] sm:$0xff]  ;;  %v203_v16 = vld [vmem:[%s4197_s0 + $0x378] sm:$0xff] }
 0x17e   :  { %v1293_v17 = vld [vmem:[#allocation2 + $0x378] sm:$0xff] }
 0x180   :  { %853 = vmatmul.mubr.f32.gmra.mrb[22].mxu0 %v138_v18  ;;  %1943 = vmatmul.mubr.f32.gmra.mrb[22].mxu1 %v1228_v0  ;;  %v202_v18 = vld [vmem:[%s4197_s0 + $0x370] sm:$0xff] }
 0x181   :  { %857 = vmatprep.mubr.f32.mxu0 %v143_v19  ;;  %1947 = vmatprep.mubr.f32.mxu1 %v1233_v20  ;;  %v1292_v0 = vld [vmem:[#allocation2 + $0x370] sm:$0xff]  ;;  %v207_v19 = vld [vmem:[%s4197_s0 + $0x398] sm:$0xff] }
 0x182   :  { %v1297_v20 = vld [vmem:[#allocation2 + $0x398] sm:$0xff] }
 0x184   :  { %858 = vmatmul.mubr.f32.gmra.mrb[24].mxu0 %v142_v21  ;;  %1948 = vmatmul.mubr.f32.gmra.mrb[24].mxu1 %v1232_v22  ;;  %v206_v21 = vld [vmem:[%s4197_s0 + $0x390] sm:$0xff] }
 0x185   :  { %862 = vmatprep.mubr.f32.mxu0 %v147_v23  ;;  %1952 = vmatprep.mubr.f32.mxu1 %v1237_v24  ;;  %v1296_v22 = vld [vmem:[#allocation2 + $0x390] sm:$0xff]  ;;  %v211_v23 = vld [vmem:[%s4197_s0 + $0x3b8] sm:$0xff] }
 0x186   :  { %v1301_v24 = vld [vmem:[#allocation2 + $0x3b8] sm:$0xff] }
 0x188   :  { %863 = vmatmul.mubr.f32.gmra.mrb[26].mxu0 %v146_v25  ;;  %1953 = vmatmul.mubr.f32.gmra.mrb[26].mxu1 %v1236_v26  ;;  %v210_v25 = vld [vmem:[%s4197_s0 + $0x3b0] sm:$0xff] }
 0x189   :  { %867 = vmatprep.mubr.f32.mxu0 %v151_v27  ;;  %1957 = vmatprep.mubr.f32.mxu1 %v1241_v28  ;;  %v1300_v26 = vld [vmem:[#allocation2 + $0x3b0] sm:$0xff]  ;;  %v215_v27 = vld [vmem:[%s4197_s0 + $0x3d8] sm:$0xff] }
 0x18a   :  { %v1305_v28 = vld [vmem:[#allocation2 + $0x3d8] sm:$0xff] }
 0x18c   :  { %868 = vmatmul.mubr.f32.gmra.mrb[28].mxu0 %v150_v29  ;;  %1958 = vmatmul.mubr.f32.gmra.mrb[28].mxu1 %v1240_v30  ;;  %v214_v29 = vld [vmem:[%s4197_s0 + $0x3d0] sm:$0xff] }
 0x18d   :  { %872 = vmatprep.mubr.f32.mxu0 %v155_v31  ;;  %1962 = vmatprep.mubr.f32.mxu1 %v1245_v32  ;;  %v1304_v30 = vld [vmem:[#allocation2 + $0x3d0] sm:$0xff]  ;;  %v219_v31 = vld [vmem:[%s4197_s0 + $0x3f8] sm:$0xff] }
 0x18e   :  { %v1309_v32 = vld [vmem:[#allocation2 + $0x3f8] sm:$0xff] }
 0x190   :  { %873 = vmatmul.mubr.f32.gmra.mrb[30].mxu0 %v154_v33  ;;  %1963 = vmatmul.mubr.f32.gmra.mrb[30].mxu1 %v1244_v34  ;;  %v218_v33 = vld [vmem:[%s4197_s0 + $0x3f0] sm:$0xff] }
 0x191   :  { %877 = vmatprep.mubr.f32.mxu0 %v159_v35  ;;  %1967 = vmatprep.mubr.f32.mxu1 %v1249_v36  ;;  %v1308_v34 = vld [vmem:[#allocation2 + $0x3f0] sm:$0xff]  ;;  %v223_v35 = vld [vmem:[%s4197_s0 + $0x418] sm:$0xff] }
 0x192   :  { %v1313_v36 = vld [vmem:[#allocation2 + $0x418] sm:$0xff] }
 0x194   :  { %878 = vmatmul.mubr.f32.gmra.mrb[32].mxu0 %v158_v37  ;;  %1968 = vmatmul.mubr.f32.gmra.mrb[32].mxu1 %v1248_v38  ;;  %v222_v37 = vld [vmem:[%s4197_s0 + $0x410] sm:$0xff] }
 0x195   :  { %882 = vmatprep.mubr.f32.mxu0 %v163_v39  ;;  %1972 = vmatprep.mubr.f32.mxu1 %v1253_v40  ;;  %v1312_v38 = vld [vmem:[#allocation2 + $0x410] sm:$0xff]  ;;  %v227_v39 = vld [vmem:[%s4197_s0 + $0x438] sm:$0xff] }
 0x196   :  { %v1317_v40 = vld [vmem:[#allocation2 + $0x438] sm:$0xff] }
 0x198   :  { %883 = vmatmul.mubr.f32.gmra.mrb[34].mxu0 %v162_v41  ;;  %1973 = vmatmul.mubr.f32.gmra.mrb[34].mxu1 %v1252_v42  ;;  %v226_v41 = vld [vmem:[%s4197_s0 + $0x430] sm:$0xff] }
 0x199   :  { %887 = vmatprep.mubr.f32.mxu0 %v167_v43  ;;  %1977 = vmatprep.mubr.f32.mxu1 %v1257_v44  ;;  %v1316_v42 = vld [vmem:[#allocation2 + $0x430] sm:$0xff]  ;;  %v231_v43 = vld [vmem:[%s4197_s0 + $0x458] sm:$0xff] }
 0x19a   :  { %v1321_v44 = vld [vmem:[#allocation2 + $0x458] sm:$0xff] }
 0x19c   :  { %888 = vmatmul.mubr.f32.gmra.mrb[36].mxu0 %v166_v45  ;;  %1978 = vmatmul.mubr.f32.gmra.mrb[36].mxu1 %v1256_v46  ;;  %v230_v45 = vld [vmem:[%s4197_s0 + $0x450] sm:$0xff] }
 0x19d   :  { %892 = vmatprep.mubr.f32.mxu0 %v171_v47  ;;  %1982 = vmatprep.mubr.f32.mxu1 %v1261_v48  ;;  %v1320_v46 = vld [vmem:[#allocation2 + $0x450] sm:$0xff]  ;;  %v235_v47 = vld [vmem:[%s4197_s0 + $0x478] sm:$0xff] }
 0x19e   :  { %v1325_v48 = vld [vmem:[#allocation2 + $0x478] sm:$0xff] }
 0x1a0   :  { %893 = vmatmul.mubr.f32.gmra.mrb[38].mxu0 %v170_v49  ;;  %1983 = vmatmul.mubr.f32.gmra.mrb[38].mxu1 %v1260_v50  ;;  %v234_v49 = vld [vmem:[%s4197_s0 + $0x470] sm:$0xff] }
 0x1a1   :  { %897 = vmatprep.mubr.f32.mxu0 %v175_v51  ;;  %1987 = vmatprep.mubr.f32.mxu1 %v1265_v52  ;;  %v1324_v50 = vld [vmem:[#allocation2 + $0x470] sm:$0xff]  ;;  %v239_v51 = vld [vmem:[%s4197_s0 + $0x498] sm:$0xff] }
 0x1a2   :  { %v1329_v52 = vld [vmem:[#allocation2 + $0x498] sm:$0xff] }
 0x1a4   :  { %898 = vmatmul.mubr.f32.gmra.mrb[40].mxu0 %v174_v53  ;;  %1988 = vmatmul.mubr.f32.gmra.mrb[40].mxu1 %v1264_v54  ;;  %v238_v53 = vld [vmem:[%s4197_s0 + $0x490] sm:$0xff] }
 0x1a5   :  { %902 = vmatprep.mubr.f32.mxu0 %v179_v55  ;;  %1992 = vmatprep.mubr.f32.mxu1 %v1269_v56  ;;  %v1328_v54 = vld [vmem:[#allocation2 + $0x490] sm:$0xff]  ;;  %v243_v55 = vld [vmem:[%s4197_s0 + $0x4b8] sm:$0xff] }
 0x1a6   :  { %v1333_v56 = vld [vmem:[#allocation2 + $0x4b8] sm:$0xff] }
 0x1a8   :  { %903 = vmatmul.mubr.f32.gmra.mrb[42].mxu0 %v178_v57  ;;  %1993 = vmatmul.mubr.f32.gmra.mrb[42].mxu1 %v1268_v58  ;;  %v242_v57 = vld [vmem:[%s4197_s0 + $0x4b0] sm:$0xff] }
 0x1a9   :  { %907 = vmatprep.mubr.f32.mxu0 %v183_v59  ;;  %1997 = vmatprep.mubr.f32.mxu1 %v1273_v60  ;;  %v1332_v58 = vld [vmem:[#allocation2 + $0x4b0] sm:$0xff]  ;;  %v247_v59 = vld [vmem:[%s4197_s0 + $0x4d8] sm:$0xff] }
 0x1aa   :  { %v1337_v60 = vld [vmem:[#allocation2 + $0x4d8] sm:$0xff] }
 0x1ac   :  { %908 = vmatmul.mubr.f32.gmra.mrb[44].mxu0 %v182_v61  ;;  %1998 = vmatmul.mubr.f32.gmra.mrb[44].mxu1 %v1272_v62  ;;  %v246_v61 = vld [vmem:[%s4197_s0 + $0x4d0] sm:$0xff] }
 0x1ad   :  { %912 = vmatprep.mubr.f32.mxu0 %v187_v63  ;;  %2002 = vmatprep.mubr.f32.mxu1 %v1277_v1  ;;  %v1336_v62 = vld [vmem:[#allocation2 + $0x4d0] sm:$0xff]  ;;  %v251_v63 = vld [vmem:[%s4197_s0 + $0x4f8] sm:$0xff] }
 0x1ae   :  { %v1341_v1 = vld [vmem:[#allocation2 + $0x4f8] sm:$0xff] }
 0x1b0   :  { %913 = vmatmul.mubr.f32.gmra.mrb[46].mxu0 %v186_v2  ;;  %2003 = vmatmul.mubr.f32.gmra.mrb[46].mxu1 %v1276_v3  ;;  %v250_v2 = vld [vmem:[%s4197_s0 + $0x4f0] sm:$0xff] }
 0x1b1   :  { %917 = vmatprep.mubr.f32.mxu0 %v191_v4  ;;  %2007 = vmatprep.mubr.f32.mxu1 %v1281_v5  ;;  %v1340_v3 = vld [vmem:[#allocation2 + $0x4f0] sm:$0xff]  ;;  %v255_v4 = vld [vmem:[%s4197_s0 + $0x518] sm:$0xff] }
 0x1b2   :  { %v1345_v5 = vld [vmem:[#allocation2 + $0x518] sm:$0xff] }
 0x1b4   :  { %918 = vmatmul.mubr.f32.gmra.mrb[48].mxu0 %v190_v6  ;;  %2008 = vmatmul.mubr.f32.gmra.mrb[48].mxu1 %v1280_v7  ;;  %v254_v6 = vld [vmem:[%s4197_s0 + $0x510] sm:$0xff] }
 0x1b5   :  { %922 = vmatprep.mubr.f32.mxu0 %v195_v8  ;;  %2012 = vmatprep.mubr.f32.mxu1 %v1285_v9  ;;  %v1344_v7 = vld [vmem:[#allocation2 + $0x510] sm:$0xff]  ;;  %v259_v8 = vld [vmem:[%s4197_s0 + $0x538] sm:$0xff] }
 0x1b6   :  { %v1349_v9 = vld [vmem:[#allocation2 + $0x538] sm:$0xff] }
 0x1b8   :  { %923 = vmatmul.mubr.f32.gmra.mrb[50].mxu0 %v194_v10  ;;  %2013 = vmatmul.mubr.f32.gmra.mrb[50].mxu1 %v1284_v11  ;;  %v258_v10 = vld [vmem:[%s4197_s0 + $0x530] sm:$0xff] }
 0x1b9   :  { %927 = vmatprep.mubr.f32.mxu0 %v199_v12  ;;  %2017 = vmatprep.mubr.f32.mxu1 %v1289_v13  ;;  %v1348_v11 = vld [vmem:[#allocation2 + $0x530] sm:$0xff]  ;;  %v263_v12 = vld [vmem:[%s4197_s0 + $0x558] sm:$0xff] }
 0x1ba   :  { %v1353_v13 = vld [vmem:[#allocation2 + $0x558] sm:$0xff] }
 0x1bc   :  { %928 = vmatmul.mubr.f32.gmra.mrb[52].mxu0 %v198_v14  ;;  %2018 = vmatmul.mubr.f32.gmra.mrb[52].mxu1 %v1288_v15  ;;  %v262_v14 = vld [vmem:[%s4197_s0 + $0x550] sm:$0xff] }
 0x1bd   :  { %932 = vmatprep.mubr.f32.mxu0 %v203_v16  ;;  %2022 = vmatprep.mubr.f32.mxu1 %v1293_v17  ;;  %v1352_v15 = vld [vmem:[#allocation2 + $0x550] sm:$0xff]  ;;  %v267_v16 = vld [vmem:[%s4197_s0 + $0x578] sm:$0xff] }
 0x1be   :  { %v1357_v17 = vld [vmem:[#allocation2 + $0x578] sm:$0xff] }
 0x1c0   :  { %933 = vmatmul.mubr.f32.gmra.mrb[54].mxu0 %v202_v18  ;;  %2023 = vmatmul.mubr.f32.gmra.mrb[54].mxu1 %v1292_v0  ;;  %v266_v18 = vld [vmem:[%s4197_s0 + $0x570] sm:$0xff] }
 0x1c1   :  { %937 = vmatprep.mubr.f32.mxu0 %v207_v19  ;;  %2027 = vmatprep.mubr.f32.mxu1 %v1297_v20  ;;  %v1356_v0 = vld [vmem:[#allocation2 + $0x570] sm:$0xff]  ;;  %v271_v19 = vld [vmem:[%s4197_s0 + $0x598] sm:$0xff] }
 0x1c2   :  { %v1361_v20 = vld [vmem:[#allocation2 + $0x598] sm:$0xff] }
 0x1c4   :  { %938 = vmatmul.mubr.f32.gmra.mrb[56].mxu0 %v206_v21  ;;  %2028 = vmatmul.mubr.f32.gmra.mrb[56].mxu1 %v1296_v22  ;;  %v270_v21 = vld [vmem:[%s4197_s0 + $0x590] sm:$0xff] }
 0x1c5   :  { %942 = vmatprep.mubr.f32.mxu0 %v211_v23  ;;  %2032 = vmatprep.mubr.f32.mxu1 %v1301_v24  ;;  %v1360_v22 = vld [vmem:[#allocation2 + $0x590] sm:$0xff]  ;;  %v275_v23 = vld [vmem:[%s4197_s0 + $0x5b8] sm:$0xff] }
 0x1c6   :  { %v1365_v24 = vld [vmem:[#allocation2 + $0x5b8] sm:$0xff] }
 0x1c8   :  { %943 = vmatmul.mubr.f32.gmra.mrb[58].mxu0 %v210_v25  ;;  %2033 = vmatmul.mubr.f32.gmra.mrb[58].mxu1 %v1300_v26  ;;  %v274_v25 = vld [vmem:[%s4197_s0 + $0x5b0] sm:$0xff] }
 0x1c9   :  { %947 = vmatprep.mubr.f32.mxu0 %v215_v27  ;;  %2037 = vmatprep.mubr.f32.mxu1 %v1305_v28  ;;  %v1364_v26 = vld [vmem:[#allocation2 + $0x5b0] sm:$0xff]  ;;  %v279_v27 = vld [vmem:[%s4197_s0 + $0x5d8] sm:$0xff] }
 0x1ca   :  { %v1369_v28 = vld [vmem:[#allocation2 + $0x5d8] sm:$0xff] }
 0x1cc   :  { %948 = vmatmul.mubr.f32.gmra.mrb[60].mxu0 %v214_v29  ;;  %2038 = vmatmul.mubr.f32.gmra.mrb[60].mxu1 %v1304_v30  ;;  %v278_v29 = vld [vmem:[%s4197_s0 + $0x5d0] sm:$0xff] }
 0x1cd   :  { %952 = vmatprep.mubr.f32.mxu0 %v219_v31  ;;  %2042 = vmatprep.mubr.f32.mxu1 %v1309_v32  ;;  %v1368_v30 = vld [vmem:[#allocation2 + $0x5d0] sm:$0xff]  ;;  %v283_v31 = vld [vmem:[%s4197_s0 + $0x5f8] sm:$0xff] }
 0x1ce   :  { %v1373_v32 = vld [vmem:[#allocation2 + $0x5f8] sm:$0xff] }
 0x1d0   :  { %953 = vmatmul.mubr.f32.gmra.mrb[62].mxu0 %v218_v33  ;;  %2043 = vmatmul.mubr.f32.gmra.mrb[62].mxu1 %v1308_v34  ;;  %v282_v33 = vld [vmem:[%s4197_s0 + $0x5f0] sm:$0xff] }
 0x1d1   :  { %957 = vmatprep.mubr.f32.mxu0 %v223_v35  ;;  %2047 = vmatprep.mubr.f32.mxu1 %v1313_v36  ;;  %v1372_v34 = vld [vmem:[#allocation2 + $0x5f0] sm:$0xff]  ;;  %v287_v35 = vld [vmem:[%s4197_s0 + $0x618] sm:$0xff] }
 0x1d2   :  { %v1377_v36 = vld [vmem:[#allocation2 + $0x618] sm:$0xff] }
 0x1d4   :  { %958 = vmatmul.mubr.f32.gmra.mrb[64].mxu0 %v222_v37  ;;  %2048 = vmatmul.mubr.f32.gmra.mrb[64].mxu1 %v1312_v38  ;;  %v286_v37 = vld [vmem:[%s4197_s0 + $0x610] sm:$0xff] }
 0x1d5   :  { %962 = vmatprep.mubr.f32.mxu0 %v227_v39  ;;  %2052 = vmatprep.mubr.f32.mxu1 %v1317_v40  ;;  %v1376_v38 = vld [vmem:[#allocation2 + $0x610] sm:$0xff]  ;;  %v291_v39 = vld [vmem:[%s4197_s0 + $0x638] sm:$0xff] }
 0x1d6   :  { %v1381_v40 = vld [vmem:[#allocation2 + $0x638] sm:$0xff] }
 0x1d8   :  { %963 = vmatmul.mubr.f32.gmra.mrb[66].mxu0 %v226_v41  ;;  %2053 = vmatmul.mubr.f32.gmra.mrb[66].mxu1 %v1316_v42  ;;  %v290_v41 = vld [vmem:[%s4197_s0 + $0x630] sm:$0xff] }
 0x1d9   :  { %967 = vmatprep.mubr.f32.mxu0 %v231_v43  ;;  %2057 = vmatprep.mubr.f32.mxu1 %v1321_v44  ;;  %v1380_v42 = vld [vmem:[#allocation2 + $0x630] sm:$0xff]  ;;  %v295_v43 = vld [vmem:[%s4197_s0 + $0x658] sm:$0xff] }
 0x1da   :  { %v1385_v44 = vld [vmem:[#allocation2 + $0x658] sm:$0xff] }
 0x1dc   :  { %968 = vmatmul.mubr.f32.gmra.mrb[68].mxu0 %v230_v45  ;;  %2058 = vmatmul.mubr.f32.gmra.mrb[68].mxu1 %v1320_v46  ;;  %v294_v45 = vld [vmem:[%s4197_s0 + $0x650] sm:$0xff] }
 0x1dd   :  { %972 = vmatprep.mubr.f32.mxu0 %v235_v47  ;;  %2062 = vmatprep.mubr.f32.mxu1 %v1325_v48  ;;  %v1384_v46 = vld [vmem:[#allocation2 + $0x650] sm:$0xff]  ;;  %v299_v47 = vld [vmem:[%s4197_s0 + $0x678] sm:$0xff] }
 0x1de   :  { %v1389_v48 = vld [vmem:[#allocation2 + $0x678] sm:$0xff] }
 0x1e0   :  { %973 = vmatmul.mubr.f32.gmra.mrb[70].mxu0 %v234_v49  ;;  %2063 = vmatmul.mubr.f32.gmra.mrb[70].mxu1 %v1324_v50  ;;  %v298_v49 = vld [vmem:[%s4197_s0 + $0x670] sm:$0xff] }
 0x1e1   :  { %977 = vmatprep.mubr.f32.mxu0 %v239_v51  ;;  %2067 = vmatprep.mubr.f32.mxu1 %v1329_v52  ;;  %v1388_v50 = vld [vmem:[#allocation2 + $0x670] sm:$0xff]  ;;  %v303_v51 = vld [vmem:[%s4197_s0 + $0x698] sm:$0xff] }
 0x1e2   :  { %v1393_v52 = vld [vmem:[#allocation2 + $0x698] sm:$0xff] }
 0x1e4   :  { %978 = vmatmul.mubr.f32.gmra.mrb[72].mxu0 %v238_v53  ;;  %2068 = vmatmul.mubr.f32.gmra.mrb[72].mxu1 %v1328_v54  ;;  %v302_v53 = vld [vmem:[%s4197_s0 + $0x690] sm:$0xff] }
 0x1e5   :  { %982 = vmatprep.mubr.f32.mxu0 %v243_v55  ;;  %2072 = vmatprep.mubr.f32.mxu1 %v1333_v56  ;;  %v1392_v54 = vld [vmem:[#allocation2 + $0x690] sm:$0xff]  ;;  %v307_v55 = vld [vmem:[%s4197_s0 + $0x6b8] sm:$0xff] }
 0x1e6   :  { %v1397_v56 = vld [vmem:[#allocation2 + $0x6b8] sm:$0xff] }
 0x1e8   :  { %983 = vmatmul.mubr.f32.gmra.mrb[74].mxu0 %v242_v57  ;;  %2073 = vmatmul.mubr.f32.gmra.mrb[74].mxu1 %v1332_v58  ;;  %v306_v57 = vld [vmem:[%s4197_s0 + $0x6b0] sm:$0xff] }
 0x1e9   :  { %987 = vmatprep.mubr.f32.mxu0 %v247_v59  ;;  %2077 = vmatprep.mubr.f32.mxu1 %v1337_v60  ;;  %v1396_v58 = vld [vmem:[#allocation2 + $0x6b0] sm:$0xff]  ;;  %v311_v59 = vld [vmem:[%s4197_s0 + $0x6d8] sm:$0xff] }
 0x1ea   :  { %v1401_v60 = vld [vmem:[#allocation2 + $0x6d8] sm:$0xff] }
 0x1ec   :  { %988 = vmatmul.mubr.f32.gmra.mrb[76].mxu0 %v246_v61  ;;  %2078 = vmatmul.mubr.f32.gmra.mrb[76].mxu1 %v1336_v62 }
 0x1ed   :  { %992 = vmatprep.mubr.f32.mxu0 %v251_v63  ;;  %2082 = vmatprep.mubr.f32.mxu1 %v1341_v1 }
 0x1f0   :  { %993 = vmatmul.mubr.f32.gmra.mrb[78].mxu0 %v250_v2  ;;  %2083 = vmatmul.mubr.f32.gmra.mrb[78].mxu1 %v1340_v3  ;;  %v310_v2 = vld [vmem:[%s4197_s0 + $0x6d0] sm:$0xff] }
 0x1f1   :  { %997 = vmatprep.mubr.f32.mxu0 %v255_v4  ;;  %2087 = vmatprep.mubr.f32.mxu1 %v1345_v5  ;;  %v1400_v3 = vld [vmem:[#allocation2 + $0x6d0] sm:$0xff]  ;;  %v315_v4 = vld [vmem:[%s4197_s0 + $0x6f8] sm:$0xff] }
 0x1f2   :  { %v1405_v5 = vld [vmem:[#allocation2 + $0x6f8] sm:$0xff] }
 0x1f4   :  { %998 = vmatmul.mubr.f32.gmra.mrb[80].mxu0 %v254_v6  ;;  %2088 = vmatmul.mubr.f32.gmra.mrb[80].mxu1 %v1344_v7 }
 0x1f5   :  { %1002 = vmatprep.mubr.f32.mxu0 %v259_v8  ;;  %2092 = vmatprep.mubr.f32.mxu1 %v1349_v9 }
 0x1f8   :  { %1003 = vmatmul.mubr.f32.gmra.mrb[82].mxu0 %v258_v10  ;;  %2093 = vmatmul.mubr.f32.gmra.mrb[82].mxu1 %v1348_v11  ;;  %v314_v10 = vld [vmem:[%s4197_s0 + $0x6f0] sm:$0xff] }
 0x1f9   :  { %1007 = vmatprep.mubr.f32.mxu0 %v263_v12  ;;  %2097 = vmatprep.mubr.f32.mxu1 %v1353_v13  ;;  %v1404_v11 = vld [vmem:[#allocation2 + $0x6f0] sm:$0xff]  ;;  %v319_v12 = vld [vmem:[%s4197_s0 + $0x718] sm:$0xff] }
 0x1fa   :  { %v1409_v13 = vld [vmem:[#allocation2 + $0x718] sm:$0xff] }
 0x1fc   :  { %1008 = vmatmul.mubr.f32.gmra.mrb[84].mxu0 %v262_v14  ;;  %2098 = vmatmul.mubr.f32.gmra.mrb[84].mxu1 %v1352_v15 }
 0x1fd   :  { %1012 = vmatprep.mubr.f32.mxu0 %v267_v16  ;;  %2102 = vmatprep.mubr.f32.mxu1 %v1357_v17 }
 0x200   :  { %1013 = vmatmul.mubr.f32.gmra.mrb[86].mxu0 %v266_v18  ;;  %2103 = vmatmul.mubr.f32.gmra.mrb[86].mxu1 %v1356_v0  ;;  %v318_v18 = vld [vmem:[%s4197_s0 + $0x710] sm:$0xff] }
 0x201   :  { %1017 = vmatprep.mubr.f32.mxu0 %v271_v19  ;;  %2107 = vmatprep.mubr.f32.mxu1 %v1361_v20  ;;  %v1408_v0 = vld [vmem:[#allocation2 + $0x710] sm:$0xff]  ;;  %v323_v19 = vld [vmem:[%s4197_s0 + $0x738] sm:$0xff] }
 0x202   :  { %v1413_v20 = vld [vmem:[#allocation2 + $0x738] sm:$0xff] }
 0x204   :  { %1018 = vmatmul.mubr.f32.gmra.mrb[88].mxu0 %v270_v21  ;;  %2108 = vmatmul.mubr.f32.gmra.mrb[88].mxu1 %v1360_v22 }
 0x205   :  { %1022 = vmatprep.mubr.f32.mxu0 %v275_v23  ;;  %2112 = vmatprep.mubr.f32.mxu1 %v1365_v24 }
 0x208   :  { %1023 = vmatmul.mubr.f32.gmra.mrb[90].mxu0 %v274_v25  ;;  %2113 = vmatmul.mubr.f32.gmra.mrb[90].mxu1 %v1364_v26  ;;  %v322_v25 = vld [vmem:[%s4197_s0 + $0x730] sm:$0xff] }
 0x209   :  { %1027 = vmatprep.mubr.f32.mxu0 %v279_v27  ;;  %2117 = vmatprep.mubr.f32.mxu1 %v1369_v28  ;;  %v1412_v26 = vld [vmem:[#allocation2 + $0x730] sm:$0xff]  ;;  %v327_v27 = vld [vmem:[%s4197_s0 + $0x758] sm:$0xff] }
 0x20a   :  { %v1417_v28 = vld [vmem:[#allocation2 + $0x758] sm:$0xff] }
 0x20c   :  { %1028 = vmatmul.mubr.f32.gmra.mrb[92].mxu0 %v278_v29  ;;  %2118 = vmatmul.mubr.f32.gmra.mrb[92].mxu1 %v1368_v30 }
 0x20d   :  { %1032 = vmatprep.mubr.f32.mxu0 %v283_v31  ;;  %2122 = vmatprep.mubr.f32.mxu1 %v1373_v32 }
 0x210   :  { %1033 = vmatmul.mubr.f32.gmra.mrb[94].mxu0 %v282_v33  ;;  %2123 = vmatmul.mubr.f32.gmra.mrb[94].mxu1 %v1372_v34  ;;  %v326_v33 = vld [vmem:[%s4197_s0 + $0x750] sm:$0xff] }
 0x211   :  { %1037 = vmatprep.mubr.f32.mxu0 %v287_v35  ;;  %2127 = vmatprep.mubr.f32.mxu1 %v1377_v36  ;;  %v1416_v34 = vld [vmem:[#allocation2 + $0x750] sm:$0xff]  ;;  %v331_v35 = vld [vmem:[%s4197_s0 + $0x778] sm:$0xff] }
 0x212   :  { %v1421_v36 = vld [vmem:[#allocation2 + $0x778] sm:$0xff] }
 0x214   :  { %1038 = vmatmul.mubr.f32.gmra.mrb[96].mxu0 %v286_v37  ;;  %2128 = vmatmul.mubr.f32.gmra.mrb[96].mxu1 %v1376_v38 }
 0x215   :  { %1042 = vmatprep.mubr.f32.mxu0 %v291_v39  ;;  %2132 = vmatprep.mubr.f32.mxu1 %v1381_v40 }
 0x218   :  { %1043 = vmatmul.mubr.f32.gmra.mrb[98].mxu0 %v290_v41  ;;  %2133 = vmatmul.mubr.f32.gmra.mrb[98].mxu1 %v1380_v42  ;;  %v330_v41 = vld [vmem:[%s4197_s0 + $0x770] sm:$0xff] }
 0x219   :  { %1047 = vmatprep.mubr.f32.mxu0 %v295_v43  ;;  %2137 = vmatprep.mubr.f32.mxu1 %v1385_v44  ;;  %v1420_v42 = vld [vmem:[#allocation2 + $0x770] sm:$0xff]  ;;  %v335_v43 = vld [vmem:[%s4197_s0 + $0x798] sm:$0xff] }
 0x21a   :  { %v1425_v44 = vld [vmem:[#allocation2 + $0x798] sm:$0xff] }
 0x21c   :  { %1048 = vmatmul.mubr.f32.gmra.mrb[100].mxu0 %v294_v45  ;;  %2138 = vmatmul.mubr.f32.gmra.mrb[100].mxu1 %v1384_v46 }
 0x21d   :  { %1052 = vmatprep.mubr.f32.mxu0 %v299_v47  ;;  %2142 = vmatprep.mubr.f32.mxu1 %v1389_v48 }
 0x220   :  { %1053 = vmatmul.mubr.f32.gmra.mrb[102].mxu0 %v298_v49  ;;  %2143 = vmatmul.mubr.f32.gmra.mrb[102].mxu1 %v1388_v50  ;;  %v334_v49 = vld [vmem:[%s4197_s0 + $0x790] sm:$0xff] }
 0x221   :  { %1057 = vmatprep.mubr.f32.mxu0 %v303_v51  ;;  %2147 = vmatprep.mubr.f32.mxu1 %v1393_v52  ;;  %v1424_v50 = vld [vmem:[#allocation2 + $0x790] sm:$0xff]  ;;  %v339_v51 = vld [vmem:[%s4197_s0 + $0x7b8] sm:$0xff] }
 0x222   :  { %v1429_v52 = vld [vmem:[#allocation2 + $0x7b8] sm:$0xff] }
 0x224   :  { %1058 = vmatmul.mubr.f32.gmra.mrb[104].mxu0 %v302_v53  ;;  %2148 = vmatmul.mubr.f32.gmra.mrb[104].mxu1 %v1392_v54 }
 0x225   :  { %1062 = vmatprep.mubr.f32.mxu0 %v307_v55  ;;  %2152 = vmatprep.mubr.f32.mxu1 %v1397_v56 }
 0x227   :  { %v799_v61 = vpop.f32.mrb[0].mxu0  ;;  %v1889_v62 = vpop.f32.mrb[0].mxu1 }
 0x228   :  { %1118 = vst [vmem:[%s4200_s3] sm:$0xff] %v799_v61  ;;  %2208 = vst [vmem:[%s4200_s3 + $0x8] sm:$0xff] %v1889_v62  ;;  %v801_v63 = vpop.f32.mrb[1].mxu0  ;;  %1063 = vmatmul.mubr.f32.gmra.mrb[106].mxu0 %v306_v57  ;;  %v1891_v1 = vpop.f32.mrb[1].mxu1  ;;  %2153 = vmatmul.mubr.f32.gmra.mrb[106].mxu1 %v1396_v58  ;;  %v338_v57 = vld [vmem:[%s4197_s0 + $0x7b0] sm:$0xff] }
 0x229   :  { %1067 = vmatprep.mubr.f32.mxu0 %v311_v59  ;;  %2157 = vmatprep.mubr.f32.mxu1 %v1401_v60  ;;  %v1428_v58 = vld [vmem:[#allocation2 + $0x7b0] sm:$0xff]  ;;  %v343_v59 = vld [vmem:[%s4197_s0 + $0x7d8] sm:$0xff] }
 0x22a   :  { %v1433_v60 = vld [vmem:[#allocation2 + $0x7d8] sm:$0xff] }
 0x22b   :  { %v804_v6 = vpop.f32.mrb[2].mxu0  ;;  %v1894_v7 = vpop.f32.mrb[2].mxu1 }
 0x22c   :  { %1119 = vst [vmem:[%s4200_s3 + $0x10] sm:$0xff] %v804_v6  ;;  %2209 = vst [vmem:[%s4200_s3 + $0x18] sm:$0xff] %v1894_v7  ;;  %v806_v8 = vpop.f32.mrb[3].mxu0  ;;  %1068 = vmatmul.mubr.f32.gmra.mrb[108].mxu0 %v310_v2  ;;  %v1896_v9 = vpop.f32.mrb[3].mxu1  ;;  %2158 = vmatmul.mubr.f32.gmra.mrb[108].mxu1 %v1400_v3  ;;  %v342_v2 = vld [vmem:[%s4197_s0 + $0x7d0] sm:$0xff] }
 0x22d   :  { %1072 = vmatprep.mubr.f32.mxu0 %v315_v4  ;;  %2162 = vmatprep.mubr.f32.mxu1 %v1405_v5  ;;  %v1432_v3 = vld [vmem:[#allocation2 + $0x7d0] sm:$0xff]  ;;  %v347_v4 = vld [vmem:[%s4197_s0 + $0x7f8] sm:$0xff] }
 0x22e   :  { %v1437_v5 = vld [vmem:[#allocation2 + $0x7f8] sm:$0xff] }
 0x22f   :  { %v809_v14 = vpop.f32.mrb[4].mxu0  ;;  %v1899_v15 = vpop.f32.mrb[4].mxu1 }
 0x230   :  { %1120 = vst [vmem:[%s4200_s3 + $0x20] sm:$0xff] %v809_v14  ;;  %2210 = vst [vmem:[%s4200_s3 + $0x28] sm:$0xff] %v1899_v15  ;;  %v811_v16 = vpop.f32.mrb[5].mxu0  ;;  %1073 = vmatmul.mubr.f32.gmra.mrb[110].mxu0 %v314_v10  ;;  %v1901_v17 = vpop.f32.mrb[5].mxu1  ;;  %2163 = vmatmul.mubr.f32.gmra.mrb[110].mxu1 %v1404_v11  ;;  %v346_v10 = vld [vmem:[%s4197_s0 + $0x7f0] sm:$0xff] }
 0x231   :  { %1077 = vmatprep.mubr.f32.mxu0 %v319_v12  ;;  %2167 = vmatprep.mubr.f32.mxu1 %v1409_v13  ;;  %v1436_v11 = vld [vmem:[#allocation2 + $0x7f0] sm:$0xff] }
 0x233   :  { %v814_v21 = vpop.f32.mrb[6].mxu0  ;;  %v1904_v22 = vpop.f32.mrb[6].mxu1 }
 0x234   :  { %1121 = vst [vmem:[%s4200_s3 + $0x30] sm:$0xff] %v814_v21  ;;  %2211 = vst [vmem:[%s4200_s3 + $0x38] sm:$0xff] %v1904_v22  ;;  %v816_v23 = vpop.f32.mrb[7].mxu0  ;;  %1078 = vmatmul.mubr.f32.gmra.mrb[112].mxu0 %v318_v18  ;;  %v1906_v24 = vpop.f32.mrb[7].mxu1  ;;  %2168 = vmatmul.mubr.f32.gmra.mrb[112].mxu1 %v1408_v0 }
 0x235   :  { %1082 = vmatprep.mubr.f32.mxu0 %v323_v19  ;;  %2172 = vmatprep.mubr.f32.mxu1 %v1413_v20 }
 0x237   :  { %v819_v29 = vpop.f32.mrb[8].mxu0  ;;  %v1909_v30 = vpop.f32.mrb[8].mxu1 }
 0x238   :  { %1122 = vst [vmem:[%s4200_s3 + $0x40] sm:$0xff] %v819_v29  ;;  %2212 = vst [vmem:[%s4200_s3 + $0x48] sm:$0xff] %v1909_v30  ;;  %v821_v31 = vpop.f32.mrb[9].mxu0  ;;  %1083 = vmatmul.mubr.f32.gmra.mrb[114].mxu0 %v322_v25  ;;  %v1911_v32 = vpop.f32.mrb[9].mxu1  ;;  %2173 = vmatmul.mubr.f32.gmra.mrb[114].mxu1 %v1412_v26 }
 0x239   :  { %1087 = vmatprep.mubr.f32.mxu0 %v327_v27  ;;  %2177 = vmatprep.mubr.f32.mxu1 %v1417_v28 }
 0x23b   :  { %v824_v37 = vpop.f32.mrb[10].mxu0  ;;  %v1914_v38 = vpop.f32.mrb[10].mxu1 }
 0x23c   :  { %1123 = vst [vmem:[%s4200_s3 + $0x50] sm:$0xff] %v824_v37  ;;  %2213 = vst [vmem:[%s4200_s3 + $0x58] sm:$0xff] %v1914_v38  ;;  %v826_v39 = vpop.f32.mrb[11].mxu0  ;;  %1088 = vmatmul.mubr.f32.gmra.mrb[116].mxu0 %v326_v33  ;;  %v1916_v40 = vpop.f32.mrb[11].mxu1  ;;  %2178 = vmatmul.mubr.f32.gmra.mrb[116].mxu1 %v1416_v34 }
 0x23d   :  { %1092 = vmatprep.mubr.f32.mxu0 %v331_v35  ;;  %2182 = vmatprep.mubr.f32.mxu1 %v1421_v36 }
 0x23f   :  { %v829_v45 = vpop.f32.mrb[12].mxu0  ;;  %v1919_v46 = vpop.f32.mrb[12].mxu1 }
 0x240   :  { %1124 = vst [vmem:[%s4200_s3 + $0x60] sm:$0xff] %v829_v45  ;;  %2214 = vst [vmem:[%s4200_s3 + $0x68] sm:$0xff] %v1919_v46  ;;  %v831_v47 = vpop.f32.mrb[13].mxu0  ;;  %1093 = vmatmul.mubr.f32.gmra.mrb[118].mxu0 %v330_v41  ;;  %v1921_v48 = vpop.f32.mrb[13].mxu1  ;;  %2183 = vmatmul.mubr.f32.gmra.mrb[118].mxu1 %v1420_v42 }
 0x241   :  { %1097 = vmatprep.mubr.f32.mxu0 %v335_v43  ;;  %2187 = vmatprep.mubr.f32.mxu1 %v1425_v44 }
 0x243   :  { %v834_v53 = vpop.f32.mrb[14].mxu0  ;;  %v1924_v54 = vpop.f32.mrb[14].mxu1 }
 0x244   :  { %1125 = vst [vmem:[%s4200_s3 + $0x70] sm:$0xff] %v834_v53  ;;  %2215 = vst [vmem:[%s4200_s3 + $0x78] sm:$0xff] %v1924_v54  ;;  %v836_v55 = vpop.f32.mrb[15].mxu0  ;;  %1098 = vmatmul.mubr.f32.gmra.mrb[120].mxu0 %v334_v49  ;;  %v1926_v56 = vpop.f32.mrb[15].mxu1  ;;  %2188 = vmatmul.mubr.f32.gmra.mrb[120].mxu1 %v1424_v50 }
 0x245   :  { %1102 = vmatprep.mubr.f32.mxu0 %v339_v51  ;;  %2192 = vmatprep.mubr.f32.mxu1 %v1429_v52 }
 0x247   :  { %v839_v61 = vpop.f32.mrb[16].mxu0  ;;  %v1929_v62 = vpop.f32.mrb[16].mxu1 }
 0x248   :  { %1126 = vst [vmem:[%s4200_s3 + $0x80] sm:$0xff] %v839_v61  ;;  %2216 = vst [vmem:[%s4200_s3 + $0x88] sm:$0xff] %v1929_v62  ;;  %v841_v63 = vpop.f32.mrb[17].mxu0  ;;  %1103 = vmatmul.mubr.f32.gmra.mrb[122].mxu0 %v338_v57  ;;  %v1931_v1 = vpop.f32.mrb[17].mxu1  ;;  %2193 = vmatmul.mubr.f32.gmra.mrb[122].mxu1 %v1428_v58 }
 0x249   :  { %1107 = vmatprep.mubr.f32.mxu0 %v343_v59  ;;  %2197 = vmatprep.mubr.f32.mxu1 %v1433_v60 }
 0x24b   :  { %v844_v6 = vpop.f32.mrb[18].mxu0  ;;  %v1934_v7 = vpop.f32.mrb[18].mxu1 }
 0x24c   :  { %1127 = vst [vmem:[%s4200_s3 + $0x90] sm:$0xff] %v844_v6  ;;  %2217 = vst [vmem:[%s4200_s3 + $0x98] sm:$0xff] %v1934_v7  ;;  %v846_v8 = vpop.f32.mrb[19].mxu0  ;;  %1108 = vmatmul.mubr.f32.gmra.mrb[124].mxu0 %v342_v2  ;;  %v1936_v9 = vpop.f32.mrb[19].mxu1  ;;  %2198 = vmatmul.mubr.f32.gmra.mrb[124].mxu1 %v1432_v3 }
 0x24d   :  { %1112 = vmatprep.mubr.f32.mxu0 %v347_v4  ;;  %2202 = vmatprep.mubr.f32.mxu1 %v1437_v5 }
 0x24f   :  { %v849_v12 = vpop.f32.mrb[20].mxu0  ;;  %v1939_v13 = vpop.f32.mrb[20].mxu1 }
 0x250   :  { %1128 = vst [vmem:[%s4200_s3 + $0xa0] sm:$0xff] %v849_v12  ;;  %2218 = vst [vmem:[%s4200_s3 + $0xa8] sm:$0xff] %v1939_v13  ;;  %v851_v14 = vpop.f32.mrb[21].mxu0  ;;  %1113 = vmatmul.mubr.f32.gmra.mrb[126].mxu0 %v346_v10  ;;  %v1941_v15 = vpop.f32.mrb[21].mxu1  ;;  %2203 = vmatmul.mubr.f32.gmra.mrb[126].mxu1 %v1436_v11 }
 0x253   :  { %v854_v16 = vpop.f32.mrb[22].mxu0  ;;  %v1944_v17 = vpop.f32.mrb[22].mxu1 }
 0x254   :  { %1129 = vst [vmem:[%s4200_s3 + $0xb0] sm:$0xff] %v854_v16  ;;  %2219 = vst [vmem:[%s4200_s3 + $0xb8] sm:$0xff] %v1944_v17  ;;  %v856_v18 = vpop.f32.mrb[23].mxu0  ;;  %v1946_v0 = vpop.f32.mrb[23].mxu1 }
 0x257   :  { %v859_v19 = vpop.f32.mrb[24].mxu0  ;;  %v1949_v20 = vpop.f32.mrb[24].mxu1 }
 0x258   :  { %1130 = vst [vmem:[%s4200_s3 + $0xc0] sm:$0xff] %v859_v19  ;;  %2220 = vst [vmem:[%s4200_s3 + $0xc8] sm:$0xff] %v1949_v20  ;;  %v861_v21 = vpop.f32.mrb[25].mxu0  ;;  %v1951_v22 = vpop.f32.mrb[25].mxu1 }
 0x25b   :  { %v864_v23 = vpop.f32.mrb[26].mxu0  ;;  %v1954_v24 = vpop.f32.mrb[26].mxu1 }
 0x25c   :  { %1131 = vst [vmem:[%s4200_s3 + $0xd0] sm:$0xff] %v864_v23  ;;  %2221 = vst [vmem:[%s4200_s3 + $0xd8] sm:$0xff] %v1954_v24  ;;  %v866_v25 = vpop.f32.mrb[27].mxu0  ;;  %v1956_v26 = vpop.f32.mrb[27].mxu1 }
 0x25f   :  { %v869_v27 = vpop.f32.mrb[28].mxu0  ;;  %v1959_v28 = vpop.f32.mrb[28].mxu1 }
 0x260   :  { %1132 = vst [vmem:[%s4200_s3 + $0xe0] sm:$0xff] %v869_v27  ;;  %2222 = vst [vmem:[%s4200_s3 + $0xe8] sm:$0xff] %v1959_v28  ;;  %v871_v29 = vpop.f32.mrb[29].mxu0  ;;  %v1961_v30 = vpop.f32.mrb[29].mxu1 }
 0x263   :  { %v874_v31 = vpop.f32.mrb[30].mxu0  ;;  %v1964_v32 = vpop.f32.mrb[30].mxu1 }
 0x264   :  { %1133 = vst [vmem:[%s4200_s3 + $0xf0] sm:$0xff] %v874_v31  ;;  %2223 = vst [vmem:[%s4200_s3 + $0xf8] sm:$0xff] %v1964_v32  ;;  %v876_v33 = vpop.f32.mrb[31].mxu0  ;;  %v1966_v34 = vpop.f32.mrb[31].mxu1 }
 0x267   :  { %v879_v35 = vpop.f32.mrb[32].mxu0  ;;  %v1969_v36 = vpop.f32.mrb[32].mxu1 }
 0x268   :  { %1134 = vst [vmem:[%s4200_s3 + $0x100] sm:$0xff] %v879_v35  ;;  %2224 = vst [vmem:[%s4200_s3 + $0x108] sm:$0xff] %v1969_v36  ;;  %v881_v37 = vpop.f32.mrb[33].mxu0  ;;  %v1971_v38 = vpop.f32.mrb[33].mxu1 }
 0x26b   :  { %v884_v39 = vpop.f32.mrb[34].mxu0  ;;  %v1974_v40 = vpop.f32.mrb[34].mxu1 }
 0x26c   :  { %1135 = vst [vmem:[%s4200_s3 + $0x110] sm:$0xff] %v884_v39  ;;  %2225 = vst [vmem:[%s4200_s3 + $0x118] sm:$0xff] %v1974_v40  ;;  %v886_v41 = vpop.f32.mrb[35].mxu0  ;;  %v1976_v42 = vpop.f32.mrb[35].mxu1 }
 0x26f   :  { %v889_v43 = vpop.f32.mrb[36].mxu0  ;;  %v1979_v44 = vpop.f32.mrb[36].mxu1 }
 0x270   :  { %1136 = vst [vmem:[%s4200_s3 + $0x120] sm:$0xff] %v889_v43  ;;  %2226 = vst [vmem:[%s4200_s3 + $0x128] sm:$0xff] %v1979_v44  ;;  %v891_v45 = vpop.f32.mrb[37].mxu0  ;;  %v1981_v46 = vpop.f32.mrb[37].mxu1 }
 0x273   :  { %v894_v47 = vpop.f32.mrb[38].mxu0  ;;  %v1984_v48 = vpop.f32.mrb[38].mxu1 }
 0x274   :  { %1137 = vst [vmem:[%s4200_s3 + $0x130] sm:$0xff] %v894_v47  ;;  %2227 = vst [vmem:[%s4200_s3 + $0x138] sm:$0xff] %v1984_v48  ;;  %v896_v49 = vpop.f32.mrb[39].mxu0  ;;  %v1986_v50 = vpop.f32.mrb[39].mxu1 }
 0x277   :  { %v899_v51 = vpop.f32.mrb[40].mxu0  ;;  %v1989_v52 = vpop.f32.mrb[40].mxu1 }
 0x278   :  { %1138 = vst [vmem:[%s4200_s3 + $0x140] sm:$0xff] %v899_v51  ;;  %2228 = vst [vmem:[%s4200_s3 + $0x148] sm:$0xff] %v1989_v52  ;;  %v901_v53 = vpop.f32.mrb[41].mxu0  ;;  %v1991_v54 = vpop.f32.mrb[41].mxu1 }
 0x27b   :  { %v904_v55 = vpop.f32.mrb[42].mxu0  ;;  %v1994_v56 = vpop.f32.mrb[42].mxu1 }
 0x27c   :  { %1139 = vst [vmem:[%s4200_s3 + $0x150] sm:$0xff] %v904_v55  ;;  %2229 = vst [vmem:[%s4200_s3 + $0x158] sm:$0xff] %v1994_v56  ;;  %v906_v57 = vpop.f32.mrb[43].mxu0  ;;  %v1996_v58 = vpop.f32.mrb[43].mxu1 }
 0x27f   :  { %v909_v59 = vpop.f32.mrb[44].mxu0  ;;  %v1999_v60 = vpop.f32.mrb[44].mxu1 }
 0x280   :  { %1140 = vst [vmem:[%s4200_s3 + $0x160] sm:$0xff] %v909_v59  ;;  %2230 = vst [vmem:[%s4200_s3 + $0x168] sm:$0xff] %v1999_v60  ;;  %v911_v61 = vpop.f32.mrb[45].mxu0  ;;  %v2001_v62 = vpop.f32.mrb[45].mxu1 }
 0x283   :  { %v914_v63 = vpop.f32.mrb[46].mxu0  ;;  %v2004_v1 = vpop.f32.mrb[46].mxu1 }
 0x284   :  { %1141 = vst [vmem:[%s4200_s3 + $0x170] sm:$0xff] %v914_v63  ;;  %2231 = vst [vmem:[%s4200_s3 + $0x178] sm:$0xff] %v2004_v1  ;;  %v916_v2 = vpop.f32.mrb[47].mxu0  ;;  %v2006_v3 = vpop.f32.mrb[47].mxu1 }
 0x287   :  { %v919_v4 = vpop.f32.mrb[48].mxu0  ;;  %v2009_v5 = vpop.f32.mrb[48].mxu1 }
 0x288   :  { %1142 = vst [vmem:[%s4200_s3 + $0x180] sm:$0xff] %v919_v4  ;;  %2232 = vst [vmem:[%s4200_s3 + $0x188] sm:$0xff] %v2009_v5  ;;  %v921_v6 = vpop.f32.mrb[49].mxu0  ;;  %v2011_v7 = vpop.f32.mrb[49].mxu1 }
 0x28b   :  { %v924_v8 = vpop.f32.mrb[50].mxu0  ;;  %v2014_v9 = vpop.f32.mrb[50].mxu1 }
 0x28c   :  { %1143 = vst [vmem:[%s4200_s3 + $0x190] sm:$0xff] %v924_v8  ;;  %2233 = vst [vmem:[%s4200_s3 + $0x198] sm:$0xff] %v2014_v9  ;;  %v926_v10 = vpop.f32.mrb[51].mxu0  ;;  %v2016_v11 = vpop.f32.mrb[51].mxu1 }
 0x28f   :  { %v929_v12 = vpop.f32.mrb[52].mxu0  ;;  %v2019_v13 = vpop.f32.mrb[52].mxu1 }
 0x290   :  { %1144 = vst [vmem:[%s4200_s3 + $0x1a0] sm:$0xff] %v929_v12  ;;  %2234 = vst [vmem:[%s4200_s3 + $0x1a8] sm:$0xff] %v2019_v13  ;;  %v931_v14 = vpop.f32.mrb[53].mxu0  ;;  %v2021_v15 = vpop.f32.mrb[53].mxu1 }
 0x293   :  { %v934_v16 = vpop.f32.mrb[54].mxu0  ;;  %v2024_v17 = vpop.f32.mrb[54].mxu1 }
 0x294   :  { %1145 = vst [vmem:[%s4200_s3 + $0x1b0] sm:$0xff] %v934_v16  ;;  %2235 = vst [vmem:[%s4200_s3 + $0x1b8] sm:$0xff] %v2024_v17  ;;  %v936_v18 = vpop.f32.mrb[55].mxu0  ;;  %v2026_v0 = vpop.f32.mrb[55].mxu1 }
 0x297   :  { %v939_v19 = vpop.f32.mrb[56].mxu0  ;;  %v2029_v20 = vpop.f32.mrb[56].mxu1 }
 0x298   :  { %1146 = vst [vmem:[%s4200_s3 + $0x1c0] sm:$0xff] %v939_v19  ;;  %2236 = vst [vmem:[%s4200_s3 + $0x1c8] sm:$0xff] %v2029_v20  ;;  %v941_v21 = vpop.f32.mrb[57].mxu0  ;;  %v2031_v22 = vpop.f32.mrb[57].mxu1 }
 0x29b   :  { %v944_v23 = vpop.f32.mrb[58].mxu0  ;;  %v2034_v24 = vpop.f32.mrb[58].mxu1 }
 0x29c   :  { %1147 = vst [vmem:[%s4200_s3 + $0x1d0] sm:$0xff] %v944_v23  ;;  %2237 = vst [vmem:[%s4200_s3 + $0x1d8] sm:$0xff] %v2034_v24  ;;  %v946_v25 = vpop.f32.mrb[59].mxu0  ;;  %v2036_v26 = vpop.f32.mrb[59].mxu1 }
 0x29f   :  { %v949_v27 = vpop.f32.mrb[60].mxu0  ;;  %v2039_v28 = vpop.f32.mrb[60].mxu1 }
 0x2a0   :  { %1148 = vst [vmem:[%s4200_s3 + $0x1e0] sm:$0xff] %v949_v27  ;;  %2238 = vst [vmem:[%s4200_s3 + $0x1e8] sm:$0xff] %v2039_v28  ;;  %v951_v29 = vpop.f32.mrb[61].mxu0  ;;  %v2041_v30 = vpop.f32.mrb[61].mxu1 }
 0x2a3   :  { %v954_v31 = vpop.f32.mrb[62].mxu0  ;;  %v2044_v32 = vpop.f32.mrb[62].mxu1 }
 0x2a4   :  { %1149 = vst [vmem:[%s4200_s3 + $0x1f0] sm:$0xff] %v954_v31  ;;  %2239 = vst [vmem:[%s4200_s3 + $0x1f8] sm:$0xff] %v2044_v32  ;;  %v956_v33 = vpop.f32.mrb[63].mxu0  ;;  %v2046_v34 = vpop.f32.mrb[63].mxu1 }
 0x2a7   :  { %v959_v35 = vpop.f32.mrb[64].mxu0  ;;  %v2049_v36 = vpop.f32.mrb[64].mxu1 }
 0x2a8   :  { %1150 = vst [vmem:[%s4200_s3 + $0x200] sm:$0xff] %v959_v35  ;;  %2240 = vst [vmem:[%s4200_s3 + $0x208] sm:$0xff] %v2049_v36  ;;  %v961_v37 = vpop.f32.mrb[65].mxu0  ;;  %v2051_v38 = vpop.f32.mrb[65].mxu1 }
 0x2ab   :  { %v964_v39 = vpop.f32.mrb[66].mxu0  ;;  %v2054_v40 = vpop.f32.mrb[66].mxu1 }
 0x2ac   :  { %1151 = vst [vmem:[%s4200_s3 + $0x210] sm:$0xff] %v964_v39  ;;  %2241 = vst [vmem:[%s4200_s3 + $0x218] sm:$0xff] %v2054_v40  ;;  %v966_v41 = vpop.f32.mrb[67].mxu0  ;;  %v2056_v42 = vpop.f32.mrb[67].mxu1 }
 0x2af   :  { %v969_v43 = vpop.f32.mrb[68].mxu0  ;;  %v2059_v44 = vpop.f32.mrb[68].mxu1 }
 0x2b0   :  { %1152 = vst [vmem:[%s4200_s3 + $0x220] sm:$0xff] %v969_v43  ;;  %2242 = vst [vmem:[%s4200_s3 + $0x228] sm:$0xff] %v2059_v44  ;;  %v971_v45 = vpop.f32.mrb[69].mxu0  ;;  %v2061_v46 = vpop.f32.mrb[69].mxu1 }
 0x2b3   :  { %v974_v47 = vpop.f32.mrb[70].mxu0  ;;  %v2064_v48 = vpop.f32.mrb[70].mxu1 }
 0x2b4   :  { %1153 = vst [vmem:[%s4200_s3 + $0x230] sm:$0xff] %v974_v47  ;;  %2243 = vst [vmem:[%s4200_s3 + $0x238] sm:$0xff] %v2064_v48  ;;  %v976_v49 = vpop.f32.mrb[71].mxu0  ;;  %v2066_v50 = vpop.f32.mrb[71].mxu1 }
 0x2b7   :  { %v979_v51 = vpop.f32.mrb[72].mxu0  ;;  %v2069_v52 = vpop.f32.mrb[72].mxu1 }
 0x2b8   :  { %1154 = vst [vmem:[%s4200_s3 + $0x240] sm:$0xff] %v979_v51  ;;  %2244 = vst [vmem:[%s4200_s3 + $0x248] sm:$0xff] %v2069_v52  ;;  %v981_v53 = vpop.f32.mrb[73].mxu0  ;;  %v2071_v54 = vpop.f32.mrb[73].mxu1 }
 0x2bb   :  { %v984_v55 = vpop.f32.mrb[74].mxu0  ;;  %v2074_v56 = vpop.f32.mrb[74].mxu1 }
 0x2bc   :  { %1155 = vst [vmem:[%s4200_s3 + $0x250] sm:$0xff] %v984_v55  ;;  %2245 = vst [vmem:[%s4200_s3 + $0x258] sm:$0xff] %v2074_v56  ;;  %v986_v57 = vpop.f32.mrb[75].mxu0  ;;  %v2076_v58 = vpop.f32.mrb[75].mxu1 }
 0x2bf   :  { %v989_v59 = vpop.f32.mrb[76].mxu0  ;;  %v2079_v60 = vpop.f32.mrb[76].mxu1 }
 0x2c0   :  { %1156 = vst [vmem:[%s4200_s3 + $0x260] sm:$0xff] %v989_v59  ;;  %2246 = vst [vmem:[%s4200_s3 + $0x268] sm:$0xff] %v2079_v60  ;;  %v991_v61 = vpop.f32.mrb[77].mxu0  ;;  %v2081_v62 = vpop.f32.mrb[77].mxu1 }
 0x2c3   :  { %v994_v63 = vpop.f32.mrb[78].mxu0  ;;  %v2084_v1 = vpop.f32.mrb[78].mxu1 }
 0x2c4   :  { %1157 = vst [vmem:[%s4200_s3 + $0x270] sm:$0xff] %v994_v63  ;;  %2247 = vst [vmem:[%s4200_s3 + $0x278] sm:$0xff] %v2084_v1  ;;  %v996_v2 = vpop.f32.mrb[79].mxu0  ;;  %v2086_v3 = vpop.f32.mrb[79].mxu1 }
 0x2c7   :  { %v999_v4 = vpop.f32.mrb[80].mxu0  ;;  %v2089_v5 = vpop.f32.mrb[80].mxu1 }
 0x2c8   :  { %1158 = vst [vmem:[%s4200_s3 + $0x280] sm:$0xff] %v999_v4  ;;  %2248 = vst [vmem:[%s4200_s3 + $0x288] sm:$0xff] %v2089_v5  ;;  %v1001_v6 = vpop.f32.mrb[81].mxu0  ;;  %v2091_v7 = vpop.f32.mrb[81].mxu1 }
 0x2cb   :  { %v1004_v8 = vpop.f32.mrb[82].mxu0  ;;  %v2094_v9 = vpop.f32.mrb[82].mxu1 }
 0x2cc   :  { %1159 = vst [vmem:[%s4200_s3 + $0x290] sm:$0xff] %v1004_v8  ;;  %2249 = vst [vmem:[%s4200_s3 + $0x298] sm:$0xff] %v2094_v9  ;;  %v1006_v10 = vpop.f32.mrb[83].mxu0  ;;  %v2096_v11 = vpop.f32.mrb[83].mxu1 }
 0x2cf   :  { %v1009_v12 = vpop.f32.mrb[84].mxu0  ;;  %v2099_v13 = vpop.f32.mrb[84].mxu1 }
 0x2d0   :  { %1160 = vst [vmem:[%s4200_s3 + $0x2a0] sm:$0xff] %v1009_v12  ;;  %2250 = vst [vmem:[%s4200_s3 + $0x2a8] sm:$0xff] %v2099_v13  ;;  %v1011_v14 = vpop.f32.mrb[85].mxu0  ;;  %v2101_v15 = vpop.f32.mrb[85].mxu1 }
 0x2d3   :  { %v1014_v16 = vpop.f32.mrb[86].mxu0  ;;  %v2104_v17 = vpop.f32.mrb[86].mxu1 }
 0x2d4   :  { %1161 = vst [vmem:[%s4200_s3 + $0x2b0] sm:$0xff] %v1014_v16  ;;  %2251 = vst [vmem:[%s4200_s3 + $0x2b8] sm:$0xff] %v2104_v17  ;;  %v1016_v18 = vpop.f32.mrb[87].mxu0  ;;  %v2106_v0 = vpop.f32.mrb[87].mxu1 }
 0x2d7   :  { %v1019_v19 = vpop.f32.mrb[88].mxu0  ;;  %v2109_v20 = vpop.f32.mrb[88].mxu1 }
 0x2d8   :  { %1162 = vst [vmem:[%s4200_s3 + $0x2c0] sm:$0xff] %v1019_v19  ;;  %2252 = vst [vmem:[%s4200_s3 + $0x2c8] sm:$0xff] %v2109_v20  ;;  %v1021_v21 = vpop.f32.mrb[89].mxu0  ;;  %v2111_v22 = vpop.f32.mrb[89].mxu1 }
 0x2db   :  { %v1024_v23 = vpop.f32.mrb[90].mxu0  ;;  %v2114_v24 = vpop.f32.mrb[90].mxu1 }
 0x2dc   :  { %1163 = vst [vmem:[%s4200_s3 + $0x2d0] sm:$0xff] %v1024_v23  ;;  %2253 = vst [vmem:[%s4200_s3 + $0x2d8] sm:$0xff] %v2114_v24  ;;  %v1026_v25 = vpop.f32.mrb[91].mxu0  ;;  %v2116_v26 = vpop.f32.mrb[91].mxu1 }
 0x2df   :  { %v1029_v27 = vpop.f32.mrb[92].mxu0  ;;  %v2119_v28 = vpop.f32.mrb[92].mxu1 }
 0x2e0   :  { %1164 = vst [vmem:[%s4200_s3 + $0x2e0] sm:$0xff] %v1029_v27  ;;  %2254 = vst [vmem:[%s4200_s3 + $0x2e8] sm:$0xff] %v2119_v28  ;;  %v1031_v29 = vpop.f32.mrb[93].mxu0  ;;  %v2121_v30 = vpop.f32.mrb[93].mxu1 }
 0x2e3   :  { %v1034_v31 = vpop.f32.mrb[94].mxu0  ;;  %v2124_v32 = vpop.f32.mrb[94].mxu1 }
 0x2e4   :  { %1165 = vst [vmem:[%s4200_s3 + $0x2f0] sm:$0xff] %v1034_v31  ;;  %2255 = vst [vmem:[%s4200_s3 + $0x2f8] sm:$0xff] %v2124_v32  ;;  %v1036_v33 = vpop.f32.mrb[95].mxu0  ;;  %v2126_v34 = vpop.f32.mrb[95].mxu1 }
 0x2e7   :  { %v1039_v35 = vpop.f32.mrb[96].mxu0  ;;  %v2129_v36 = vpop.f32.mrb[96].mxu1 }
 0x2e8   :  { %1166 = vst [vmem:[%s4200_s3 + $0x300] sm:$0xff] %v1039_v35  ;;  %2256 = vst [vmem:[%s4200_s3 + $0x308] sm:$0xff] %v2129_v36  ;;  %v1041_v37 = vpop.f32.mrb[97].mxu0  ;;  %v2131_v38 = vpop.f32.mrb[97].mxu1 }
 0x2eb   :  { %v1044_v39 = vpop.f32.mrb[98].mxu0  ;;  %v2134_v40 = vpop.f32.mrb[98].mxu1 }
 0x2ec   :  { %1167 = vst [vmem:[%s4200_s3 + $0x310] sm:$0xff] %v1044_v39  ;;  %2257 = vst [vmem:[%s4200_s3 + $0x318] sm:$0xff] %v2134_v40  ;;  %v1046_v41 = vpop.f32.mrb[99].mxu0  ;;  %v2136_v42 = vpop.f32.mrb[99].mxu1 }
 0x2ef   :  { %v1049_v43 = vpop.f32.mrb[100].mxu0  ;;  %v2139_v44 = vpop.f32.mrb[100].mxu1 }
 0x2f0   :  { %1168 = vst [vmem:[%s4200_s3 + $0x320] sm:$0xff] %v1049_v43  ;;  %2258 = vst [vmem:[%s4200_s3 + $0x328] sm:$0xff] %v2139_v44  ;;  %v1051_v45 = vpop.f32.mrb[101].mxu0  ;;  %v2141_v46 = vpop.f32.mrb[101].mxu1 }
 0x2f3   :  { %v1054_v47 = vpop.f32.mrb[102].mxu0  ;;  %v2144_v48 = vpop.f32.mrb[102].mxu1 }
 0x2f4   :  { %1169 = vst [vmem:[%s4200_s3 + $0x330] sm:$0xff] %v1054_v47  ;;  %2259 = vst [vmem:[%s4200_s3 + $0x338] sm:$0xff] %v2144_v48  ;;  %v1056_v49 = vpop.f32.mrb[103].mxu0  ;;  %v2146_v50 = vpop.f32.mrb[103].mxu1 }
 0x2f7   :  { %v1059_v51 = vpop.f32.mrb[104].mxu0  ;;  %v2149_v52 = vpop.f32.mrb[104].mxu1 }
 0x2f8   :  { %1170 = vst [vmem:[%s4200_s3 + $0x340] sm:$0xff] %v1059_v51  ;;  %2260 = vst [vmem:[%s4200_s3 + $0x348] sm:$0xff] %v2149_v52  ;;  %v1061_v53 = vpop.f32.mrb[105].mxu0  ;;  %v2151_v54 = vpop.f32.mrb[105].mxu1 }
 0x2fb   :  { %v1064_v55 = vpop.f32.mrb[106].mxu0  ;;  %v2154_v56 = vpop.f32.mrb[106].mxu1 }
 0x2fc   :  { %1171 = vst [vmem:[%s4200_s3 + $0x350] sm:$0xff] %v1064_v55  ;;  %2261 = vst [vmem:[%s4200_s3 + $0x358] sm:$0xff] %v2154_v56  ;;  %v1066_v57 = vpop.f32.mrb[107].mxu0  ;;  %v2156_v58 = vpop.f32.mrb[107].mxu1 }
 0x2ff   :  { %v1069_v59 = vpop.f32.mrb[108].mxu0  ;;  %v2159_v60 = vpop.f32.mrb[108].mxu1 }
 0x300   :  { %1172 = vst [vmem:[%s4200_s3 + $0x360] sm:$0xff] %v1069_v59  ;;  %2262 = vst [vmem:[%s4200_s3 + $0x368] sm:$0xff] %v2159_v60  ;;  %v1071_v61 = vpop.f32.mrb[109].mxu0  ;;  %v2161_v62 = vpop.f32.mrb[109].mxu1 }
 0x303   :  { %v1074_v63 = vpop.f32.mrb[110].mxu0  ;;  %v2164_v1 = vpop.f32.mrb[110].mxu1 }
 0x304   :  { %1173 = vst [vmem:[%s4200_s3 + $0x370] sm:$0xff] %v1074_v63  ;;  %2263 = vst [vmem:[%s4200_s3 + $0x378] sm:$0xff] %v2164_v1  ;;  %v1076_v2 = vpop.f32.mrb[111].mxu0  ;;  %v2166_v3 = vpop.f32.mrb[111].mxu1 }
 0x307   :  { %v1079_v4 = vpop.f32.mrb[112].mxu0  ;;  %v2169_v5 = vpop.f32.mrb[112].mxu1 }
 0x308   :  { %1174 = vst [vmem:[%s4200_s3 + $0x380] sm:$0xff] %v1079_v4  ;;  %2264 = vst [vmem:[%s4200_s3 + $0x388] sm:$0xff] %v2169_v5  ;;  %v1081_v6 = vpop.f32.mrb[113].mxu0  ;;  %v2171_v7 = vpop.f32.mrb[113].mxu1 }
 0x30b   :  { %v1084_v8 = vpop.f32.mrb[114].mxu0  ;;  %v2174_v9 = vpop.f32.mrb[114].mxu1 }
 0x30c   :  { %1175 = vst [vmem:[%s4200_s3 + $0x390] sm:$0xff] %v1084_v8  ;;  %2265 = vst [vmem:[%s4200_s3 + $0x398] sm:$0xff] %v2174_v9  ;;  %v1086_v10 = vpop.f32.mrb[115].mxu0  ;;  %v2176_v11 = vpop.f32.mrb[115].mxu1 }
 0x30f   :  { %v1089_v12 = vpop.f32.mrb[116].mxu0  ;;  %v2179_v13 = vpop.f32.mrb[116].mxu1 }
 0x310   :  { %1176 = vst [vmem:[%s4200_s3 + $0x3a0] sm:$0xff] %v1089_v12  ;;  %2266 = vst [vmem:[%s4200_s3 + $0x3a8] sm:$0xff] %v2179_v13  ;;  %v1091_v14 = vpop.f32.mrb[117].mxu0  ;;  %v2181_v15 = vpop.f32.mrb[117].mxu1 }
 0x313   :  { %v1094_v16 = vpop.f32.mrb[118].mxu0  ;;  %v2184_v17 = vpop.f32.mrb[118].mxu1 }
 0x314   :  { %1177 = vst [vmem:[%s4200_s3 + $0x3b0] sm:$0xff] %v1094_v16  ;;  %2267 = vst [vmem:[%s4200_s3 + $0x3b8] sm:$0xff] %v2184_v17  ;;  %v1096_v18 = vpop.f32.mrb[119].mxu0  ;;  %v2186_v0 = vpop.f32.mrb[119].mxu1 }
 0x317   :  { %v1099_v19 = vpop.f32.mrb[120].mxu0  ;;  %v2189_v20 = vpop.f32.mrb[120].mxu1 }
 0x318   :  { %1178 = vst [vmem:[%s4200_s3 + $0x3c0] sm:$0xff] %v1099_v19  ;;  %2268 = vst [vmem:[%s4200_s3 + $0x3c8] sm:$0xff] %v2189_v20  ;;  %v1101_v21 = vpop.f32.mrb[121].mxu0  ;;  %v2191_v22 = vpop.f32.mrb[121].mxu1 }
 0x31b   :  { %v1104_v23 = vpop.f32.mrb[122].mxu0  ;;  %v2194_v24 = vpop.f32.mrb[122].mxu1 }
 0x31c   :  { %1179 = vst [vmem:[%s4200_s3 + $0x3d0] sm:$0xff] %v1104_v23  ;;  %2269 = vst [vmem:[%s4200_s3 + $0x3d8] sm:$0xff] %v2194_v24  ;;  %v1106_v25 = vpop.f32.mrb[123].mxu0  ;;  %v2196_v26 = vpop.f32.mrb[123].mxu1 }
 0x31f   :  { %v1109_v27 = vpop.f32.mrb[124].mxu0  ;;  %v2199_v28 = vpop.f32.mrb[124].mxu1 }
 0x320   :  { %1180 = vst [vmem:[%s4200_s3 + $0x3e0] sm:$0xff] %v1109_v27  ;;  %2270 = vst [vmem:[%s4200_s3 + $0x3e8] sm:$0xff] %v2199_v28  ;;  %v1111_v29 = vpop.f32.mrb[125].mxu0  ;;  %v2201_v30 = vpop.f32.mrb[125].mxu1 }
 0x323   :  { %v1114_v31 = vpop.f32.mrb[126].mxu0  ;;  %v2204_v32 = vpop.f32.mrb[126].mxu1 }
 0x324   :  { %1181 = vst [vmem:[%s4200_s3 + $0x3f0] sm:$0xff] %v1114_v31  ;;  %2271 = vst [vmem:[%s4200_s3 + $0x3f8] sm:$0xff] %v2204_v32  ;;  %v1116_v33 = vpop.f32.mrb[127].mxu0  ;;  %v2206_v34 = vpop.f32.mrb[127].mxu1 }
 0x325   :  { %2276 = vsyncpa [#allocation3], 1 }

</bundles_post_ra>
